<compile_context>
chip_gen: v5e
topology: v5e:2x2
jax: 0.10.0
libtpu: 0.0.40
codegen_flags: <defaults>
</compile_context>

<pallas_src>
import functools
import math

import jax
import jax.numpy as jnp
from jax import lax
from jax.experimental import pallas as pl
from jax.experimental.pallas import tpu as pltpu


# --------------------------- hardware queries --------------------------------
def _vmem_capacity_bytes():
    try:
        cap = int(pltpu.get_tpu_info().vmem_capacity_bytes)
        if cap > 0:
            return cap
    except Exception:
        pass
    return 64 * 1024 * 1024  # conservative default (v7x physical VMEM)


def _num_tensorcores():
    """Best-effort TensorCore count (2 on v7x / megacore, else 1)."""
    try:
        info = pltpu.get_tpu_info()
        for name in ("num_cores", "core_count", "num_tensorcores", "tensorcore_count"):
            v = getattr(info, name, None)
            if isinstance(v, int) and v >= 1:
                return v
    except Exception:
        pass
    try:
        v = getattr(jax.devices()[0], "num_cores", None)
        if isinstance(v, int) and v >= 1:
            return v
    except Exception:
        pass
    return 1


@functools.lru_cache(maxsize=1)
def _strided_lane_load_ok():
    """Probe: does ref[..., pl.ds(start, n, stride=k)] lower and read correctly?

    Prime this outside any jit trace (done in __main__).  Under a trace the
    probe conservatively reports False and the XLA-unshuffle fallback is used.
    """
    try:
        x = jnp.arange(2 * 8 * 64, dtype=jnp.float32).reshape(2, 8, 64)
        for start, size, stride in ((17, 8, 2), (51, 4, 4)):
            def kprobe(x_ref, o_ref, *, s=start, n=size, st=stride):
                o_ref[...] = x_ref[:, :, pl.ds(s, n, stride=st)]

            out = pl.pallas_call(
                kprobe,
                out_shape=jax.ShapeDtypeStruct((2, 8, size), jnp.float32))(x)
            out = jax.block_until_ready(out)
            want = x[:, :, start:start + size * stride:stride]
            if not bool(jnp.allclose(out, want)):
                return False
        return True
    except Exception:
        return False


# ----------------------------- Pallas kernel ---------------------------------
def _silog_scale_kernel(pred_ref, gt_ref, sq_ref, sd_ref, ct_ref, *,
                        r, w, ow, oh, toh, nblocks, nkp, max_depth,
                        gt_unshuffled, guard_overhang):
    p = pl.program_id(0)          # (possible) dual-TensorCore split
    k = pl.program_id(1)          # row-block reduction axis
    blk = p * nkp + k
    B = pred_ref.shape[0]

    @pl.when(k == 0)
    def _init():
        sq_ref[...] = jnp.zeros_like(sq_ref)
        sd_ref[...] = jnp.zeros_like(sd_ref)
        ct_ref[...] = jnp.zeros_like(ct_ref)

    def _sum2(x):                 # (B, toh, ow) f32 -> (B, 1)
        return jnp.sum(jnp.sum(x, axis=-1), axis=-1, keepdims=True)

    def _accumulate(row_ok):
        sq_acc = jnp.zeros((B, 1), jnp.float32)
        sd_acc = jnp.zeros((B, 1), jnp.float32)
        ct_acc = jnp.zeros((B, 1), jnp.float32)
        # TODO(synk): for very large r (>= 16) switch this unrolled Python loop
        # to a lax.fori_loop to keep compiled code size down.
        for dr in range(r):
            for dc in range(r):
                kk = dr * r + dc
                # Per-chunk loads stay in the inner loop (low register pressure).
                pch = pred_ref[:, kk, :, :].astype(jnp.float32)      # (B, toh, ow)
                if gt_unshuffled:
                    g = gt_ref[:, kk, :, :]
                elif r == 1:
                    g = gt_ref[...]
                else:
                    # On-chip pixel_unshuffle: static strided lane slice picks
                    # gts[b, 0, i*r+dr, j*r+dc] out of the contiguous gt rows.
                    g = gt_ref[:, :, pl.ds(dr * w + dc, ow, stride=r)]
                g = g.astype(jnp.float32)

                valid = jnp.logical_and(g > 0.1, g < max_depth)
                if row_ok is not None:
                    valid = jnp.logical_and(valid, row_ok)
                diff = jnp.log(pch) - jnp.log(g)
                keep = jnp.logical_and(valid, jnp.abs(diff) > 0.001)
                d = jnp.where(keep, diff, 0.0)

                # Per-chunk reduction to (B, 1): no full-width VMEM accumulators,
                # no store-slot pressure; the reduce rides the idle XLU slot.
                sq_acc = sq_acc + _sum2(d * d)
                sd_acc = sd_acc + _sum2(d)
                ct_acc = ct_acc + _sum2(valid.astype(jnp.float32))
        sq_ref[0, :, :] += sq_acc
        sd_ref[0, :, :] += sd_acc
        ct_ref[0, :, :] += ct_acc

    ragged = (oh % toh) != 0
    if ragged:
        last = nblocks - 1
        # Steady state runs unmasked; only the true last row block is masked.
        @pl.when(blk < last)
        def _steady():
            _accumulate(None)

        @pl.when(blk == last)
        def _tail():
            rows = lax.broadcasted_iota(jnp.int32, (1, toh, 1), 1)
            _accumulate((blk * toh + rows) < oh)
    elif guard_overhang:
        @pl.when(blk < nblocks)
        def _guarded():
            _accumulate(None)
    else:
        _accumulate(None)


# ------------------------------ host wrapper ----------------------------------
def _choose_row_block(oh, per_row_bytes, budget):
    cap_rows = max(1, budget // max(per_row_bytes, 1))
    if cap_rows >= oh or oh <= 8:
        return oh
    cap8 = max(8, (cap_rows // 8) * 8)
    cap8 = min(cap8, (oh // 8) * 8)
    for cand in range(cap8, 7, -8):
        if oh % cand == 0:
            return cand            # exact divisor -> no ragged tail
    return cap8                    # ragged tail, masked on the last block only


def _silog_scale_stats(pred, gts, max_depth, *, row_block=None):
    """Per-batch (sum d^2, sum d, valid count) for one prediction scale.

    pred: (B, r*r, oh, ow); gts: (B, 1, oh*r, ow*r).  Matches the torch
    reference's pixel_unshuffle + masked-log-diff statistics, computed in a
    single HBM pass over pred and gts (the unshuffle alignment is on-chip).
    """
    B, C, oh, ow = map(int, pred.shape)
    r = int(round(math.sqrt(C)))
    assert r * r == C, "prediction channel count must be a perfect square"
    gB, gC, H, W = map(int, gts.shape)
    # TODO(synk): like the torch reference, this assumes a single gt channel.
    assert gB == B and gC == 1 and H == oh * r and W == ow * r, (pred.shape, gts.shape)
    w = W

    fused = (r == 1) or _strided_lane_load_ok()
    if fused:
        gt_in = gts.reshape(B, oh, r * w)       # free (contiguous) reshape
    else:
        # Fallback: one XLA transpose per scale (still no concatenate copies).
        gt_in = pixel_unshuffle(gts, r)          # (B, r*r, oh, ow)

    itemsize = max(pred.dtype.itemsize, gts.dtype.itemsize)
    vmem_cap = _vmem_capacity_bytes()
    budget = int(0.35 * vmem_cap)
    # pred row + gt row (double-buffered) + in-kernel f32 temporaries per row.
    per_row = 2 * 2 * B * C * ow * itemsize + 32 * B * ow
    toh = int(row_block) if row_block is not None else _choose_row_block(oh, per_row, budget)
    toh = max(1, min(toh, oh))
    assert toh == oh or toh % 8 == 0, "row block must be a multiple of 8 or the full height"

    nblocks = int(pl.cdiv(oh, toh))
    cores = _num_tensorcores()
    P = 2 if (cores >= 2 and nblocks >= 2) else 1
    nkp = int(pl.cdiv(nblocks, P))
    guard_overhang = (P * nkp) > nblocks

    footprint = 2 * 2 * B * C * toh * ow * itemsize + 32 * B * toh * ow + (1 << 20)
    vmem_limit = int(min(0.85 * vmem_cap, max(32 << 20, 2 * footprint + (8 << 20))))

    def _blk_idx(p_, k_):
        return jnp.minimum(p_ * nkp + k_, nblocks - 1)

    pred_shape = (B, C, toh, ow)
    pred_imap = lambda p_, k_: (0, 0, _blk_idx(p_, k_), 0)
    if fused:
        gt_shape = (B, toh, r * w)
        gt_imap = lambda p_, k_: (0, _blk_idx(p_, k_), 0)
    else:
        gt_shape = (B, C, toh, ow)
        gt_imap = pred_imap

    # Deeper input buffering when the per-step tile is small (hides per-step
    # pipeline overhead); skipped if this jax build lacks the API.
    block_bytes = B * C * toh * ow * itemsize
    multibuffer = (nkp >= 4) and (block_bytes < (2 << 20))

    def _in_spec(shape, imap):
        if multibuffer and hasattr(pl, "Buffered"):
            try:
                return pl.BlockSpec(shape, imap, pipeline_mode=pl.Buffered(3))
            except Exception:
                pass
        return pl.BlockSpec(shape, imap)

    kernel = functools.partial(
        _silog_scale_kernel,
        r=r, w=w, ow=ow, oh=oh, toh=toh, nblocks=nblocks, nkp=nkp,
        max_depth=float(max_depth), gt_unshuffled=not fused,
        guard_overhang=bool(guard_overhang))

    out_stat = jax.ShapeDtypeStruct((P, B, 1), jnp.float32)
    out_spec = pl.BlockSpec((1, B, 1), lambda p_, k_: (p_, 0, 0))

    sq, sd, ct = pl.pallas_call(
        kernel,
        out_shape=[out_stat, out_stat, out_stat],
        grid_spec=pltpu.PrefetchScalarGridSpec(
            num_scalar_prefetch=0,
            grid=(P, nkp),
            in_specs=[_in_spec(pred_shape, pred_imap),
                      _in_spec(gt_shape, gt_imap)],
            out_specs=[out_spec, out_spec, out_spec],
        ),
        compiler_params=pltpu.CompilerParams(
            dimension_semantics=("parallel", "arbitrary"),
            vmem_limit_bytes=vmem_limit,
        ),
    )(pred, gt_in)

    # Fold the (possible) dual-core partials: (P, B, 1) -> (B,).
    return sq.sum(axis=0)[:, 0], sd.sum(axis=0)[:, 0], ct.sum(axis=0)[:, 0]


# ------------------------------- JAX glue -------------------------------------
def pixel_unshuffle(fm, r):
    """NCHW space-to-depth, identical semantics to the PyTorch helper."""
    b, c, h, w = fm.shape
    oh, ow = h // r, w // r
    x = fm.reshape(b, c, oh, r, ow, r)
    x = jnp.transpose(x, (0, 1, 3, 5, 2, 4))
    return x.reshape(b, c * r * r, oh, ow)


def silog_loss(feat, gts, si_loss_lambda, max_depth):
    """Forward pass of SILogLoss; feat is a dict of NCHW depth predictions."""
    total_pixels = gts.shape[1] * gts.shape[2] * gts.shape[3]
    loss = jnp.float32(0.0)
    for key in feat:
        pred = feat[key]
        sumsq, sumd, cnt = _silog_scale_stats(pred, gts, max_depth)
        # NOTE: cnt is accumulated in f32 (exact up to 2^24 pixels per image).
        num_pixels = cnt + 1e-6
        loss1 = sumsq / num_pixels - si_loss_lambda * (sumd / num_pixels) ** 2
        weight = num_pixels / total_pixels
        loss = loss + jnp.sum(loss1 * weight)
    return loss


# pure-JAX reference (mirrors the PyTorch code line by line) for sanity checks
def silog_loss_ref(feat, gts, si_loss_lambda, max_depth):
    loss = jnp.float32(0.0)
    for key in feat:
        pred = feat[key].astype(jnp.float32)
        r = int(round(math.sqrt(pred.shape[1])))
        gt = pixel_unshuffle(gts, r).astype(jnp.float32)
        diff = jnp.log(pred) - jnp.log(gt)
        valid = (gt > 0.1) & (gt < max_depth)
        diff = jnp.where(valid & (jnp.abs(diff) > 0.001), diff, jnp.zeros_like(diff))
        b = diff.shape[0]
        diff = diff.reshape(b, -1)
        num_pixels = valid.reshape(b, -1).sum(axis=-1).astype(jnp.float32) + 1e-6
        loss1 = (diff ** 2).sum(axis=-1) / num_pixels
        loss1 = loss1 - si_loss_lambda * (diff.sum(axis=-1) / num_pixels) ** 2
        total_pixels = gt.shape[1] * gt.shape[2] * gt.shape[3]
        weight = num_pixels / total_pixels
        loss = loss + jnp.sum(loss1 * weight)
    return loss


def _scale_stats_ref(pred, gts, max_depth):
    r = int(round(math.sqrt(pred.shape[1])))
    gt = pixel_unshuffle(gts, r).astype(jnp.float32)
    p = pred.astype(jnp.float32).reshape(pred.shape[0], -1)
    g = gt.reshape(gt.shape[0], -1)
    diff = jnp.log(p) - jnp.log(g)
    valid = (g > 0.1) & (g < max_depth)
    d = jnp.where(valid & (jnp.abs(diff) > 0.001), diff, 0.0)
    return (d * d).sum(-1), d.sum(-1), valid.sum(-1).astype(jnp.float32)


if __name__ == "__main__":
    SI_LOSS_LAMBDA = 0.85
    MAX_DEPTH = 10.0

    # Prime the strided-lane-load capability probe outside of any jit trace.
    _ = _strided_lane_load_ok()

    key = jax.random.PRNGKey(0)
    k1, k2, k3, k4, k5 = jax.random.split(key, 5)

    # gts: [B, 1, 16, 16]; two prediction scales (C = r^2 -> r = 2 and r = 4).
    B = 2
    gts = jax.random.uniform(k1, (B, 1, 16, 16), jnp.float32, minval=0.05, maxval=12.0)
    feat = {
        "scale_2": jax.random.uniform(k2, (B, 4, 8, 8), jnp.float32, minval=0.5, maxval=9.0),
        "scale_4": jax.random.uniform(k3, (B, 16, 4, 4), jnp.float32, minval=0.5, maxval=9.0),
    }

    loss_fn = jax.jit(silog_loss, static_argnames=("si_loss_lambda", "max_depth"))
    out = jax.block_until_ready(
        loss_fn(feat, gts, si_loss_lambda=SI_LOSS_LAMBDA, max_depth=MAX_DEPTH))
    ref = jax.block_until_ready(silog_loss_ref(feat, gts, SI_LOSS_LAMBDA, MAX_DEPTH))
    assert jnp.allclose(out, ref, rtol=1e-4, atol=1e-5), (out, ref)

    # Exercise the multi-row-block / dual-core split / ragged-tail kernel paths.
    gts2 = jax.random.uniform(k4, (B, 1, 48, 16), jnp.float32, minval=0.05, maxval=12.0)
    pred2 = jax.random.uniform(k5, (B, 4, 24, 8), jnp.float32, minval=0.5, maxval=9.0)
    want = [jax.block_until_ready(x) for x in _scale_stats_ref(pred2, gts2, MAX_DEPTH)]
    for rb in (16, 8):   # 16 -> ragged last block (24 % 16 != 0); 8 -> exact split
        got = _silog_scale_stats(pred2, gts2, MAX_DEPTH, row_block=rb)
        for a, b_ in zip(got, want):
            a = jax.block_until_ready(a)
            assert jnp.allclose(a, b_, rtol=2e-4, atol=1e-3), (rb, a, b_)

    # bf16 inputs: the kernel DMAs bf16 and upcasts in-register.
    feat16 = {kk: v.astype(jnp.bfloat16) for kk, v in feat.items()}
    gts16 = gts.astype(jnp.bfloat16)
    out16 = jax.block_until_ready(
        loss_fn(feat16, gts16, si_loss_lambda=SI_LOSS_LAMBDA, max_depth=MAX_DEPTH))
    ref16 = jax.block_until_ready(silog_loss_ref(feat16, gts16, SI_LOSS_LAMBDA, MAX_DEPTH))
    assert jnp.allclose(out16, ref16, rtol=2e-3, atol=2e-3), (out16, ref16)

    print("KERNEL_OK")
</pallas_src>

<mosaic_0001>
module attributes {stable_mosaic.version = 11 : i64} {
  func.func @kprobe(%arg0: memref<2x8x64xf32, #tpu.memory_space<vmem>>, %arg1: memref<2x8x8xf32, #tpu.memory_space<vmem>>) attributes {dimension_semantics = [], scalar_prefetch = 0 : i64, scratch_operands = 0 : i64, tpu.core_type = #tpu.core_type<tc>} {
    %c0 = arith.constant 0 : index
    %c0_0 = arith.constant 0 : index
    %c17 = arith.constant 17 : index
    %0 = tpu.strided_load %arg0[%c0, %c0_0, %c17] {strides = array<i32: 1, 1, 2>} : memref<2x8x64xf32, #tpu.memory_space<vmem>>, vector<2x8x8xf32>
    %c0_1 = arith.constant 0 : index
    %c0_2 = arith.constant 0 : index
    %c0_3 = arith.constant 0 : index
    %1 = vector.load %arg1[%c0_1, %c0_2, %c0_3] : memref<2x8x8xf32, #tpu.memory_space<vmem>>, vector<2x8x8xf32>
    tpu.vector_store %arg1[%c0_1, %c0_2, %c0_3], %0 {strides = array<i32>} : memref<2x8x8xf32, #tpu.memory_space<vmem>>, vector<2x8x8xf32>,
    return
  }
}

module attributes {stable_mosaic.version = 11 : i64} {
  func.func @_silog_scale_kernel(%arg0: i32, %arg1: i32, %arg2: memref<2x16x4x4xf32, #tpu.memory_space<vmem>>, %arg3: memref<2x16x4x4xf32, #tpu.memory_space<vmem>>, %arg4: memref<1x2x1xf32, #tpu.memory_space<vmem>>, %arg5: memref<1x2x1xf32, #tpu.memory_space<vmem>>, %arg6: memref<1x2x1xf32, #tpu.memory_space<vmem>>) attributes {dimension_semantics = [#tpu.dimension_semantics<parallel>, #tpu.dimension_semantics<arbitrary>], iteration_bounds = array<i64: 1, 1>, scalar_prefetch = 0 : i64, scratch_operands = 0 : i64, tpu.core_type = #tpu.core_type<tc>, window_params = [{transform_indices = @transform_0, window_bounds = array<i64: 2, 16, 4, 4>}, {transform_indices = @transform_1, window_bounds = array<i64: 2, 16, 4, 4>}, {transform_indices = @transform_2, window_bounds = array<i64: 1, 2, 1>}, {transform_indices = @transform_3, window_bounds = array<i64: 1, 2, 1>}, {transform_indices = @transform_4, window_bounds = array<i64: 1, 2, 1>}]} {
    %c0_i32 = arith.constant 0 : i32
    %0 = arith.cmpi eq, %arg1, %c0_i32 : i32
    %1 = arith.extui %0 : i1 to i32
    %c0_i32_0 = arith.constant 0 : i32
    %2 = arith.cmpi ne, %1, %c0_i32_0 : i32
    scf.if %2 {
      %cst_293 = arith.constant 0.000000e+00 : f32
      %552 = vector.broadcast %cst_293 : f32 to vector<1x2x1xf32>
      %c0_294 = arith.constant 0 : index
      %c0_295 = arith.constant 0 : index
      %c0_296 = arith.constant 0 : index
      %553 = vector.load %arg4[%c0_294, %c0_295, %c0_296] : memref<1x2x1xf32, #tpu.memory_space<vmem>>, vector<1x2x1xf32>
      tpu.vector_store %arg4[%c0_294, %c0_295, %c0_296], %552 {strides = array<i32>} : memref<1x2x1xf32, #tpu.memory_space<vmem>>, vector<1x2x1xf32>,
      %cst_297 = arith.constant 0.000000e+00 : f32
      %554 = vector.broadcast %cst_297 : f32 to vector<1x2x1xf32>
      %c0_298 = arith.constant 0 : index
      %c0_299 = arith.constant 0 : index
      %c0_300 = arith.constant 0 : index
      %555 = vector.load %arg5[%c0_298, %c0_299, %c0_300] : memref<1x2x1xf32, #tpu.memory_space<vmem>>, vector<1x2x1xf32>
      tpu.vector_store %arg5[%c0_298, %c0_299, %c0_300], %554 {strides = array<i32>} : memref<1x2x1xf32, #tpu.memory_space<vmem>>, vector<1x2x1xf32>,
      %cst_301 = arith.constant 0.000000e+00 : f32
      %556 = vector.broadcast %cst_301 : f32 to vector<1x2x1xf32>
      %c0_302 = arith.constant 0 : index
      %c0_303 = arith.constant 0 : index
      %c0_304 = arith.constant 0 : index
      %557 = vector.load %arg6[%c0_302, %c0_303, %c0_304] : memref<1x2x1xf32, #tpu.memory_space<vmem>>, vector<1x2x1xf32>
      tpu.vector_store %arg6[%c0_302, %c0_303, %c0_304], %556 {strides = array<i32>} : memref<1x2x1xf32, #tpu.memory_space<vmem>>, vector<1x2x1xf32>,
    } else {
    }
    %cst = arith.constant 0.000000e+00 : f32
    %3 = vector.broadcast %cst : f32 to vector<2x1xf32>
    %cst_1 = arith.constant 0.000000e+00 : f32
    %4 = vector.broadcast %cst_1 : f32 to vector<2x1xf32>
    %cst_2 = arith.constant 0.000000e+00 : f32
    %5 = vector.broadcast %cst_2 : f32 to vector<2x1xf32>
    %c0 = arith.constant 0 : index
    %c0_3 = arith.constant 0 : index
    %c0_4 = arith.constant 0 : index
    %c0_5 = arith.constant 0 : index
    %6 = vector.load %arg2[%c0, %c0_3, %c0_4, %c0_5] : memref<2x16x4x4xf32, #tpu.memory_space<vmem>>, vector<2x1x4x4xf32>
    %7 = vector.shape_cast %6 : vector<2x1x4x4xf32> to vector<2x4x4xf32>
    %c0_6 = arith.constant 0 : index
    %c0_7 = arith.constant 0 : index
    %c0_8 = arith.constant 0 : index
    %c0_9 = arith.constant 0 : index
    %8 = vector.load %arg3[%c0_6, %c0_7, %c0_8, %c0_9] : memref<2x16x4x4xf32, #tpu.memory_space<vmem>>, vector<2x1x4x4xf32>
    %9 = vector.shape_cast %8 : vector<2x1x4x4xf32> to vector<2x4x4xf32>
    %cst_10 = arith.constant 1.000000e-01 : f32
    %10 = vector.broadcast %cst_10 : f32 to vector<2x4x4xf32>
    %11 = arith.cmpf ogt, %9, %10 : vector<2x4x4xf32>
    %cst_11 = arith.constant 1.000000e+01 : f32
    %12 = vector.broadcast %cst_11 : f32 to vector<2x4x4xf32>
    %13 = arith.cmpf olt, %9, %12 : vector<2x4x4xf32>
    %14 = arith.andi %11, %13 : vector<2x4x4xi1>
    %15 = math.log %7 : vector<2x4x4xf32>
    %16 = math.log %9 : vector<2x4x4xf32>
    %17 = arith.subf %15, %16 : vector<2x4x4xf32>
    %18 = math.absf %17 : vector<2x4x4xf32>
    %cst_12 = arith.constant 1.000000e-03 : f32
    %19 = vector.broadcast %cst_12 : f32 to vector<2x4x4xf32>
    %20 = arith.cmpf ogt, %18, %19 : vector<2x4x4xf32>
    %21 = arith.andi %14, %20 : vector<2x4x4xi1>
    %cst_13 = arith.constant 0.000000e+00 : f32
    %22 = vector.broadcast %cst_13 : f32 to vector<2x4x4xf32>
    %23 = arith.select %21, %17, %22 : vector<2x4x4xi1>, vector<2x4x4xf32>
    %24 = arith.mulf %23, %23 : vector<2x4x4xf32>
    %cst_14 = arith.constant dense<0.000000e+00> : vector<2x4xf32>
    %25 = vector.multi_reduction <add>, %24, %cst_14 [2] : vector<2x4x4xf32> to vector<2x4xf32>
    %cst_15 = arith.constant dense<0.000000e+00> : vector<2xf32>
    %26 = vector.multi_reduction <add>, %25, %cst_15 [1] : vector<2x4xf32> to vector<2xf32>
    %27 = vector.shape_cast %26 : vector<2xf32> to vector<2x1xf32>
    %28 = arith.addf %3, %27 : vector<2x1xf32>
    %cst_16 = arith.constant dense<0.000000e+00> : vector<2x4xf32>
    %29 = vector.multi_reduction <add>, %23, %cst_16 [2] : vector<2x4x4xf32> to vector<2x4xf32>
    %cst_17 = arith.constant dense<0.000000e+00> : vector<2xf32>
    %30 = vector.multi_reduction <add>, %29, %cst_17 [1] : vector<2x4xf32> to vector<2xf32>
    %31 = vector.shape_cast %30 : vector<2xf32> to vector<2x1xf32>
    %32 = arith.addf %4, %31 : vector<2x1xf32>
    %33 = arith.extui %14 : vector<2x4x4xi1> to vector<2x4x4xi32>
    %34 = arith.sitofp %33 : vector<2x4x4xi32> to vector<2x4x4xf32>
    %cst_18 = arith.constant dense<0.000000e+00> : vector<2x4xf32>
    %35 = vector.multi_reduction <add>, %34, %cst_18 [2] : vector<2x4x4xf32> to vector<2x4xf32>
    %cst_19 = arith.constant dense<0.000000e+00> : vector<2xf32>
    %36 = vector.multi_reduction <add>, %35, %cst_19 [1] : vector<2x4xf32> to vector<2xf32>
    %37 = vector.shape_cast %36 : vector<2xf32> to vector<2x1xf32>
    %38 = arith.addf %5, %37 : vector<2x1xf32>
    %c0_20 = arith.constant 0 : index
    %c1 = arith.constant 1 : index
    %c0_21 = arith.constant 0 : index
    %c0_22 = arith.constant 0 : index
    %39 = vector.load %arg2[%c0_20, %c1, %c0_21, %c0_22] : memref<2x16x4x4xf32, #tpu.memory_space<vmem>>, vector<2x1x4x4xf32>
    %40 = vector.shape_cast %39 : vector<2x1x4x4xf32> to vector<2x4x4xf32>
    %c0_23 = arith.constant 0 : index
    %c1_24 = arith.constant 1 : index
    %c0_25 = arith.constant 0 : index
    %c0_26 = arith.constant 0 : index
    %41 = vector.load %arg3[%c0_23, %c1_24, %c0_25, %c0_26] : memref<2x16x4x4xf32, #tpu.memory_space<vmem>>, vector<2x1x4x4xf32>
    %42 = vector.shape_cast %41 : vector<2x1x4x4xf32> to vector<2x4x4xf32>
    %cst_27 = arith.constant 1.000000e-01 : f32
    %43 = vector.broadcast %cst_27 : f32 to vector<2x4x4xf32>
    %44 = arith.cmpf ogt, %42, %43 : vector<2x4x4xf32>
    %cst_28 = arith.constant 1.000000e+01 : f32
    %45 = vector.broadcast %cst_28 : f32 to vector<2x4x4xf32>
    %46 = arith.cmpf olt, %42, %45 : vector<2x4x4xf32>
    %47 = arith.andi %44, %46 : vector<2x4x4xi1>
    %48 = math.log %40 : vector<2x4x4xf32>
    %49 = math.log %42 : vector<2x4x4xf32>
    %50 = arith.subf %48, %49 : vector<2x4x4xf32>
    %51 = math.absf %50 : vector<2x4x4xf32>
    %cst_29 = arith.constant 1.000000e-03 : f32
    %52 = vector.broadcast %cst_29 : f32 to vector<2x4x4xf32>
    %53 = arith.cmpf ogt, %51, %52 : vector<2x4x4xf32>
    %54 = arith.andi %47, %53 : vector<2x4x4xi1>
    %cst_30 = arith.constant 0.000000e+00 : f32
    %55 = vector.broadcast %cst_30 : f32 to vector<2x4x4xf32>
    %56 = arith.select %54, %50, %55 : vector<2x4x4xi1>, vector<2x4x4xf32>
    %57 = arith.mulf %56, %56 : vector<2x4x4xf32>
    %cst_31 = arith.constant dense<0.000000e+00> : vector<2x4xf32>
    %58 = vector.multi_reduction <add>, %57, %cst_31 [2] : vector<2x4x4xf32> to vector<2x4xf32>
    %cst_32 = arith.constant dense<0.000000e+00> : vector<2xf32>
    %59 = vector.multi_reduction <add>, %58, %cst_32 [1] : vector<2x4xf32> to vector<2xf32>
    %60 = vector.shape_cast %59 : vector<2xf32> to vector<2x1xf32>
    %61 = arith.addf %28, %60 : vector<2x1xf32>
    %cst_33 = arith.constant dense<0.000000e+00> : vector<2x4xf32>
    %62 = vector.multi_reduction <add>, %56, %cst_33 [2] : vector<2x4x4xf32> to vector<2x4xf32>
    %cst_34 = arith.constant dense<0.000000e+00> : vector<2xf32>
    %63 = vector.multi_reduction <add>, %62, %cst_34 [1] : vector<2x4xf32> to vector<2xf32>
    %64 = vector.shape_cast %63 : vector<2xf32> to vector<2x1xf32>
    %65 = arith.addf %32, %64 : vector<2x1xf32>
    %66 = arith.extui %47 : vector<2x4x4xi1> to vector<2x4x4xi32>
    %67 = arith.sitofp %66 : vector<2x4x4xi32> to vector<2x4x4xf32>
    %cst_35 = arith.constant dense<0.000000e+00> : vector<2x4xf32>
    %68 = vector.multi_reduction <add>, %67, %cst_35 [2] : vector<2x4x4xf32> to vector<2x4xf32>
    %cst_36 = arith.constant dense<0.000000e+00> : vector<2xf32>
    %69 = vector.multi_reduction <add>, %68, %cst_36 [1] : vector<2x4xf32> to vector<2xf32>
    %70 = vector.shape_cast %69 : vector<2xf32> to vector<2x1xf32>
    %71 = arith.addf %38, %70 : vector<2x1xf32>
    %c0_37 = arith.constant 0 : index
    %c2 = arith.constant 2 : index
    %c0_38 = arith.constant 0 : index
    %c0_39 = arith.constant 0 : index
    %72 = vector.load %arg2[%c0_37, %c2, %c0_38, %c0_39] : memref<2x16x4x4xf32, #tpu.memory_space<vmem>>, vector<2x1x4x4xf32>
    %73 = vector.shape_cast %72 : vector<2x1x4x4xf32> to vector<2x4x4xf32>
    %c0_40 = arith.constant 0 : index
    %c2_41 = arith.constant 2 : index
    %c0_42 = arith.constant 0 : index
    %c0_43 = arith.constant 0 : index
    %74 = vector.load %arg3[%c0_40, %c2_41, %c0_42, %c0_43] : memref<2x16x4x4xf32, #tpu.memory_space<vmem>>, vector<2x1x4x4xf32>
    %75 = vector.shape_cast %74 : vector<2x1x4x4xf32> to vector<2x4x4xf32>
    %cst_44 = arith.constant 1.000000e-01 : f32
    %76 = vector.broadcast %cst_44 : f32 to vector<2x4x4xf32>
    %77 = arith.cmpf ogt, %75, %76 : vector<2x4x4xf32>
    %cst_45 = arith.constant 1.000000e+01 : f32
    %78 = vector.broadcast %cst_45 : f32 to vector<2x4x4xf32>
    %79 = arith.cmpf olt, %75, %78 : vector<2x4x4xf32>
    %80 = arith.andi %77, %79 : vector<2x4x4xi1>
    %81 = math.log %73 : vector<2x4x4xf32>
    %82 = math.log %75 : vector<2x4x4xf32>
    %83 = arith.subf %81, %82 : vector<2x4x4xf32>
    %84 = math.absf %83 : vector<2x4x4xf32>
    %cst_46 = arith.constant 1.000000e-03 : f32
    %85 = vector.broadcast %cst_46 : f32 to vector<2x4x4xf32>
    %86 = arith.cmpf ogt, %84, %85 : vector<2x4x4xf32>
    %87 = arith.andi %80, %86 : vector<2x4x4xi1>
    %cst_47 = arith.constant 0.000000e+00 : f32
    %88 = vector.broadcast %cst_47 : f32 to vector<2x4x4xf32>
    %89 = arith.select %87, %83, %88 : vector<2x4x4xi1>, vector<2x4x4xf32>
    %90 = arith.mulf %89, %89 : vector<2x4x4xf32>
    %cst_48 = arith.constant dense<0.000000e+00> : vector<2x4xf32>
    %91 = vector.multi_reduction <add>, %90, %cst_48 [2] : vector<2x4x4xf32> to vector<2x4xf32>
    %cst_49 = arith.constant dense<0.000000e+00> : vector<2xf32>
    %92 = vector.multi_reduction <add>, %91, %cst_49 [1] : vector<2x4xf32> to vector<2xf32>
    %93 = vector.shape_cast %92 : vector<2xf32> to vector<2x1xf32>
    %94 = arith.addf %61, %93 : vector<2x1xf32>
    %cst_50 = arith.constant dense<0.000000e+00> : vector<2x4xf32>
    %95 = vector.multi_reduction <add>, %89, %cst_50 [2] : vector<2x4x4xf32> to vector<2x4xf32>
    %cst_51 = arith.constant dense<0.000000e+00> : vector<2xf32>
    %96 = vector.multi_reduction <add>, %95, %cst_51 [1] : vector<2x4xf32> to vector<2xf32>
    %97 = vector.shape_cast %96 : vector<2xf32> to vector<2x1xf32>
    %98 = arith.addf %65, %97 : vector<2x1xf32>
    %99 = arith.extui %80 : vector<2x4x4xi1> to vector<2x4x4xi32>
    %100 = arith.sitofp %99 : vector<2x4x4xi32> to vector<2x4x4xf32>
    %cst_52 = arith.constant dense<0.000000e+00> : vector<2x4xf32>
    %101 = vector.multi_reduction <add>, %100, %cst_52 [2] : vector<2x4x4xf32> to vector<2x4xf32>
    %cst_53 = arith.constant dense<0.000000e+00> : vector<2xf32>
    %102 = vector.multi_reduction <add>, %101, %cst_53 [1] : vector<2x4xf32> to vector<2xf32>
    %103 = vector.shape_cast %102 : vector<2xf32> to vector<2x1xf32>
    %104 = arith.addf %71, %103 : vector<2x1xf32>
    %c0_54 = arith.constant 0 : index
    %c3 = arith.constant 3 : index
    %c0_55 = arith.constant 0 : index
    %c0_56 = arith.constant 0 : index
    %105 = vector.load %arg2[%c0_54, %c3, %c0_55, %c0_56] : memref<2x16x4x4xf32, #tpu.memory_space<vmem>>, vector<2x1x4x4xf32>
    %106 = vector.shape_cast %105 : vector<2x1x4x4xf32> to vector<2x4x4xf32>
    %c0_57 = arith.constant 0 : index
    %c3_58 = arith.constant 3 : index
    %c0_59 = arith.constant 0 : index
    %c0_60 = arith.constant 0 : index
    %107 = vector.load %arg3[%c0_57, %c3_58, %c0_59, %c0_60] : memref<2x16x4x4xf32, #tpu.memory_space<vmem>>, vector<2x1x4x4xf32>
    %108 = vector.shape_cast %107 : vector<2x1x4x4xf32> to vector<2x4x4xf32>
    %cst_61 = arith.constant 1.000000e-01 : f32
    %109 = vector.broadcast %cst_61 : f32 to vector<2x4x4xf32>
    %110 = arith.cmpf ogt, %108, %109 : vector<2x4x4xf32>
    %cst_62 = arith.constant 1.000000e+01 : f32
    %111 = vector.broadcast %cst_62 : f32 to vector<2x4x4xf32>
    %112 = arith.cmpf olt, %108, %111 : vector<2x4x4xf32>
    %113 = arith.andi %110, %112 : vector<2x4x4xi1>
    %114 = math.log %106 : vector<2x4x4xf32>
    %115 = math.log %108 : vector<2x4x4xf32>
    %116 = arith.subf %114, %115 : vector<2x4x4xf32>
    %117 = math.absf %116 : vector<2x4x4xf32>
    %cst_63 = arith.constant 1.000000e-03 : f32
    %118 = vector.broadcast %cst_63 : f32 to vector<2x4x4xf32>
    %119 = arith.cmpf ogt, %117, %118 : vector<2x4x4xf32>
    %120 = arith.andi %113, %119 : vector<2x4x4xi1>
    %cst_64 = arith.constant 0.000000e+00 : f32
    %121 = vector.broadcast %cst_64 : f32 to vector<2x4x4xf32>
    %122 = arith.select %120, %116, %121 : vector<2x4x4xi1>, vector<2x4x4xf32>
    %123 = arith.mulf %122, %122 : vector<2x4x4xf32>
    %cst_65 = arith.constant dense<0.000000e+00> : vector<2x4xf32>
    %124 = vector.multi_reduction <add>, %123, %cst_65 [2] : vector<2x4x4xf32> to vector<2x4xf32>
    %cst_66 = arith.constant dense<0.000000e+00> : vector<2xf32>
    %125 = vector.multi_reduction <add>, %124, %cst_66 [1] : vector<2x4xf32> to vector<2xf32>
    %126 = vector.shape_cast %125 : vector<2xf32> to vector<2x1xf32>
    %127 = arith.addf %94, %126 : vector<2x1xf32>
    %cst_67 = arith.constant dense<0.000000e+00> : vector<2x4xf32>
    %128 = vector.multi_reduction <add>, %122, %cst_67 [2] : vector<2x4x4xf32> to vector<2x4xf32>
    %cst_68 = arith.constant dense<0.000000e+00> : vector<2xf32>
    %129 = vector.multi_reduction <add>, %128, %cst_68 [1] : vector<2x4xf32> to vector<2xf32>
    %130 = vector.shape_cast %129 : vector<2xf32> to vector<2x1xf32>
    %131 = arith.addf %98, %130 : vector<2x1xf32>
    %132 = arith.extui %113 : vector<2x4x4xi1> to vector<2x4x4xi32>
    %133 = arith.sitofp %132 : vector<2x4x4xi32> to vector<2x4x4xf32>
    %cst_69 = arith.constant dense<0.000000e+00> : vector<2x4xf32>
    %134 = vector.multi_reduction <add>, %133, %cst_69 [2] : vector<2x4x4xf32> to vector<2x4xf32>
    %cst_70 = arith.constant dense<0.000000e+00> : vector<2xf32>
    %135 = vector.multi_reduction <add>, %134, %cst_70 [1] : vector<2x4xf32> to vector<2xf32>
    %136 = vector.shape_cast %135 : vector<2xf32> to vector<2x1xf32>
    %137 = arith.addf %104, %136 : vector<2x1xf32>
    %c0_71 = arith.constant 0 : index
    %c4 = arith.constant 4 : index
    %c0_72 = arith.constant 0 : index
    %c0_73 = arith.constant 0 : index
    %138 = vector.load %arg2[%c0_71, %c4, %c0_72, %c0_73] : memref<2x16x4x4xf32, #tpu.memory_space<vmem>>, vector<2x1x4x4xf32>
    %139 = vector.shape_cast %138 : vector<2x1x4x4xf32> to vector<2x4x4xf32>
    %c0_74 = arith.constant 0 : index
    %c4_75 = arith.constant 4 : index
    %c0_76 = arith.constant 0 : index
    %c0_77 = arith.constant 0 : index
    %140 = vector.load %arg3[%c0_74, %c4_75, %c0_76, %c0_77] : memref<2x16x4x4xf32, #tpu.memory_space<vmem>>, vector<2x1x4x4xf32>
    %141 = vector.shape_cast %140 : vector<2x1x4x4xf32> to vector<2x4x4xf32>
    %cst_78 = arith.constant 1.000000e-01 : f32
    %142 = vector.broadcast %cst_78 : f32 to vector<2x4x4xf32>
    %143 = arith.cmpf ogt, %141, %142 : vector<2x4x4xf32>
    %cst_79 = arith.constant 1.000000e+01 : f32
    %144 = vector.broadcast %cst_79 : f32 to vector<2x4x4xf32>
    %145 = arith.cmpf olt, %141, %144 : vector<2x4x4xf32>
    %146 = arith.andi %143, %145 : vector<2x4x4xi1>
    %147 = math.log %139 : vector<2x4x4xf32>
    %148 = math.log %141 : vector<2x4x4xf32>
    %149 = arith.subf %147, %148 : vector<2x4x4xf32>
    %150 = math.absf %149 : vector<2x4x4xf32>
    %cst_80 = arith.constant 1.000000e-03 : f32
    %151 = vector.broadcast %cst_80 : f32 to vector<2x4x4xf32>
    %152 = arith.cmpf ogt, %150, %151 : vector<2x4x4xf32>
    %153 = arith.andi %146, %152 : vector<2x4x4xi1>
    %cst_81 = arith.constant 0.000000e+00 : f32
    %154 = vector.broadcast %cst_81 : f32 to vector<2x4x4xf32>
    %155 = arith.select %153, %149, %154 : vector<2x4x4xi1>, vector<2x4x4xf32>
    %156 = arith.mulf %155, %155 : vector<2x4x4xf32>
    %cst_82 = arith.constant dense<0.000000e+00> : vector<2x4xf32>
    %157 = vector.multi_reduction <add>, %156, %cst_82 [2] : vector<2x4x4xf32> to vector<2x4xf32>
    %cst_83 = arith.constant dense<0.000000e+00> : vector<2xf32>
    %158 = vector.multi_reduction <add>, %157, %cst_83 [1] : vector<2x4xf32> to vector<2xf32>
    %159 = vector.shape_cast %158 : vector<2xf32> to vector<2x1xf32>
    %160 = arith.addf %127, %159 : vector<2x1xf32>
    %cst_84 = arith.constant dense<0.000000e+00> : vector<2x4xf32>
    %161 = vector.multi_reduction <add>, %155, %cst_84 [2] : vector<2x4x4xf32> to vector<2x4xf32>
    %cst_85 = arith.constant dense<0.000000e+00> : vector<2xf32>
    %162 = vector.multi_reduction <add>, %161, %cst_85 [1] : vector<2x4xf32> to vector<2xf32>
    %163 = vector.shape_cast %162 : vector<2xf32> to vector<2x1xf32>
    %164 = arith.addf %131, %163 : vector<2x1xf32>
    %165 = arith.extui %146 : vector<2x4x4xi1> to vector<2x4x4xi32>
    %166 = arith.sitofp %165 : vector<2x4x4xi32> to vector<2x4x4xf32>
    %cst_86 = arith.constant dense<0.000000e+00> : vector<2x4xf32>
    %167 = vector.multi_reduction <add>, %166, %cst_86 [2] : vector<2x4x4xf32> to vector<2x4xf32>
    %cst_87 = arith.constant dense<0.000000e+00> : vector<2xf32>
    %168 = vector.multi_reduction <add>, %167, %cst_87 [1] : vector<2x4xf32> to vector<2xf32>
    %169 = vector.shape_cast %168 : vector<2xf32> to vector<2x1xf32>
    %170 = arith.addf %137, %169 : vector<2x1xf32>
    %c0_88 = arith.constant 0 : index
    %c5 = arith.constant 5 : index
    %c0_89 = arith.constant 0 : index
    %c0_90 = arith.constant 0 : index
    %171 = vector.load %arg2[%c0_88, %c5, %c0_89, %c0_90] : memref<2x16x4x4xf32, #tpu.memory_space<vmem>>, vector<2x1x4x4xf32>
    %172 = vector.shape_cast %171 : vector<2x1x4x4xf32> to vector<2x4x4xf32>
    %c0_91 = arith.constant 0 : index
    %c5_92 = arith.constant 5 : index
    %c0_93 = arith.constant 0 : index
    %c0_94 = arith.constant 0 : index
    %173 = vector.load %arg3[%c0_91, %c5_92, %c0_93, %c0_94] : memref<2x16x4x4xf32, #tpu.memory_space<vmem>>, vector<2x1x4x4xf32>
    %174 = vector.shape_cast %173 : vector<2x1x4x4xf32> to vector<2x4x4xf32>
    %cst_95 = arith.constant 1.000000e-01 : f32
    %175 = vector.broadcast %cst_95 : f32 to vector<2x4x4xf32>
    %176 = arith.cmpf ogt, %174, %175 : vector<2x4x4xf32>
    %cst_96 = arith.constant 1.000000e+01 : f32
    %177 = vector.broadcast %cst_96 : f32 to vector<2x4x4xf32>
    %178 = arith.cmpf olt, %174, %177 : vector<2x4x4xf32>
    %179 = arith.andi %176, %178 : vector<2x4x4xi1>
    %180 = math.log %172 : vector<2x4x4xf32>
    %181 = math.log %174 : vector<2x4x4xf32>
    %182 = arith.subf %180, %181 : vector<2x4x4xf32>
    %183 = math.absf %182 : vector<2x4x4xf32>
    %cst_97 = arith.constant 1.000000e-03 : f32
    %184 = vector.broadcast %cst_97 : f32 to vector<2x4x4xf32>
    %185 = arith.cmpf ogt, %183, %184 : vector<2x4x4xf32>
    %186 = arith.andi %179, %185 : vector<2x4x4xi1>
    %cst_98 = arith.constant 0.000000e+00 : f32
    %187 = vector.broadcast %cst_98 : f32 to vector<2x4x4xf32>
    %188 = arith.select %186, %182, %187 : vector<2x4x4xi1>, vector<2x4x4xf32>
    %189 = arith.mulf %188, %188 : vector<2x4x4xf32>
    %cst_99 = arith.constant dense<0.000000e+00> : vector<2x4xf32>
    %190 = vector.multi_reduction <add>, %189, %cst_99 [2] : vector<2x4x4xf32> to vector<2x4xf32>
    %cst_100 = arith.constant dense<0.000000e+00> : vector<2xf32>
    %191 = vector.multi_reduction <add>, %190, %cst_100 [1] : vector<2x4xf32> to vector<2xf32>
    %192 = vector.shape_cast %191 : vector<2xf32> to vector<2x1xf32>
    %193 = arith.addf %160, %192 : vector<2x1xf32>
    %cst_101 = arith.constant dense<0.000000e+00> : vector<2x4xf32>
    %194 = vector.multi_reduction <add>, %188, %cst_101 [2] : vector<2x4x4xf32> to vector<2x4xf32>
    %cst_102 = arith.constant dense<0.000000e+00> : vector<2xf32>
    %195 = vector.multi_reduction <add>, %194, %cst_102 [1] : vector<2x4xf32> to vector<2xf32>
    %196 = vector.shape_cast %195 : vector<2xf32> to vector<2x1xf32>
    %197 = arith.addf %164, %196 : vector<2x1xf32>
    %198 = arith.extui %179 : vector<2x4x4xi1> to vector<2x4x4xi32>
    %199 = arith.sitofp %198 : vector<2x4x4xi32> to vector<2x4x4xf32>
    %cst_103 = arith.constant dense<0.000000e+00> : vector<2x4xf32>
    %200 = vector.multi_reduction <add>, %199, %cst_103 [2] : vector<2x4x4xf32> to vector<2x4xf32>
    %cst_104 = arith.constant dense<0.000000e+00> : vector<2xf32>
    %201 = vector.multi_reduction <add>, %200, %cst_104 [1] : vector<2x4xf32> to vector<2xf32>
    %202 = vector.shape_cast %201 : vector<2xf32> to vector<2x1xf32>
    %203 = arith.addf %170, %202 : vector<2x1xf32>
    %c0_105 = arith.constant 0 : index
    %c6 = arith.constant 6 : index
    %c0_106 = arith.constant 0 : index
    %c0_107 = arith.constant 0 : index
    %204 = vector.load %arg2[%c0_105, %c6, %c0_106, %c0_107] : memref<2x16x4x4xf32, #tpu.memory_space<vmem>>, vector<2x1x4x4xf32>
    %205 = vector.shape_cast %204 : vector<2x1x4x4xf32> to vector<2x4x4xf32>
    %c0_108 = arith.constant 0 : index
    %c6_109 = arith.constant 6 : index
    %c0_110 = arith.constant 0 : index
    %c0_111 = arith.constant 0 : index
    %206 = vector.load %arg3[%c0_108, %c6_109, %c0_110, %c0_111] : memref<2x16x4x4xf32, #tpu.memory_space<vmem>>, vector<2x1x4x4xf32>
    %207 = vector.shape_cast %206 : vector<2x1x4x4xf32> to vector<2x4x4xf32>
    %cst_112 = arith.constant 1.000000e-01 : f32
    %208 = vector.broadcast %cst_112 : f32 to vector<2x4x4xf32>
    %209 = arith.cmpf ogt, %207, %208 : vector<2x4x4xf32>
    %cst_113 = arith.constant 1.000000e+01 : f32
    %210 = vector.broadcast %cst_113 : f32 to vector<2x4x4xf32>
    %211 = arith.cmpf olt, %207, %210 : vector<2x4x4xf32>
    %212 = arith.andi %209, %211 : vector<2x4x4xi1>
    %213 = math.log %205 : vector<2x4x4xf32>
    %214 = math.log %207 : vector<2x4x4xf32>
    %215 = arith.subf %213, %214 : vector<2x4x4xf32>
    %216 = math.absf %215 : vector<2x4x4xf32>
    %cst_114 = arith.constant 1.000000e-03 : f32
    %217 = vector.broadcast %cst_114 : f32 to vector<2x4x4xf32>
    %218 = arith.cmpf ogt, %216, %217 : vector<2x4x4xf32>
    %219 = arith.andi %212, %218 : vector<2x4x4xi1>
    %cst_115 = arith.constant 0.000000e+00 : f32
    %220 = vector.broadcast %cst_115 : f32 to vector<2x4x4xf32>
    %221 = arith.select %219, %215, %220 : vector<2x4x4xi1>, vector<2x4x4xf32>
    %222 = arith.mulf %221, %221 : vector<2x4x4xf32>
    %cst_116 = arith.constant dense<0.000000e+00> : vector<2x4xf32>
    %223 = vector.multi_reduction <add>, %222, %cst_116 [2] : vector<2x4x4xf32> to vector<2x4xf32>
    %cst_117 = arith.constant dense<0.000000e+00> : vector<2xf32>
    %224 = vector.multi_reduction <add>, %223, %cst_117 [1] : vector<2x4xf32> to vector<2xf32>
    %225 = vector.shape_cast %224 : vector<2xf32> to vector<2x1xf32>
    %226 = arith.addf %193, %225 : vector<2x1xf32>
    %cst_118 = arith.constant dense<0.000000e+00> : vector<2x4xf32>
    %227 = vector.multi_reduction <add>, %221, %cst_118 [2] : vector<2x4x4xf32> to vector<2x4xf32>
    %cst_119 = arith.constant dense<0.000000e+00> : vector<2xf32>
    %228 = vector.multi_reduction <add>, %227, %cst_119 [1] : vector<2x4xf32> to vector<2xf32>
    %229 = vector.shape_cast %228 : vector<2xf32> to vector<2x1xf32>
    %230 = arith.addf %197, %229 : vector<2x1xf32>
    %231 = arith.extui %212 : vector<2x4x4xi1> to vector<2x4x4xi32>
    %232 = arith.sitofp %231 : vector<2x4x4xi32> to vector<2x4x4xf32>
    %cst_120 = arith.constant dense<0.000000e+00> : vector<2x4xf32>
    %233 = vector.multi_reduction <add>, %232, %cst_120 [2] : vector<2x4x4xf32> to vector<2x4xf32>
    %cst_121 = arith.constant dense<0.000000e+00> : vector<2xf32>
    %234 = vector.multi_reduction <add>, %233, %cst_121 [1] : vector<2x4xf32> to vector<2xf32>
    %235 = vector.shape_cast %234 : vector<2xf32> to vector<2x1xf32>
    %236 = arith.addf %203, %235 : vector<2x1xf32>
    %c0_122 = arith.constant 0 : index
    %c7 = arith.constant 7 : index
    %c0_123 = arith.constant 0 : index
    %c0_124 = arith.constant 0 : index
    %237 = vector.load %arg2[%c0_122, %c7, %c0_123, %c0_124] : memref<2x16x4x4xf32, #tpu.memory_space<vmem>>, vector<2x1x4x4xf32>
    %238 = vector.shape_cast %237 : vector<2x1x4x4xf32> to vector<2x4x4xf32>
    %c0_125 = arith.constant 0 : index
    %c7_126 = arith.constant 7 : index
    %c0_127 = arith.constant 0 : index
    %c0_128 = arith.constant 0 : index
    %239 = vector.load %arg3[%c0_125, %c7_126, %c0_127, %c0_128] : memref<2x16x4x4xf32, #tpu.memory_space<vmem>>, vector<2x1x4x4xf32>
    %240 = vector.shape_cast %239 : vector<2x1x4x4xf32> to vector<2x4x4xf32>
    %cst_129 = arith.constant 1.000000e-01 : f32
    %241 = vector.broadcast %cst_129 : f32 to vector<2x4x4xf32>
    %242 = arith.cmpf ogt, %240, %241 : vector<2x4x4xf32>
    %cst_130 = arith.constant 1.000000e+01 : f32
    %243 = vector.broadcast %cst_130 : f32 to vector<2x4x4xf32>
    %244 = arith.cmpf olt, %240, %243 : vector<2x4x4xf32>
    %245 = arith.andi %242, %244 : vector<2x4x4xi1>
    %246 = math.log %238 : vector<2x4x4xf32>
    %247 = math.log %240 : vector<2x4x4xf32>
    %248 = arith.subf %246, %247 : vector<2x4x4xf32>
    %249 = math.absf %248 : vector<2x4x4xf32>
    %cst_131 = arith.constant 1.000000e-03 : f32
    %250 = vector.broadcast %cst_131 : f32 to vector<2x4x4xf32>
    %251 = arith.cmpf ogt, %249, %250 : vector<2x4x4xf32>
    %252 = arith.andi %245, %251 : vector<2x4x4xi1>
    %cst_132 = arith.constant 0.000000e+00 : f32
    %253 = vector.broadcast %cst_132 : f32 to vector<2x4x4xf32>
    %254 = arith.select %252, %248, %253 : vector<2x4x4xi1>, vector<2x4x4xf32>
    %255 = arith.mulf %254, %254 : vector<2x4x4xf32>
    %cst_133 = arith.constant dense<0.000000e+00> : vector<2x4xf32>
    %256 = vector.multi_reduction <add>, %255, %cst_133 [2] : vector<2x4x4xf32> to vector<2x4xf32>
    %cst_134 = arith.constant dense<0.000000e+00> : vector<2xf32>
    %257 = vector.multi_reduction <add>, %256, %cst_134 [1] : vector<2x4xf32> to vector<2xf32>
    %258 = vector.shape_cast %257 : vector<2xf32> to vector<2x1xf32>
    %259 = arith.addf %226, %258 : vector<2x1xf32>
    %cst_135 = arith.constant dense<0.000000e+00> : vector<2x4xf32>
    %260 = vector.multi_reduction <add>, %254, %cst_135 [2] : vector<2x4x4xf32> to vector<2x4xf32>
    %cst_136 = arith.constant dense<0.000000e+00> : vector<2xf32>
    %261 = vector.multi_reduction <add>, %260, %cst_136 [1] : vector<2x4xf32> to vector<2xf32>
    %262 = vector.shape_cast %261 : vector<2xf32> to vector<2x1xf32>
    %263 = arith.addf %230, %262 : vector<2x1xf32>
    %264 = arith.extui %245 : vector<2x4x4xi1> to vector<2x4x4xi32>
    %265 = arith.sitofp %264 : vector<2x4x4xi32> to vector<2x4x4xf32>
    %cst_137 = arith.constant dense<0.000000e+00> : vector<2x4xf32>
    %266 = vector.multi_reduction <add>, %265, %cst_137 [2] : vector<2x4x4xf32> to vector<2x4xf32>
    %cst_138 = arith.constant dense<0.000000e+00> : vector<2xf32>
    %267 = vector.multi_reduction <add>, %266, %cst_138 [1] : vector<2x4xf32> to vector<2xf32>
    %268 = vector.shape_cast %267 : vector<2xf32> to vector<2x1xf32>
    %269 = arith.addf %236, %268 : vector<2x1xf32>
    %c0_139 = arith.constant 0 : index
    %c8 = arith.constant 8 : index
    %c0_140 = arith.constant 0 : index
    %c0_141 = arith.constant 0 : index
    %270 = vector.load %arg2[%c0_139, %c8, %c0_140, %c0_141] : memref<2x16x4x4xf32, #tpu.memory_space<vmem>>, vector<2x1x4x4xf32>
    %271 = vector.shape_cast %270 : vector<2x1x4x4xf32> to vector<2x4x4xf32>
    %c0_142 = arith.constant 0 : index
    %c8_143 = arith.constant 8 : index
    %c0_144 = arith.constant 0 : index
    %c0_145 = arith.constant 0 : index
    %272 = vector.load %arg3[%c0_142, %c8_143, %c0_144, %c0_145] : memref<2x16x4x4xf32, #tpu.memory_space<vmem>>, vector<2x1x4x4xf32>
    %273 = vector.shape_cast %272 : vector<2x1x4x4xf32> to vector<2x4x4xf32>
    %cst_146 = arith.constant 1.000000e-01 : f32
    %274 = vector.broadcast %cst_146 : f32 to vector<2x4x4xf32>
    %275 = arith.cmpf ogt, %273, %274 : vector<2x4x4xf32>
    %cst_147 = arith.constant 1.000000e+01 : f32
    %276 = vector.broadcast %cst_147 : f32 to vector<2x4x4xf32>
    %277 = arith.cmpf olt, %273, %276 : vector<2x4x4xf32>
    %278 = arith.andi %275, %277 : vector<2x4x4xi1>
    %279 = math.log %271 : vector<2x4x4xf32>
    %280 = math.log %273 : vector<2x4x4xf32>
    %281 = arith.subf %279, %280 : vector<2x4x4xf32>
    %282 = math.absf %281 : vector<2x4x4xf32>
    %cst_148 = arith.constant 1.000000e-03 : f32
    %283 = vector.broadcast %cst_148 : f32 to vector<2x4x4xf32>
    %284 = arith.cmpf ogt, %282, %283 : vector<2x4x4xf32>
    %285 = arith.andi %278, %284 : vector<2x4x4xi1>
    %cst_149 = arith.constant 0.000000e+00 : f32
    %286 = vector.broadcast %cst_149 : f32 to vector<2x4x4xf32>
    %287 = arith.select %285, %281, %286 : vector<2x4x4xi1>, vector<2x4x4xf32>
    %288 = arith.mulf %287, %287 : vector<2x4x4xf32>
    %cst_150 = arith.constant dense<0.000000e+00> : vector<2x4xf32>
    %289 = vector.multi_reduction <add>, %288, %cst_150 [2] : vector<2x4x4xf32> to vector<2x4xf32>
    %cst_151 = arith.constant dense<0.000000e+00> : vector<2xf32>
    %290 = vector.multi_reduction <add>, %289, %cst_151 [1] : vector<2x4xf32> to vector<2xf32>
    %291 = vector.shape_cast %290 : vector<2xf32> to vector<2x1xf32>
    %292 = arith.addf %259, %291 : vector<2x1xf32>
    %cst_152 = arith.constant dense<0.000000e+00> : vector<2x4xf32>
    %293 = vector.multi_reduction <add>, %287, %cst_152 [2] : vector<2x4x4xf32> to vector<2x4xf32>
    %cst_153 = arith.constant dense<0.000000e+00> : vector<2xf32>
    %294 = vector.multi_reduction <add>, %293, %cst_153 [1] : vector<2x4xf32> to vector<2xf32>
    %295 = vector.shape_cast %294 : vector<2xf32> to vector<2x1xf32>
    %296 = arith.addf %263, %295 : vector<2x1xf32>
    %297 = arith.extui %278 : vector<2x4x4xi1> to vector<2x4x4xi32>
    %298 = arith.sitofp %297 : vector<2x4x4xi32> to vector<2x4x4xf32>
    %cst_154 = arith.constant dense<0.000000e+00> : vector<2x4xf32>
    %299 = vector.multi_reduction <add>, %298, %cst_154 [2] : vector<2x4x4xf32> to vector<2x4xf32>
    %cst_155 = arith.constant dense<0.000000e+00> : vector<2xf32>
    %300 = vector.multi_reduction <add>, %299, %cst_155 [1] : vector<2x4xf32> to vector<2xf32>
    %301 = vector.shape_cast %300 : vector<2xf32> to vector<2x1xf32>
    %302 = arith.addf %269, %301 : vector<2x1xf32>
    %c0_156 = arith.constant 0 : index
    %c9 = arith.constant 9 : index
    %c0_157 = arith.constant 0 : index
    %c0_158 = arith.constant 0 : index
    %303 = vector.load %arg2[%c0_156, %c9, %c0_157, %c0_158] : memref<2x16x4x4xf32, #tpu.memory_space<vmem>>, vector<2x1x4x4xf32>
    %304 = vector.shape_cast %303 : vector<2x1x4x4xf32> to vector<2x4x4xf32>
    %c0_159 = arith.constant 0 : index
    %c9_160 = arith.constant 9 : index
    %c0_161 = arith.constant 0 : index
    %c0_162 = arith.constant 0 : index
    %305 = vector.load %arg3[%c0_159, %c9_160, %c0_161, %c0_162] : memref<2x16x4x4xf32, #tpu.memory_space<vmem>>, vector<2x1x4x4xf32>
    %306 = vector.shape_cast %305 : vector<2x1x4x4xf32> to vector<2x4x4xf32>
    %cst_163 = arith.constant 1.000000e-01 : f32
    %307 = vector.broadcast %cst_163 : f32 to vector<2x4x4xf32>
    %308 = arith.cmpf ogt, %306, %307 : vector<2x4x4xf32>
    %cst_164 = arith.constant 1.000000e+01 : f32
    %309 = vector.broadcast %cst_164 : f32 to vector<2x4x4xf32>
    %310 = arith.cmpf olt, %306, %309 : vector<2x4x4xf32>
    %311 = arith.andi %308, %310 : vector<2x4x4xi1>
    %312 = math.log %304 : vector<2x4x4xf32>
    %313 = math.log %306 : vector<2x4x4xf32>
    %314 = arith.subf %312, %313 : vector<2x4x4xf32>
    %315 = math.absf %314 : vector<2x4x4xf32>
    %cst_165 = arith.constant 1.000000e-03 : f32
    %316 = vector.broadcast %cst_165 : f32 to vector<2x4x4xf32>
    %317 = arith.cmpf ogt, %315, %316 : vector<2x4x4xf32>
    %318 = arith.andi %311, %317 : vector<2x4x4xi1>
    %cst_166 = arith.constant 0.000000e+00 : f32
    %319 = vector.broadcast %cst_166 : f32 to vector<2x4x4xf32>
    %320 = arith.select %318, %314, %319 : vector<2x4x4xi1>, vector<2x4x4xf32>
    %321 = arith.mulf %320, %320 : vector<2x4x4xf32>
    %cst_167 = arith.constant dense<0.000000e+00> : vector<2x4xf32>
    %322 = vector.multi_reduction <add>, %321, %cst_167 [2] : vector<2x4x4xf32> to vector<2x4xf32>
    %cst_168 = arith.constant dense<0.000000e+00> : vector<2xf32>
    %323 = vector.multi_reduction <add>, %322, %cst_168 [1] : vector<2x4xf32> to vector<2xf32>
    %324 = vector.shape_cast %323 : vector<2xf32> to vector<2x1xf32>
    %325 = arith.addf %292, %324 : vector<2x1xf32>
    %cst_169 = arith.constant dense<0.000000e+00> : vector<2x4xf32>
    %326 = vector.multi_reduction <add>, %320, %cst_169 [2] : vector<2x4x4xf32> to vector<2x4xf32>
    %cst_170 = arith.constant dense<0.000000e+00> : vector<2xf32>
    %327 = vector.multi_reduction <add>, %326, %cst_170 [1] : vector<2x4xf32> to vector<2xf32>
    %328 = vector.shape_cast %327 : vector<2xf32> to vector<2x1xf32>
    %329 = arith.addf %296, %328 : vector<2x1xf32>
    %330 = arith.extui %311 : vector<2x4x4xi1> to vector<2x4x4xi32>
    %331 = arith.sitofp %330 : vector<2x4x4xi32> to vector<2x4x4xf32>
    %cst_171 = arith.constant dense<0.000000e+00> : vector<2x4xf32>
    %332 = vector.multi_reduction <add>, %331, %cst_171 [2] : vector<2x4x4xf32> to vector<2x4xf32>
    %cst_172 = arith.constant dense<0.000000e+00> : vector<2xf32>
    %333 = vector.multi_reduction <add>, %332, %cst_172 [1] : vector<2x4xf32> to vector<2xf32>
    %334 = vector.shape_cast %333 : vector<2xf32> to vector<2x1xf32>
    %335 = arith.addf %302, %334 : vector<2x1xf32>
    %c0_173 = arith.constant 0 : index
    %c10 = arith.constant 10 : index
    %c0_174 = arith.constant 0 : index
    %c0_175 = arith.constant 0 : index
    %336 = vector.load %arg2[%c0_173, %c10, %c0_174, %c0_175] : memref<2x16x4x4xf32, #tpu.memory_space<vmem>>, vector<2x1x4x4xf32>
    %337 = vector.shape_cast %336 : vector<2x1x4x4xf32> to vector<2x4x4xf32>
    %c0_176 = arith.constant 0 : index
    %c10_177 = arith.constant 10 : index
    %c0_178 = arith.constant 0 : index
    %c0_179 = arith.constant 0 : index
    %338 = vector.load %arg3[%c0_176, %c10_177, %c0_178, %c0_179] : memref<2x16x4x4xf32, #tpu.memory_space<vmem>>, vector<2x1x4x4xf32>
    %339 = vector.shape_cast %338 : vector<2x1x4x4xf32> to vector<2x4x4xf32>
    %cst_180 = arith.constant 1.000000e-01 : f32
    %340 = vector.broadcast %cst_180 : f32 to vector<2x4x4xf32>
    %341 = arith.cmpf ogt, %339, %340 : vector<2x4x4xf32>
    %cst_181 = arith.constant 1.000000e+01 : f32
    %342 = vector.broadcast %cst_181 : f32 to vector<2x4x4xf32>
    %343 = arith.cmpf olt, %339, %342 : vector<2x4x4xf32>
    %344 = arith.andi %341, %343 : vector<2x4x4xi1>
    %345 = math.log %337 : vector<2x4x4xf32>
    %346 = math.log %339 : vector<2x4x4xf32>
    %347 = arith.subf %345, %346 : vector<2x4x4xf32>
    %348 = math.absf %347 : vector<2x4x4xf32>
    %cst_182 = arith.constant 1.000000e-03 : f32
    %349 = vector.broadcast %cst_182 : f32 to vector<2x4x4xf32>
    %350 = arith.cmpf ogt, %348, %349 : vector<2x4x4xf32>
    %351 = arith.andi %344, %350 : vector<2x4x4xi1>
    %cst_183 = arith.constant 0.000000e+00 : f32
    %352 = vector.broadcast %cst_183 : f32 to vector<2x4x4xf32>
    %353 = arith.select %351, %347, %352 : vector<2x4x4xi1>, vector<2x4x4xf32>
    %354 = arith.mulf %353, %353 : vector<2x4x4xf32>
    %cst_184 = arith.constant dense<0.000000e+00> : vector<2x4xf32>
    %355 = vector.multi_reduction <add>, %354, %cst_184 [2] : vector<2x4x4xf32> to vector<2x4xf32>
    %cst_185 = arith.constant dense<0.000000e+00> : vector<2xf32>
    %356 = vector.multi_reduction <add>, %355, %cst_185 [1] : vector<2x4xf32> to vector<2xf32>
    %357 = vector.shape_cast %356 : vector<2xf32> to vector<2x1xf32>
    %358 = arith.addf %325, %357 : vector<2x1xf32>
    %cst_186 = arith.constant dense<0.000000e+00> : vector<2x4xf32>
    %359 = vector.multi_reduction <add>, %353, %cst_186 [2] : vector<2x4x4xf32> to vector<2x4xf32>
    %cst_187 = arith.constant dense<0.000000e+00> : vector<2xf32>
    %360 = vector.multi_reduction <add>, %359, %cst_187 [1] : vector<2x4xf32> to vector<2xf32>
    %361 = vector.shape_cast %360 : vector<2xf32> to vector<2x1xf32>
    %362 = arith.addf %329, %361 : vector<2x1xf32>
    %363 = arith.extui %344 : vector<2x4x4xi1> to vector<2x4x4xi32>
    %364 = arith.sitofp %363 : vector<2x4x4xi32> to vector<2x4x4xf32>
    %cst_188 = arith.constant dense<0.000000e+00> : vector<2x4xf32>
    %365 = vector.multi_reduction <add>, %364, %cst_188 [2] : vector<2x4x4xf32> to vector<2x4xf32>
    %cst_189 = arith.constant dense<0.000000e+00> : vector<2xf32>
    %366 = vector.multi_reduction <add>, %365, %cst_189 [1] : vector<2x4xf32> to vector<2xf32>
    %367 = vector.shape_cast %366 : vector<2xf32> to vector<2x1xf32>
    %368 = arith.addf %335, %367 : vector<2x1xf32>
    %c0_190 = arith.constant 0 : index
    %c11 = arith.constant 11 : index
    %c0_191 = arith.constant 0 : index
    %c0_192 = arith.constant 0 : index
    %369 = vector.load %arg2[%c0_190, %c11, %c0_191, %c0_192] : memref<2x16x4x4xf32, #tpu.memory_space<vmem>>, vector<2x1x4x4xf32>
    %370 = vector.shape_cast %369 : vector<2x1x4x4xf32> to vector<2x4x4xf32>
    %c0_193 = arith.constant 0 : index
    %c11_194 = arith.constant 11 : index
    %c0_195 = arith.constant 0 : index
    %c0_196 = arith.constant 0 : index
    %371 = vector.load %arg3[%c0_193, %c11_194, %c0_195, %c0_196] : memref<2x16x4x4xf32, #tpu.memory_space<vmem>>, vector<2x1x4x4xf32>
    %372 = vector.shape_cast %371 : vector<2x1x4x4xf32> to vector<2x4x4xf32>
    %cst_197 = arith.constant 1.000000e-01 : f32
    %373 = vector.broadcast %cst_197 : f32 to vector<2x4x4xf32>
    %374 = arith.cmpf ogt, %372, %373 : vector<2x4x4xf32>
    %cst_198 = arith.constant 1.000000e+01 : f32
    %375 = vector.broadcast %cst_198 : f32 to vector<2x4x4xf32>
    %376 = arith.cmpf olt, %372, %375 : vector<2x4x4xf32>
    %377 = arith.andi %374, %376 : vector<2x4x4xi1>
    %378 = math.log %370 : vector<2x4x4xf32>
    %379 = math.log %372 : vector<2x4x4xf32>
    %380 = arith.subf %378, %379 : vector<2x4x4xf32>
    %381 = math.absf %380 : vector<2x4x4xf32>
    %cst_199 = arith.constant 1.000000e-03 : f32
    %382 = vector.broadcast %cst_199 : f32 to vector<2x4x4xf32>
    %383 = arith.cmpf ogt, %381, %382 : vector<2x4x4xf32>
    %384 = arith.andi %377, %383 : vector<2x4x4xi1>
    %cst_200 = arith.constant 0.000000e+00 : f32
    %385 = vector.broadcast %cst_200 : f32 to vector<2x4x4xf32>
    %386 = arith.select %384, %380, %385 : vector<2x4x4xi1>, vector<2x4x4xf32>
    %387 = arith.mulf %386, %386 : vector<2x4x4xf32>
    %cst_201 = arith.constant dense<0.000000e+00> : vector<2x4xf32>
    %388 = vector.multi_reduction <add>, %387, %cst_201 [2] : vector<2x4x4xf32> to vector<2x4xf32>
    %cst_202 = arith.constant dense<0.000000e+00> : vector<2xf32>
    %389 = vector.multi_reduction <add>, %388, %cst_202 [1] : vector<2x4xf32> to vector<2xf32>
    %390 = vector.shape_cast %389 : vector<2xf32> to vector<2x1xf32>
    %391 = arith.addf %358, %390 : vector<2x1xf32>
    %cst_203 = arith.constant dense<0.000000e+00> : vector<2x4xf32>
    %392 = vector.multi_reduction <add>, %386, %cst_203 [2] : vector<2x4x4xf32> to vector<2x4xf32>
    %cst_204 = arith.constant dense<0.000000e+00> : vector<2xf32>
    %393 = vector.multi_reduction <add>, %392, %cst_204 [1] : vector<2x4xf32> to vector<2xf32>
    %394 = vector.shape_cast %393 : vector<2xf32> to vector<2x1xf32>
    %395 = arith.addf %362, %394 : vector<2x1xf32>
    %396 = arith.extui %377 : vector<2x4x4xi1> to vector<2x4x4xi32>
    %397 = arith.sitofp %396 : vector<2x4x4xi32> to vector<2x4x4xf32>
    %cst_205 = arith.constant dense<0.000000e+00> : vector<2x4xf32>
    %398 = vector.multi_reduction <add>, %397, %cst_205 [2] : vector<2x4x4xf32> to vector<2x4xf32>
    %cst_206 = arith.constant dense<0.000000e+00> : vector<2xf32>
    %399 = vector.multi_reduction <add>, %398, %cst_206 [1] : vector<2x4xf32> to vector<2xf32>
    %400 = vector.shape_cast %399 : vector<2xf32> to vector<2x1xf32>
    %401 = arith.addf %368, %400 : vector<2x1xf32>
    %c0_207 = arith.constant 0 : index
    %c12 = arith.constant 12 : index
    %c0_208 = arith.constant 0 : index
    %c0_209 = arith.constant 0 : index
    %402 = vector.load %arg2[%c0_207, %c12, %c0_208, %c0_209] : memref<2x16x4x4xf32, #tpu.memory_space<vmem>>, vector<2x1x4x4xf32>
    %403 = vector.shape_cast %402 : vector<2x1x4x4xf32> to vector<2x4x4xf32>
    %c0_210 = arith.constant 0 : index
    %c12_211 = arith.constant 12 : index
    %c0_212 = arith.constant 0 : index
    %c0_213 = arith.constant 0 : index
    %404 = vector.load %arg3[%c0_210, %c12_211, %c0_212, %c0_213] : memref<2x16x4x4xf32, #tpu.memory_space<vmem>>, vector<2x1x4x4xf32>
    %405 = vector.shape_cast %404 : vector<2x1x4x4xf32> to vector<2x4x4xf32>
    %cst_214 = arith.constant 1.000000e-01 : f32
    %406 = vector.broadcast %cst_214 : f32 to vector<2x4x4xf32>
    %407 = arith.cmpf ogt, %405, %406 : vector<2x4x4xf32>
    %cst_215 = arith.constant 1.000000e+01 : f32
    %408 = vector.broadcast %cst_215 : f32 to vector<2x4x4xf32>
    %409 = arith.cmpf olt, %405, %408 : vector<2x4x4xf32>
    %410 = arith.andi %407, %409 : vector<2x4x4xi1>
    %411 = math.log %403 : vector<2x4x4xf32>
    %412 = math.log %405 : vector<2x4x4xf32>
    %413 = arith.subf %411, %412 : vector<2x4x4xf32>
    %414 = math.absf %413 : vector<2x4x4xf32>
    %cst_216 = arith.constant 1.000000e-03 : f32
    %415 = vector.broadcast %cst_216 : f32 to vector<2x4x4xf32>
    %416 = arith.cmpf ogt, %414, %415 : vector<2x4x4xf32>
    %417 = arith.andi %410, %416 : vector<2x4x4xi1>
    %cst_217 = arith.constant 0.000000e+00 : f32
    %418 = vector.broadcast %cst_217 : f32 to vector<2x4x4xf32>
    %419 = arith.select %417, %413, %418 : vector<2x4x4xi1>, vector<2x4x4xf32>
    %420 = arith.mulf %419, %419 : vector<2x4x4xf32>
    %cst_218 = arith.constant dense<0.000000e+00> : vector<2x4xf32>
    %421 = vector.multi_reduction <add>, %420, %cst_218 [2] : vector<2x4x4xf32> to vector<2x4xf32>
    %cst_219 = arith.constant dense<0.000000e+00> : vector<2xf32>
    %422 = vector.multi_reduction <add>, %421, %cst_219 [1] : vector<2x4xf32> to vector<2xf32>
    %423 = vector.shape_cast %422 : vector<2xf32> to vector<2x1xf32>
    %424 = arith.addf %391, %423 : vector<2x1xf32>
    %cst_220 = arith.constant dense<0.000000e+00> : vector<2x4xf32>
    %425 = vector.multi_reduction <add>, %419, %cst_220 [2] : vector<2x4x4xf32> to vector<2x4xf32>
    %cst_221 = arith.constant dense<0.000000e+00> : vector<2xf32>
    %426 = vector.multi_reduction <add>, %425, %cst_221 [1] : vector<2x4xf32> to vector<2xf32>
    %427 = vector.shape_cast %426 : vector<2xf32> to vector<2x1xf32>
    %428 = arith.addf %395, %427 : vector<2x1xf32>
    %429 = arith.extui %410 : vector<2x4x4xi1> to vector<2x4x4xi32>
    %430 = arith.sitofp %429 : vector<2x4x4xi32> to vector<2x4x4xf32>
    %cst_222 = arith.constant dense<0.000000e+00> : vector<2x4xf32>
    %431 = vector.multi_reduction <add>, %430, %cst_222 [2] : vector<2x4x4xf32> to vector<2x4xf32>
    %cst_223 = arith.constant dense<0.000000e+00> : vector<2xf32>
    %432 = vector.multi_reduction <add>, %431, %cst_223 [1] : vector<2x4xf32> to vector<2xf32>
    %433 = vector.shape_cast %432 : vector<2xf32> to vector<2x1xf32>
    %434 = arith.addf %401, %433 : vector<2x1xf32>
    %c0_224 = arith.constant 0 : index
    %c13 = arith.constant 13 : index
    %c0_225 = arith.constant 0 : index
    %c0_226 = arith.constant 0 : index
    %435 = vector.load %arg2[%c0_224, %c13, %c0_225, %c0_226] : memref<2x16x4x4xf32, #tpu.memory_space<vmem>>, vector<2x1x4x4xf32>
    %436 = vector.shape_cast %435 : vector<2x1x4x4xf32> to vector<2x4x4xf32>
    %c0_227 = arith.constant 0 : index
    %c13_228 = arith.constant 13 : index
    %c0_229 = arith.constant 0 : index
    %c0_230 = arith.constant 0 : index
    %437 = vector.load %arg3[%c0_227, %c13_228, %c0_229, %c0_230] : memref<2x16x4x4xf32, #tpu.memory_space<vmem>>, vector<2x1x4x4xf32>
    %438 = vector.shape_cast %437 : vector<2x1x4x4xf32> to vector<2x4x4xf32>
    %cst_231 = arith.constant 1.000000e-01 : f32
    %439 = vector.broadcast %cst_231 : f32 to vector<2x4x4xf32>
    %440 = arith.cmpf ogt, %438, %439 : vector<2x4x4xf32>
    %cst_232 = arith.constant 1.000000e+01 : f32
    %441 = vector.broadcast %cst_232 : f32 to vector<2x4x4xf32>
    %442 = arith.cmpf olt, %438, %441 : vector<2x4x4xf32>
    %443 = arith.andi %440, %442 : vector<2x4x4xi1>
    %444 = math.log %436 : vector<2x4x4xf32>
    %445 = math.log %438 : vector<2x4x4xf32>
    %446 = arith.subf %444, %445 : vector<2x4x4xf32>
    %447 = math.absf %446 : vector<2x4x4xf32>
    %cst_233 = arith.constant 1.000000e-03 : f32
    %448 = vector.broadcast %cst_233 : f32 to vector<2x4x4xf32>
    %449 = arith.cmpf ogt, %447, %448 : vector<2x4x4xf32>
    %450 = arith.andi %443, %449 : vector<2x4x4xi1>
    %cst_234 = arith.constant 0.000000e+00 : f32
    %451 = vector.broadcast %cst_234 : f32 to vector<2x4x4xf32>
    %452 = arith.select %450, %446, %451 : vector<2x4x4xi1>, vector<2x4x4xf32>
    %453 = arith.mulf %452, %452 : vector<2x4x4xf32>
    %cst_235 = arith.constant dense<0.000000e+00> : vector<2x4xf32>
    %454 = vector.multi_reduction <add>, %453, %cst_235 [2] : vector<2x4x4xf32> to vector<2x4xf32>
    %cst_236 = arith.constant dense<0.000000e+00> : vector<2xf32>
    %455 = vector.multi_reduction <add>, %454, %cst_236 [1] : vector<2x4xf32> to vector<2xf32>
    %456 = vector.shape_cast %455 : vector<2xf32> to vector<2x1xf32>
    %457 = arith.addf %424, %456 : vector<2x1xf32>
    %cst_237 = arith.constant dense<0.000000e+00> : vector<2x4xf32>
    %458 = vector.multi_reduction <add>, %452, %cst_237 [2] : vector<2x4x4xf32> to vector<2x4xf32>
    %cst_238 = arith.constant dense<0.000000e+00> : vector<2xf32>
    %459 = vector.multi_reduction <add>, %458, %cst_238 [1] : vector<2x4xf32> to vector<2xf32>
    %460 = vector.shape_cast %459 : vector<2xf32> to vector<2x1xf32>
    %461 = arith.addf %428, %460 : vector<2x1xf32>
    %462 = arith.extui %443 : vector<2x4x4xi1> to vector<2x4x4xi32>
    %463 = arith.sitofp %462 : vector<2x4x4xi32> to vector<2x4x4xf32>
    %cst_239 = arith.constant dense<0.000000e+00> : vector<2x4xf32>
    %464 = vector.multi_reduction <add>, %463, %cst_239 [2] : vector<2x4x4xf32> to vector<2x4xf32>
    %cst_240 = arith.constant dense<0.000000e+00> : vector<2xf32>
    %465 = vector.multi_reduction <add>, %464, %cst_240 [1] : vector<2x4xf32> to vector<2xf32>
    %466 = vector.shape_cast %465 : vector<2xf32> to vector<2x1xf32>
    %467 = arith.addf %434, %466 : vector<2x1xf32>
    %c0_241 = arith.constant 0 : index
    %c14 = arith.constant 14 : index
    %c0_242 = arith.constant 0 : index
    %c0_243 = arith.constant 0 : index
    %468 = vector.load %arg2[%c0_241, %c14, %c0_242, %c0_243] : memref<2x16x4x4xf32, #tpu.memory_space<vmem>>, vector<2x1x4x4xf32>
    %469 = vector.shape_cast %468 : vector<2x1x4x4xf32> to vector<2x4x4xf32>
    %c0_244 = arith.constant 0 : index
    %c14_245 = arith.constant 14 : index
    %c0_246 = arith.constant 0 : index
    %c0_247 = arith.constant 0 : index
    %470 = vector.load %arg3[%c0_244, %c14_245, %c0_246, %c0_247] : memref<2x16x4x4xf32, #tpu.memory_space<vmem>>, vector<2x1x4x4xf32>
    %471 = vector.shape_cast %470 : vector<2x1x4x4xf32> to vector<2x4x4xf32>
    %cst_248 = arith.constant 1.000000e-01 : f32
    %472 = vector.broadcast %cst_248 : f32 to vector<2x4x4xf32>
    %473 = arith.cmpf ogt, %471, %472 : vector<2x4x4xf32>
    %cst_249 = arith.constant 1.000000e+01 : f32
    %474 = vector.broadcast %cst_249 : f32 to vector<2x4x4xf32>
    %475 = arith.cmpf olt, %471, %474 : vector<2x4x4xf32>
    %476 = arith.andi %473, %475 : vector<2x4x4xi1>
    %477 = math.log %469 : vector<2x4x4xf32>
    %478 = math.log %471 : vector<2x4x4xf32>
    %479 = arith.subf %477, %478 : vector<2x4x4xf32>
    %480 = math.absf %479 : vector<2x4x4xf32>
    %cst_250 = arith.constant 1.000000e-03 : f32
    %481 = vector.broadcast %cst_250 : f32 to vector<2x4x4xf32>
    %482 = arith.cmpf ogt, %480, %481 : vector<2x4x4xf32>
    %483 = arith.andi %476, %482 : vector<2x4x4xi1>
    %cst_251 = arith.constant 0.000000e+00 : f32
    %484 = vector.broadcast %cst_251 : f32 to vector<2x4x4xf32>
    %485 = arith.select %483, %479, %484 : vector<2x4x4xi1>, vector<2x4x4xf32>
    %486 = arith.mulf %485, %485 : vector<2x4x4xf32>
    %cst_252 = arith.constant dense<0.000000e+00> : vector<2x4xf32>
    %487 = vector.multi_reduction <add>, %486, %cst_252 [2] : vector<2x4x4xf32> to vector<2x4xf32>
    %cst_253 = arith.constant dense<0.000000e+00> : vector<2xf32>
    %488 = vector.multi_reduction <add>, %487, %cst_253 [1] : vector<2x4xf32> to vector<2xf32>
    %489 = vector.shape_cast %488 : vector<2xf32> to vector<2x1xf32>
    %490 = arith.addf %457, %489 : vector<2x1xf32>
    %cst_254 = arith.constant dense<0.000000e+00> : vector<2x4xf32>
    %491 = vector.multi_reduction <add>, %485, %cst_254 [2] : vector<2x4x4xf32> to vector<2x4xf32>
    %cst_255 = arith.constant dense<0.000000e+00> : vector<2xf32>
    %492 = vector.multi_reduction <add>, %491, %cst_255 [1] : vector<2x4xf32> to vector<2xf32>
    %493 = vector.shape_cast %492 : vector<2xf32> to vector<2x1xf32>
    %494 = arith.addf %461, %493 : vector<2x1xf32>
    %495 = arith.extui %476 : vector<2x4x4xi1> to vector<2x4x4xi32>
    %496 = arith.sitofp %495 : vector<2x4x4xi32> to vector<2x4x4xf32>
    %cst_256 = arith.constant dense<0.000000e+00> : vector<2x4xf32>
    %497 = vector.multi_reduction <add>, %496, %cst_256 [2] : vector<2x4x4xf32> to vector<2x4xf32>
    %cst_257 = arith.constant dense<0.000000e+00> : vector<2xf32>
    %498 = vector.multi_reduction <add>, %497, %cst_257 [1] : vector<2x4xf32> to vector<2xf32>
    %499 = vector.shape_cast %498 : vector<2xf32> to vector<2x1xf32>
    %500 = arith.addf %467, %499 : vector<2x1xf32>
    %c0_258 = arith.constant 0 : index
    %c15 = arith.constant 15 : index
    %c0_259 = arith.constant 0 : index
    %c0_260 = arith.constant 0 : index
    %501 = vector.load %arg2[%c0_258, %c15, %c0_259, %c0_260] : memref<2x16x4x4xf32, #tpu.memory_space<vmem>>, vector<2x1x4x4xf32>
    %502 = vector.shape_cast %501 : vector<2x1x4x4xf32> to vector<2x4x4xf32>
    %c0_261 = arith.constant 0 : index
    %c15_262 = arith.constant 15 : index
    %c0_263 = arith.constant 0 : index
    %c0_264 = arith.constant 0 : index
    %503 = vector.load %arg3[%c0_261, %c15_262, %c0_263, %c0_264] : memref<2x16x4x4xf32, #tpu.memory_space<vmem>>, vector<2x1x4x4xf32>
    %504 = vector.shape_cast %503 : vector<2x1x4x4xf32> to vector<2x4x4xf32>
    %cst_265 = arith.constant 1.000000e-01 : f32
    %505 = vector.broadcast %cst_265 : f32 to vector<2x4x4xf32>
    %506 = arith.cmpf ogt, %504, %505 : vector<2x4x4xf32>
    %cst_266 = arith.constant 1.000000e+01 : f32
    %507 = vector.broadcast %cst_266 : f32 to vector<2x4x4xf32>
    %508 = arith.cmpf olt, %504, %507 : vector<2x4x4xf32>
    %509 = arith.andi %506, %508 : vector<2x4x4xi1>
    %510 = math.log %502 : vector<2x4x4xf32>
    %511 = math.log %504 : vector<2x4x4xf32>
    %512 = arith.subf %510, %511 : vector<2x4x4xf32>
    %513 = math.absf %512 : vector<2x4x4xf32>
    %cst_267 = arith.constant 1.000000e-03 : f32
    %514 = vector.broadcast %cst_267 : f32 to vector<2x4x4xf32>
    %515 = arith.cmpf ogt, %513, %514 : vector<2x4x4xf32>
    %516 = arith.andi %509, %515 : vector<2x4x4xi1>
    %cst_268 = arith.constant 0.000000e+00 : f32
    %517 = vector.broadcast %cst_268 : f32 to vector<2x4x4xf32>
    %518 = arith.select %516, %512, %517 : vector<2x4x4xi1>, vector<2x4x4xf32>
    %519 = arith.mulf %518, %518 : vector<2x4x4xf32>
    %cst_269 = arith.constant dense<0.000000e+00> : vector<2x4xf32>
    %520 = vector.multi_reduction <add>, %519, %cst_269 [2] : vector<2x4x4xf32> to vector<2x4xf32>
    %cst_270 = arith.constant dense<0.000000e+00> : vector<2xf32>
    %521 = vector.multi_reduction <add>, %520, %cst_270 [1] : vector<2x4xf32> to vector<2xf32>
    %522 = vector.shape_cast %521 : vector<2xf32> to vector<2x1xf32>
    %523 = arith.addf %490, %522 : vector<2x1xf32>
    %cst_271 = arith.constant dense<0.000000e+00> : vector<2x4xf32>
    %524 = vector.multi_reduction <add>, %518, %cst_271 [2] : vector<2x4x4xf32> to vector<2x4xf32>
    %cst_272 = arith.constant dense<0.000000e+00> : vector<2xf32>
    %525 = vector.multi_reduction <add>, %524, %cst_272 [1] : vector<2x4xf32> to vector<2xf32>
    %526 = vector.shape_cast %525 : vector<2xf32> to vector<2x1xf32>
    %527 = arith.addf %494, %526 : vector<2x1xf32>
    %528 = arith.extui %509 : vector<2x4x4xi1> to vector<2x4x4xi32>
    %529 = arith.sitofp %528 : vector<2x4x4xi32> to vector<2x4x4xf32>
    %cst_273 = arith.constant dense<0.000000e+00> : vector<2x4xf32>
    %530 = vector.multi_reduction <add>, %529, %cst_273 [2] : vector<2x4x4xf32> to vector<2x4xf32>
    %cst_274 = arith.constant dense<0.000000e+00> : vector<2xf32>
    %531 = vector.multi_reduction <add>, %530, %cst_274 [1] : vector<2x4xf32> to vector<2xf32>
    %532 = vector.shape_cast %531 : vector<2xf32> to vector<2x1xf32>
    %533 = arith.addf %500, %532 : vector<2x1xf32>
    %c0_275 = arith.constant 0 : index
    %c0_276 = arith.constant 0 : index
    %c0_277 = arith.constant 0 : index
    %534 = vector.load %arg4[%c0_275, %c0_276, %c0_277] : memref<1x2x1xf32, #tpu.memory_space<vmem>>, vector<1x2x1xf32>
    %535 = vector.shape_cast %534 : vector<1x2x1xf32> to vector<2x1xf32>
    %536 = arith.addf %535, %523 : vector<2x1xf32>
    %c0_278 = arith.constant 0 : index
    %c0_279 = arith.constant 0 : index
    %c0_280 = arith.constant 0 : index
    %537 = vector.load %arg4[%c0_278, %c0_279, %c0_280] : memref<1x2x1xf32, #tpu.memory_space<vmem>>, vector<1x2x1xf32>
    %538 = vector.shape_cast %537 : vector<1x2x1xf32> to vector<2x1xf32>
    %539 = vector.shape_cast %536 : vector<2x1xf32> to vector<1x2x1xf32>
    tpu.vector_store %arg4[%c0_278, %c0_279, %c0_280], %539 {strides = array<i32>} : memref<1x2x1xf32, #tpu.memory_space<vmem>>, vector<1x2x1xf32>,
    %c0_281 = arith.constant 0 : index
    %c0_282 = arith.constant 0 : index
    %c0_283 = arith.constant 0 : index
    %540 = vector.load %arg5[%c0_281, %c0_282, %c0_283] : memref<1x2x1xf32, #tpu.memory_space<vmem>>, vector<1x2x1xf32>
    %541 = vector.shape_cast %540 : vector<1x2x1xf32> to vector<2x1xf32>
    %542 = arith.addf %541, %527 : vector<2x1xf32>
    %c0_284 = arith.constant 0 : index
    %c0_285 = arith.constant 0 : index
    %c0_286 = arith.constant 0 : index
    %543 = vector.load %arg5[%c0_284, %c0_285, %c0_286] : memref<1x2x1xf32, #tpu.memory_space<vmem>>, vector<1x2x1xf32>
    %544 = vector.shape_cast %543 : vector<1x2x1xf32> to vector<2x1xf32>
    %545 = vector.shape_cast %542 : vector<2x1xf32> to vector<1x2x1xf32>
    tpu.vector_store %arg5[%c0_284, %c0_285, %c0_286], %545 {strides = array<i32>} : memref<1x2x1xf32, #tpu.memory_space<vmem>>, vector<1x2x1xf32>,
    %c0_287 = arith.constant 0 : index
    %c0_288 = arith.constant 0 : index
    %c0_289 = arith.constant 0 : index
    %546 = vector.load %arg6[%c0_287, %c0_288, %c0_289] : memref<1x2x1xf32, #tpu.memory_space<vmem>>, vector<1x2x1xf32>
    %547 = vector.shape_cast %546 : vector<1x2x1xf32> to vector<2x1xf32>
    %548 = arith.addf %547, %533 : vector<2x1xf32>
    %c0_290 = arith.constant 0 : index
    %c0_291 = arith.constant 0 : index
    %c0_292 = arith.constant 0 : index
    %549 = vector.load %arg6[%c0_290, %c0_291, %c0_292] : memref<1x2x1xf32, #tpu.memory_space<vmem>>, vector<1x2x1xf32>
    %550 = vector.shape_cast %549 : vector<1x2x1xf32> to vector<2x1xf32>
    %551 = vector.shape_cast %548 : vector<2x1xf32> to vector<1x2x1xf32>
    tpu.vector_store %arg6[%c0_290, %c0_291, %c0_292], %551 {strides = array<i32>} : memref<1x2x1xf32, #tpu.memory_space<vmem>>, vector<1x2x1xf32>,
    return
  }
  func.func @transform_0(%arg0: i32, %arg1: i32) -> (i32, i32, i32, i32) {
    %c1_i32 = arith.constant 1 : i32
    %0 = arith.muli %arg0, %c1_i32 : i32
    %1 = arith.addi %0, %arg1 : i32
    %c0_i32 = arith.constant 0 : i32
    %2 = arith.minsi %1, %c0_i32 : i32
    %c0_i32_0 = arith.constant 0 : i32
    %c0_i32_1 = arith.constant 0 : i32
    %c0_i32_2 = arith.constant 0 : i32
    %c0_i32_3 = arith.constant 0 : i32
    return %c0_i32_0, %c0_i32_1, %2, %c0_i32_2 : i32, i32, i32, i32
  }
  func.func @transform_1(%arg0: i32, %arg1: i32) -> (i32, i32, i32, i32) {
    %c1_i32 = arith.constant 1 : i32
    %0 = arith.muli %arg0, %c1_i32 : i32
    %1 = arith.addi %0, %arg1 : i32
    %c0_i32 = arith.constant 0 : i32
    %2 = arith.minsi %1, %c0_i32 : i32
    %c0_i32_0 = arith.constant 0 : i32
    %c0_i32_1 = arith.constant 0 : i32
    %c0_i32_2 = arith.constant 0 : i32
    %c0_i32_3 = arith.constant 0 : i32
    return %c0_i32_0, %c0_i32_1, %2, %c0_i32_2 : i32, i32, i32, i32
  }
  func.func @transform_2(%arg0: i32, %arg1: i32) -> (i32, i32, i32) {
    %c0_i32 = arith.constant 0 : i32
    %c0_i32_0 = arith.constant 0 : i32
    %c0_i32_1 = arith.constant 0 : i32
    return %arg0, %c0_i32, %c0_i32_0 : i32, i32, i32
  }
  func.func @transform_3(%arg0: i32, %arg1: i32) -> (i32, i32, i32) {
    %c0_i32 = arith.constant 0 : i32
    %c0_i32_0 = arith.constant 0 : i32
    %c0_i32_1 = arith.constant 0 : i32
    return %arg0, %c0_i32, %c0_i32_0 : i32, i32, i32
  }
  func.func @transform_4(%arg0: i32, %arg1: i32) -> (i32, i32, i32) {
    %c0_i32 = arith.constant 0 : i32
    %c0_i32_0 = arith.constant 0 : i32
    %c0_i32_1 = arith.constant 0 : i32
    return %arg0, %c0_i32, %c0_i32_0 : i32, i32, i32
  }
}

module attributes {stable_mosaic.version = 11 : i64} {
  func.func @_silog_scale_kernel(%arg0: i32, %arg1: i32, %arg2: memref<2x4x8x8xf32, #tpu.memory_space<vmem>>, %arg3: memref<2x4x8x8xf32, #tpu.memory_space<vmem>>, %arg4: memref<1x2x1xf32, #tpu.memory_space<vmem>>, %arg5: memref<1x2x1xf32, #tpu.memory_space<vmem>>, %arg6: memref<1x2x1xf32, #tpu.memory_space<vmem>>) attributes {dimension_semantics = [#tpu.dimension_semantics<parallel>, #tpu.dimension_semantics<arbitrary>], iteration_bounds = array<i64: 1, 1>, scalar_prefetch = 0 : i64, scratch_operands = 0 : i64, tpu.core_type = #tpu.core_type<tc>, window_params = [{transform_indices = @transform_0, window_bounds = array<i64: 2, 4, 8, 8>}, {transform_indices = @transform_1, window_bounds = array<i64: 2, 4, 8, 8>}, {transform_indices = @transform_2, window_bounds = array<i64: 1, 2, 1>}, {transform_indices = @transform_3, window_bounds = array<i64: 1, 2, 1>}, {transform_indices = @transform_4, window_bounds = array<i64: 1, 2, 1>}]} {
    %c0_i32 = arith.constant 0 : i32
    %0 = arith.cmpi eq, %arg1, %c0_i32 : i32
    %1 = arith.extui %0 : i1 to i32
    %c0_i32_0 = arith.constant 0 : i32
    %2 = arith.cmpi ne, %1, %c0_i32_0 : i32
    scf.if %2 {
      %cst_89 = arith.constant 0.000000e+00 : f32
      %156 = vector.broadcast %cst_89 : f32 to vector<1x2x1xf32>
      %c0_90 = arith.constant 0 : index
      %c0_91 = arith.constant 0 : index
      %c0_92 = arith.constant 0 : index
      %157 = vector.load %arg4[%c0_90, %c0_91, %c0_92] : memref<1x2x1xf32, #tpu.memory_space<vmem>>, vector<1x2x1xf32>
      tpu.vector_store %arg4[%c0_90, %c0_91, %c0_92], %156 {strides = array<i32>} : memref<1x2x1xf32, #tpu.memory_space<vmem>>, vector<1x2x1xf32>,
      %cst_93 = arith.constant 0.000000e+00 : f32
      %158 = vector.broadcast %cst_93 : f32 to vector<1x2x1xf32>
      %c0_94 = arith.constant 0 : index
      %c0_95 = arith.constant 0 : index
      %c0_96 = arith.constant 0 : index
      %159 = vector.load %arg5[%c0_94, %c0_95, %c0_96] : memref<1x2x1xf32, #tpu.memory_space<vmem>>, vector<1x2x1xf32>
      tpu.vector_store %arg5[%c0_94, %c0_95, %c0_96], %158 {strides = array<i32>} : memref<1x2x1xf32, #tpu.memory_space<vmem>>, vector<1x2x1xf32>,
      %cst_97 = arith.constant 0.000000e+00 : f32
      %160 = vector.broadcast %cst_97 : f32 to vector<1x2x1xf32>
      %c0_98 = arith.constant 0 : index
      %c0_99 = arith.constant 0 : index
      %c0_100 = arith.constant 0 : index
      %161 = vector.load %arg6[%c0_98, %c0_99, %c0_100] : memref<1x2x1xf32, #tpu.memory_space<vmem>>, vector<1x2x1xf32>
      tpu.vector_store %arg6[%c0_98, %c0_99, %c0_100], %160 {strides = array<i32>} : memref<1x2x1xf32, #tpu.memory_space<vmem>>, vector<1x2x1xf32>,
    } else {
    }
    %cst = arith.constant 0.000000e+00 : f32
    %3 = vector.broadcast %cst : f32 to vector<2x1xf32>
    %cst_1 = arith.constant 0.000000e+00 : f32
    %4 = vector.broadcast %cst_1 : f32 to vector<2x1xf32>
    %cst_2 = arith.constant 0.000000e+00 : f32
    %5 = vector.broadcast %cst_2 : f32 to vector<2x1xf32>
    %c0 = arith.constant 0 : index
    %c0_3 = arith.constant 0 : index
    %c0_4 = arith.constant 0 : index
    %c0_5 = arith.constant 0 : index
    %6 = vector.load %arg2[%c0, %c0_3, %c0_4, %c0_5] : memref<2x4x8x8xf32, #tpu.memory_space<vmem>>, vector<2x1x8x8xf32>
    %7 = vector.shape_cast %6 : vector<2x1x8x8xf32> to vector<2x8x8xf32>
    %c0_6 = arith.constant 0 : index
    %c0_7 = arith.constant 0 : index
    %c0_8 = arith.constant 0 : index
    %c0_9 = arith.constant 0 : index
    %8 = vector.load %arg3[%c0_6, %c0_7, %c0_8, %c0_9] : memref<2x4x8x8xf32, #tpu.memory_space<vmem>>, vector<2x1x8x8xf32>
    %9 = vector.shape_cast %8 : vector<2x1x8x8xf32> to vector<2x8x8xf32>
    %cst_10 = arith.constant 1.000000e-01 : f32
    %10 = vector.broadcast %cst_10 : f32 to vector<2x8x8xf32>
    %11 = arith.cmpf ogt, %9, %10 : vector<2x8x8xf32>
    %cst_11 = arith.constant 1.000000e+01 : f32
    %12 = vector.broadcast %cst_11 : f32 to vector<2x8x8xf32>
    %13 = arith.cmpf olt, %9, %12 : vector<2x8x8xf32>
    %14 = arith.andi %11, %13 : vector<2x8x8xi1>
    %15 = math.log %7 : vector<2x8x8xf32>
    %16 = math.log %9 : vector<2x8x8xf32>
    %17 = arith.subf %15, %16 : vector<2x8x8xf32>
    %18 = math.absf %17 : vector<2x8x8xf32>
    %cst_12 = arith.constant 1.000000e-03 : f32
    %19 = vector.broadcast %cst_12 : f32 to vector<2x8x8xf32>
    %20 = arith.cmpf ogt, %18, %19 : vector<2x8x8xf32>
    %21 = arith.andi %14, %20 : vector<2x8x8xi1>
    %cst_13 = arith.constant 0.000000e+00 : f32
    %22 = vector.broadcast %cst_13 : f32 to vector<2x8x8xf32>
    %23 = arith.select %21, %17, %22 : vector<2x8x8xi1>, vector<2x8x8xf32>
    %24 = arith.mulf %23, %23 : vector<2x8x8xf32>
    %cst_14 = arith.constant dense<0.000000e+00> : vector<2x8xf32>
    %25 = vector.multi_reduction <add>, %24, %cst_14 [2] : vector<2x8x8xf32> to vector<2x8xf32>
    %cst_15 = arith.constant dense<0.000000e+00> : vector<2xf32>
    %26 = vector.multi_reduction <add>, %25, %cst_15 [1] : vector<2x8xf32> to vector<2xf32>
    %27 = vector.shape_cast %26 : vector<2xf32> to vector<2x1xf32>
    %28 = arith.addf %3, %27 : vector<2x1xf32>
    %cst_16 = arith.constant dense<0.000000e+00> : vector<2x8xf32>
    %29 = vector.multi_reduction <add>, %23, %cst_16 [2] : vector<2x8x8xf32> to vector<2x8xf32>
    %cst_17 = arith.constant dense<0.000000e+00> : vector<2xf32>
    %30 = vector.multi_reduction <add>, %29, %cst_17 [1] : vector<2x8xf32> to vector<2xf32>
    %31 = vector.shape_cast %30 : vector<2xf32> to vector<2x1xf32>
    %32 = arith.addf %4, %31 : vector<2x1xf32>
    %33 = arith.extui %14 : vector<2x8x8xi1> to vector<2x8x8xi32>
    %34 = arith.sitofp %33 : vector<2x8x8xi32> to vector<2x8x8xf32>
    %cst_18 = arith.constant dense<0.000000e+00> : vector<2x8xf32>
    %35 = vector.multi_reduction <add>, %34, %cst_18 [2] : vector<2x8x8xf32> to vector<2x8xf32>
    %cst_19 = arith.constant dense<0.000000e+00> : vector<2xf32>
    %36 = vector.multi_reduction <add>, %35, %cst_19 [1] : vector<2x8xf32> to vector<2xf32>
    %37 = vector.shape_cast %36 : vector<2xf32> to vector<2x1xf32>
    %38 = arith.addf %5, %37 : vector<2x1xf32>
    %c0_20 = arith.constant 0 : index
    %c1 = arith.constant 1 : index
    %c0_21 = arith.constant 0 : index
    %c0_22 = arith.constant 0 : index
    %39 = vector.load %arg2[%c0_20, %c1, %c0_21, %c0_22] : memref<2x4x8x8xf32, #tpu.memory_space<vmem>>, vector<2x1x8x8xf32>
    %40 = vector.shape_cast %39 : vector<2x1x8x8xf32> to vector<2x8x8xf32>
    %c0_23 = arith.constant 0 : index
    %c1_24 = arith.constant 1 : index
    %c0_25 = arith.constant 0 : index
    %c0_26 = arith.constant 0 : index
    %41 = vector.load %arg3[%c0_23, %c1_24, %c0_25, %c0_26] : memref<2x4x8x8xf32, #tpu.memory_space<vmem>>, vector<2x1x8x8xf32>
    %42 = vector.shape_cast %41 : vector<2x1x8x8xf32> to vector<2x8x8xf32>
    %cst_27 = arith.constant 1.000000e-01 : f32
    %43 = vector.broadcast %cst_27 : f32 to vector<2x8x8xf32>
    %44 = arith.cmpf ogt, %42, %43 : vector<2x8x8xf32>
    %cst_28 = arith.constant 1.000000e+01 : f32
    %45 = vector.broadcast %cst_28 : f32 to vector<2x8x8xf32>
    %46 = arith.cmpf olt, %42, %45 : vector<2x8x8xf32>
    %47 = arith.andi %44, %46 : vector<2x8x8xi1>
    %48 = math.log %40 : vector<2x8x8xf32>
    %49 = math.log %42 : vector<2x8x8xf32>
    %50 = arith.subf %48, %49 : vector<2x8x8xf32>
    %51 = math.absf %50 : vector<2x8x8xf32>
    %cst_29 = arith.constant 1.000000e-03 : f32
    %52 = vector.broadcast %cst_29 : f32 to vector<2x8x8xf32>
    %53 = arith.cmpf ogt, %51, %52 : vector<2x8x8xf32>
    %54 = arith.andi %47, %53 : vector<2x8x8xi1>
    %cst_30 = arith.constant 0.000000e+00 : f32
    %55 = vector.broadcast %cst_30 : f32 to vector<2x8x8xf32>
    %56 = arith.select %54, %50, %55 : vector<2x8x8xi1>, vector<2x8x8xf32>
    %57 = arith.mulf %56, %56 : vector<2x8x8xf32>
    %cst_31 = arith.constant dense<0.000000e+00> : vector<2x8xf32>
    %58 = vector.multi_reduction <add>, %57, %cst_31 [2] : vector<2x8x8xf32> to vector<2x8xf32>
    %cst_32 = arith.constant dense<0.000000e+00> : vector<2xf32>
    %59 = vector.multi_reduction <add>, %58, %cst_32 [1] : vector<2x8xf32> to vector<2xf32>
    %60 = vector.shape_cast %59 : vector<2xf32> to vector<2x1xf32>
    %61 = arith.addf %28, %60 : vector<2x1xf32>
    %cst_33 = arith.constant dense<0.000000e+00> : vector<2x8xf32>
    %62 = vector.multi_reduction <add>, %56, %cst_33 [2] : vector<2x8x8xf32> to vector<2x8xf32>
    %cst_34 = arith.constant dense<0.000000e+00> : vector<2xf32>
    %63 = vector.multi_reduction <add>, %62, %cst_34 [1] : vector<2x8xf32> to vector<2xf32>
    %64 = vector.shape_cast %63 : vector<2xf32> to vector<2x1xf32>
    %65 = arith.addf %32, %64 : vector<2x1xf32>
    %66 = arith.extui %47 : vector<2x8x8xi1> to vector<2x8x8xi32>
    %67 = arith.sitofp %66 : vector<2x8x8xi32> to vector<2x8x8xf32>
    %cst_35 = arith.constant dense<0.000000e+00> : vector<2x8xf32>
    %68 = vector.multi_reduction <add>, %67, %cst_35 [2] : vector<2x8x8xf32> to vector<2x8xf32>
    %cst_36 = arith.constant dense<0.000000e+00> : vector<2xf32>
    %69 = vector.multi_reduction <add>, %68, %cst_36 [1] : vector<2x8xf32> to vector<2xf32>
    %70 = vector.shape_cast %69 : vector<2xf32> to vector<2x1xf32>
    %71 = arith.addf %38, %70 : vector<2x1xf32>
    %c0_37 = arith.constant 0 : index
    %c2 = arith.constant 2 : index
    %c0_38 = arith.constant 0 : index
    %c0_39 = arith.constant 0 : index
    %72 = vector.load %arg2[%c0_37, %c2, %c0_38, %c0_39] : memref<2x4x8x8xf32, #tpu.memory_space<vmem>>, vector<2x1x8x8xf32>
    %73 = vector.shape_cast %72 : vector<2x1x8x8xf32> to vector<2x8x8xf32>
    %c0_40 = arith.constant 0 : index
    %c2_41 = arith.constant 2 : index
    %c0_42 = arith.constant 0 : index
    %c0_43 = arith.constant 0 : index
    %74 = vector.load %arg3[%c0_40, %c2_41, %c0_42, %c0_43] : memref<2x4x8x8xf32, #tpu.memory_space<vmem>>, vector<2x1x8x8xf32>
    %75 = vector.shape_cast %74 : vector<2x1x8x8xf32> to vector<2x8x8xf32>
    %cst_44 = arith.constant 1.000000e-01 : f32
    %76 = vector.broadcast %cst_44 : f32 to vector<2x8x8xf32>
    %77 = arith.cmpf ogt, %75, %76 : vector<2x8x8xf32>
    %cst_45 = arith.constant 1.000000e+01 : f32
    %78 = vector.broadcast %cst_45 : f32 to vector<2x8x8xf32>
    %79 = arith.cmpf olt, %75, %78 : vector<2x8x8xf32>
    %80 = arith.andi %77, %79 : vector<2x8x8xi1>
    %81 = math.log %73 : vector<2x8x8xf32>
    %82 = math.log %75 : vector<2x8x8xf32>
    %83 = arith.subf %81, %82 : vector<2x8x8xf32>
    %84 = math.absf %83 : vector<2x8x8xf32>
    %cst_46 = arith.constant 1.000000e-03 : f32
    %85 = vector.broadcast %cst_46 : f32 to vector<2x8x8xf32>
    %86 = arith.cmpf ogt, %84, %85 : vector<2x8x8xf32>
    %87 = arith.andi %80, %86 : vector<2x8x8xi1>
    %cst_47 = arith.constant 0.000000e+00 : f32
    %88 = vector.broadcast %cst_47 : f32 to vector<2x8x8xf32>
    %89 = arith.select %87, %83, %88 : vector<2x8x8xi1>, vector<2x8x8xf32>
    %90 = arith.mulf %89, %89 : vector<2x8x8xf32>
    %cst_48 = arith.constant dense<0.000000e+00> : vector<2x8xf32>
    %91 = vector.multi_reduction <add>, %90, %cst_48 [2] : vector<2x8x8xf32> to vector<2x8xf32>
    %cst_49 = arith.constant dense<0.000000e+00> : vector<2xf32>
    %92 = vector.multi_reduction <add>, %91, %cst_49 [1] : vector<2x8xf32> to vector<2xf32>
    %93 = vector.shape_cast %92 : vector<2xf32> to vector<2x1xf32>
    %94 = arith.addf %61, %93 : vector<2x1xf32>
    %cst_50 = arith.constant dense<0.000000e+00> : vector<2x8xf32>
    %95 = vector.multi_reduction <add>, %89, %cst_50 [2] : vector<2x8x8xf32> to vector<2x8xf32>
    %cst_51 = arith.constant dense<0.000000e+00> : vector<2xf32>
    %96 = vector.multi_reduction <add>, %95, %cst_51 [1] : vector<2x8xf32> to vector<2xf32>
    %97 = vector.shape_cast %96 : vector<2xf32> to vector<2x1xf32>
    %98 = arith.addf %65, %97 : vector<2x1xf32>
    %99 = arith.extui %80 : vector<2x8x8xi1> to vector<2x8x8xi32>
    %100 = arith.sitofp %99 : vector<2x8x8xi32> to vector<2x8x8xf32>
    %cst_52 = arith.constant dense<0.000000e+00> : vector<2x8xf32>
    %101 = vector.multi_reduction <add>, %100, %cst_52 [2] : vector<2x8x8xf32> to vector<2x8xf32>
    %cst_53 = arith.constant dense<0.000000e+00> : vector<2xf32>
    %102 = vector.multi_reduction <add>, %101, %cst_53 [1] : vector<2x8xf32> to vector<2xf32>
    %103 = vector.shape_cast %102 : vector<2xf32> to vector<2x1xf32>
    %104 = arith.addf %71, %103 : vector<2x1xf32>
    %c0_54 = arith.constant 0 : index
    %c3 = arith.constant 3 : index
    %c0_55 = arith.constant 0 : index
    %c0_56 = arith.constant 0 : index
    %105 = vector.load %arg2[%c0_54, %c3, %c0_55, %c0_56] : memref<2x4x8x8xf32, #tpu.memory_space<vmem>>, vector<2x1x8x8xf32>
    %106 = vector.shape_cast %105 : vector<2x1x8x8xf32> to vector<2x8x8xf32>
    %c0_57 = arith.constant 0 : index
    %c3_58 = arith.constant 3 : index
    %c0_59 = arith.constant 0 : index
    %c0_60 = arith.constant 0 : index
    %107 = vector.load %arg3[%c0_57, %c3_58, %c0_59, %c0_60] : memref<2x4x8x8xf32, #tpu.memory_space<vmem>>, vector<2x1x8x8xf32>
    %108 = vector.shape_cast %107 : vector<2x1x8x8xf32> to vector<2x8x8xf32>
    %cst_61 = arith.constant 1.000000e-01 : f32
    %109 = vector.broadcast %cst_61 : f32 to vector<2x8x8xf32>
    %110 = arith.cmpf ogt, %108, %109 : vector<2x8x8xf32>
    %cst_62 = arith.constant 1.000000e+01 : f32
    %111 = vector.broadcast %cst_62 : f32 to vector<2x8x8xf32>
    %112 = arith.cmpf olt, %108, %111 : vector<2x8x8xf32>
    %113 = arith.andi %110, %112 : vector<2x8x8xi1>
    %114 = math.log %106 : vector<2x8x8xf32>
    %115 = math.log %108 : vector<2x8x8xf32>
    %116 = arith.subf %114, %115 : vector<2x8x8xf32>
    %117 = math.absf %116 : vector<2x8x8xf32>
    %cst_63 = arith.constant 1.000000e-03 : f32
    %118 = vector.broadcast %cst_63 : f32 to vector<2x8x8xf32>
    %119 = arith.cmpf ogt, %117, %118 : vector<2x8x8xf32>
    %120 = arith.andi %113, %119 : vector<2x8x8xi1>
    %cst_64 = arith.constant 0.000000e+00 : f32
    %121 = vector.broadcast %cst_64 : f32 to vector<2x8x8xf32>
    %122 = arith.select %120, %116, %121 : vector<2x8x8xi1>, vector<2x8x8xf32>
    %123 = arith.mulf %122, %122 : vector<2x8x8xf32>
    %cst_65 = arith.constant dense<0.000000e+00> : vector<2x8xf32>
    %124 = vector.multi_reduction <add>, %123, %cst_65 [2] : vector<2x8x8xf32> to vector<2x8xf32>
    %cst_66 = arith.constant dense<0.000000e+00> : vector<2xf32>
    %125 = vector.multi_reduction <add>, %124, %cst_66 [1] : vector<2x8xf32> to vector<2xf32>
    %126 = vector.shape_cast %125 : vector<2xf32> to vector<2x1xf32>
    %127 = arith.addf %94, %126 : vector<2x1xf32>
    %cst_67 = arith.constant dense<0.000000e+00> : vector<2x8xf32>
    %128 = vector.multi_reduction <add>, %122, %cst_67 [2] : vector<2x8x8xf32> to vector<2x8xf32>
    %cst_68 = arith.constant dense<0.000000e+00> : vector<2xf32>
    %129 = vector.multi_reduction <add>, %128, %cst_68 [1] : vector<2x8xf32> to vector<2xf32>
    %130 = vector.shape_cast %129 : vector<2xf32> to vector<2x1xf32>
    %131 = arith.addf %98, %130 : vector<2x1xf32>
    %132 = arith.extui %113 : vector<2x8x8xi1> to vector<2x8x8xi32>
    %133 = arith.sitofp %132 : vector<2x8x8xi32> to vector<2x8x8xf32>
    %cst_69 = arith.constant dense<0.000000e+00> : vector<2x8xf32>
    %134 = vector.multi_reduction <add>, %133, %cst_69 [2] : vector<2x8x8xf32> to vector<2x8xf32>
    %cst_70 = arith.constant dense<0.000000e+00> : vector<2xf32>
    %135 = vector.multi_reduction <add>, %134, %cst_70 [1] : vector<2x8xf32> to vector<2xf32>
    %136 = vector.shape_cast %135 : vector<2xf32> to vector<2x1xf32>
    %137 = arith.addf %104, %136 : vector<2x1xf32>
    %c0_71 = arith.constant 0 : index
    %c0_72 = arith.constant 0 : index
    %c0_73 = arith.constant 0 : index
    %138 = vector.load %arg4[%c0_71, %c0_72, %c0_73] : memref<1x2x1xf32, #tpu.memory_space<vmem>>, vector<1x2x1xf32>
    %139 = vector.shape_cast %138 : vector<1x2x1xf32> to vector<2x1xf32>
    %140 = arith.addf %139, %127 : vector<2x1xf32>
    %c0_74 = arith.constant 0 : index
    %c0_75 = arith.constant 0 : index
    %c0_76 = arith.constant 0 : index
    %141 = vector.load %arg4[%c0_74, %c0_75, %c0_76] : memref<1x2x1xf32, #tpu.memory_space<vmem>>, vector<1x2x1xf32>
    %142 = vector.shape_cast %141 : vector<1x2x1xf32> to vector<2x1xf32>
    %143 = vector.shape_cast %140 : vector<2x1xf32> to vector<1x2x1xf32>
    tpu.vector_store %arg4[%c0_74, %c0_75, %c0_76], %143 {strides = array<i32>} : memref<1x2x1xf32, #tpu.memory_space<vmem>>, vector<1x2x1xf32>,
    %c0_77 = arith.constant 0 : index
    %c0_78 = arith.constant 0 : index
    %c0_79 = arith.constant 0 : index
    %144 = vector.load %arg5[%c0_77, %c0_78, %c0_79] : memref<1x2x1xf32, #tpu.memory_space<vmem>>, vector<1x2x1xf32>
    %145 = vector.shape_cast %144 : vector<1x2x1xf32> to vector<2x1xf32>
    %146 = arith.addf %145, %131 : vector<2x1xf32>
    %c0_80 = arith.constant 0 : index
    %c0_81 = arith.constant 0 : index
    %c0_82 = arith.constant 0 : index
    %147 = vector.load %arg5[%c0_80, %c0_81, %c0_82] : memref<1x2x1xf32, #tpu.memory_space<vmem>>, vector<1x2x1xf32>
    %148 = vector.shape_cast %147 : vector<1x2x1xf32> to vector<2x1xf32>
    %149 = vector.shape_cast %146 : vector<2x1xf32> to vector<1x2x1xf32>
    tpu.vector_store %arg5[%c0_80, %c0_81, %c0_82], %149 {strides = array<i32>} : memref<1x2x1xf32, #tpu.memory_space<vmem>>, vector<1x2x1xf32>,
    %c0_83 = arith.constant 0 : index
    %c0_84 = arith.constant 0 : index
    %c0_85 = arith.constant 0 : index
    %150 = vector.load %arg6[%c0_83, %c0_84, %c0_85] : memref<1x2x1xf32, #tpu.memory_space<vmem>>, vector<1x2x1xf32>
    %151 = vector.shape_cast %150 : vector<1x2x1xf32> to vector<2x1xf32>
    %152 = arith.addf %151, %137 : vector<2x1xf32>
    %c0_86 = arith.constant 0 : index
    %c0_87 = arith.constant 0 : index
    %c0_88 = arith.constant 0 : index
    %153 = vector.load %arg6[%c0_86, %c0_87, %c0_88] : memref<1x2x1xf32, #tpu.memory_space<vmem>>, vector<1x2x1xf32>
    %154 = vector.shape_cast %153 : vector<1x2x1xf32> to vector<2x1xf32>
    %155 = vector.shape_cast %152 : vector<2x1xf32> to vector<1x2x1xf32>
    tpu.vector_store %arg6[%c0_86, %c0_87, %c0_88], %155 {strides = array<i32>} : memref<1x2x1xf32, #tpu.memory_space<vmem>>, vector<1x2x1xf32>,
    return
  }
  func.func @transform_0(%arg0: i32, %arg1: i32) -> (i32, i32, i32, i32) {
    %c1_i32 = arith.constant 1 : i32
    %0 = arith.muli %arg0, %c1_i32 : i32
    %1 = arith.addi %0, %arg1 : i32
    %c0_i32 = arith.constant 0 : i32
    %2 = arith.minsi %1, %c0_i32 : i32
    %c0_i32_0 = arith.constant 0 : i32
    %c0_i32_1 = arith.constant 0 : i32
    %c0_i32_2 = arith.constant 0 : i32
    %c0_i32_3 = arith.constant 0 : i32
    return %c0_i32_0, %c0_i32_1, %2, %c0_i32_2 : i32, i32, i32, i32
  }
  func.func @transform_1(%arg0: i32, %arg1: i32) -> (i32, i32, i32, i32) {
    %c1_i32 = arith.constant 1 : i32
    %0 = arith.muli %arg0, %c1_i32 : i32
    %1 = arith.addi %0, %arg1 : i32
    %c0_i32 = arith.constant 0 : i32
    %2 = arith.minsi %1, %c0_i32 : i32
    %c0_i32_0 = arith.constant 0 : i32
    %c0_i32_1 = arith.constant 0 : i32
    %c0_i32_2 = arith.constant 0 : i32
    %c0_i32_3 = arith.constant 0 : i32
    return %c0_i32_0, %c0_i32_1, %2, %c0_i32_2 : i32, i32, i32, i32
  }
  func.func @transform_2(%arg0: i32, %arg1: i32) -> (i32, i32, i32) {
    %c0_i32 = arith.constant 0 : i32
    %c0_i32_0 = arith.constant 0 : i32
    %c0_i32_1 = arith.constant 0 : i32
    return %arg0, %c0_i32, %c0_i32_0 : i32, i32, i32
  }
  func.func @transform_3(%arg0: i32, %arg1: i32) -> (i32, i32, i32) {
    %c0_i32 = arith.constant 0 : i32
    %c0_i32_0 = arith.constant 0 : i32
    %c0_i32_1 = arith.constant 0 : i32
    return %arg0, %c0_i32, %c0_i32_0 : i32, i32, i32
  }
  func.func @transform_4(%arg0: i32, %arg1: i32) -> (i32, i32, i32) {
    %c0_i32 = arith.constant 0 : i32
    %c0_i32_0 = arith.constant 0 : i32
    %c0_i32_1 = arith.constant 0 : i32
    return %arg0, %c0_i32, %c0_i32_0 : i32, i32, i32
  }
}

</mosaic_0001>

<bundles_post_ra>
// kernel: silog_loss.2
= control target key start
LH: loop header
LB: loop body
LE: loop exit
PB: predicated region body
PF: predicated region fallthrough
CT: control target
= control target key end

     0   :  { %vm106_vm0 = vcmask 64512   ;;  %v502_v5 = vmov 0.0   ;;  %s789_s1 = inlined_call_operand.vmem [shape: f32[2,4,8,8], index: 1, kind: input, shape index: {}]   ;;  %s790_s0 = inlined_call_operand.vmem [shape: f32[2,4,8,8], index: 0, kind: input, shape index: {}]   ;;  %s791_s3 = inlined_call_operand.vmem [shape: f32[1,2,1], index: 3, kind: output, shape index: {1}]   ;;  %s792_s2 = inlined_call_operand.vmem [shape: f32[1,2,1], index: 2, kind: output, shape index: {0}]   ;;  %s793_s4 = inlined_call_operand.vmem [shape: f32[1,2,1], index: 4, kind: output, shape index: {2}]  }
   0x1   :  { %v79_v0 = vld [vmem:[%s789_s1 + $0x20] sm:$0xff]  ;;  %v451_v8 = vld [vmem:[%s790_s0 + $0x8] sm:$0xff]  ;;  %v457_v15 = vld [vmem:[%s790_s0 + $0x10] sm:$0xff] }
   0x2   :  { %v78_v1 = vld [vmem:[%s789_s1] sm:$0xff]  ;;  %vm81_vm1 = vcmp.gt.f32.partialorder %v79_v0, 0.1  ;;  %vm83_vm2 = vcmp.lt.f32.partialorder %v79_v0, 10.0  ;;  %v453_v11 = vld [vmem:[%s789_s1 + $0x8] sm:$0xff]  ;;  %v576_v17 = vld [vmem:[%s789_s1 + $0x10] sm:$0xff] }
   0x3   :  { %v76_v2 = vld [vmem:[%s790_s0] sm:$0xff]  ;;  %vm80_vm3 = vcmp.gt.f32.partialorder %v78_v1, 0.1  ;;  %vm82_vm4 = vcmp.lt.f32.partialorder %v78_v1, 10.0  ;;  %vm537_vm5 = vmand %vm81_vm1, %vm83_vm2  ;;  %470 = vlog2.f32 %v78_v1  ;;  %v452_v13 = vld [vmem:[%s790_s0 + $0x28] sm:$0xff]  ;;  %vm171_vm8 = vcmp.lt.f32.partialorder %v453_v11, 10.0 }
   0x4   :  { %v77_v4 = vld [vmem:[%s790_s0 + $0x20] sm:$0xff]  ;;  %v450_v6 = vsel %vm537_vm5, 1.0, %v502_v5  ;;  %vm547_vm6 = vmand %vm80_vm3, %vm82_vm4  ;;  %472 = vlog2.f32 %v76_v2  ;;  %v568_v14 = vld [vmem:[%s789_s1 + $0x28] sm:$0xff]  ;;  %vm169_vm7 = vcmp.gt.f32.partialorder %v453_v11, 0.1 }
   0x5   :  { %v150_v9 = vsel %vm106_vm0, %v450_v6, 0.0  ;;  %v449_v10 = vsel %vm547_vm6, 1.0, %v502_v5  ;;  %474 = vlog2.f32 %v77_v4  ;;  %v458_v27 = vld [vmem:[%s790_s0 + $0x30] sm:$0xff]  ;;  %vm170_vm11 = vcmp.gt.f32.partialorder %v568_v14, 0.1  ;;  %vm594_vm13 = vmand %vm169_vm7, %vm171_vm8  ;;  %v463_v55 = vld [vmem:[%s790_s0 + $0x18] sm:$0xff] }
   0x6   :  { %151 = vadd.xlane.f32.xlu1 %v150_v9  ;;  %v147_v12 = vsel %vm106_vm0, %v449_v10, 0.0  ;;  %476 = vlog2.f32 %v79_v0  ;;  %v586_v34 = vld [vmem:[%s789_s1 + $0x30] sm:$0xff]  ;;  %vm172_vm15 = vcmp.lt.f32.partialorder %v568_v14, 10.0  ;;  %v622_v60 = vld [vmem:[%s789_s1 + $0x18] sm:$0xff]  ;;  %vm255_vm7 = vcmp.lt.f32.partialorder %v576_v17, 10.0 }
   0x7   :  { %148 = vadd.xlane.f32.xlu0 %v147_v12  ;;  %478 = vlog2.f32 %v451_v8  ;;  %vm611_vm3 = vmand %vm170_vm11, %vm172_vm15  ;;  %v464_v8 = vld [vmem:[%s790_s0 + $0x38] sm:$0xff]  ;;  %vm254_vm11 = vcmp.gt.f32.partialorder %v586_v34, 0.1 }
   0x8   :  { %480 = vlog2.f32 %v453_v11  ;;  %v456_v12 = vsel %vm611_vm3, 1.0, %v502_v5 }
   0x9   :  { %v471_v16 = vpop.eup %470  ;;  %482 = vlog2.f32 %v452_v13 }
   0xa   :  { %v473_v18 = vpop.eup %472  ;;  %v91_v19 = vmul.f32 0.6931472, %v471_v16  ;;  %484 = vlog2.f32 %v568_v14  ;;  %v466_v14 = vld [vmem:[%s789_s1 + $0x38] sm:$0xff] }
   0xb   :  { %v475_v20 = vpop.eup %474  ;;  %v87_v21 = vmul.f32 0.6931472, %v473_v18  ;;  %486 = vlog2.f32 %v457_v15 }
   0xc   :  { %v477_v22 = vpop.eup %476  ;;  %v89_v23 = vmul.f32 0.6931472, %v475_v20  ;;  %488 = vlog2.f32 %v576_v17 }
   0xd   :  { %v479_v24 = vpop.eup %478  ;;  %v94_v25 = vsub.f32 %v87_v21, %v91_v19  ;;  %v93_v26 = vmul.f32 0.6931472, %v477_v22  ;;  %490 = vlog2.f32 %v458_v27 }
   0xe   :  { %v481_v28 = vpop.eup %480  ;;  %v176_v29 = vmul.f32 0.6931472, %v479_v24  ;;  %492 = vlog2.f32 %v586_v34 }
   0xf   :  { %v483_v30 = vpop.eup %482  ;;  %v96_v31 = vand.u32 2147483647, %v94_v25  ;;  %v95_v32 = vsub.f32 %v89_v23, %v93_v26  ;;  %v180_v33 = vmul.f32 0.6931472, %v481_v28  ;;  %494 = vlog2.f32 %v463_v55 }
  0x10   :  { %v485_v35 = vpop.eup %484  ;;  %v178_v36 = vmul.f32 0.6931472, %v483_v30  ;;  %496 = vlog2.f32 %v622_v60 }
  0x11   :  { %v487_v37 = vpop.eup %486  ;;  %vm98_vm9 = vcmp.gt.f32.partialorder %v96_v31, 0.001  ;;  %v97_v38 = vand.u32 2147483647, %v95_v32  ;;  %v183_v39 = vsub.f32 %v176_v29, %v180_v33  ;;  %v182_v40 = vmul.f32 0.6931472, %v485_v35 }
  0x12   :  { %v489_v41 = vpop.eup %488  ;;  %vm100_vm10 = vmand %vm547_vm6, %vm98_vm9  ;;  %v260_v42 = vmul.f32 0.6931472, %v487_v37  ;;  %vm253_vm6 = vcmp.gt.f32.partialorder %v576_v17, 0.1  ;;  %498 = vlog2.f32 %v464_v8  ;;  %v234_v17 = vsel %vm106_vm0, %v456_v12, 0.0 }
  0x13   :  { %vm99_vm12 = vcmp.gt.f32.partialorder %v97_v38, 0.001  ;;  %v102_v43 = vsel %vm100_vm10, %v94_v25, 0.0  ;;  %v185_v45 = vand.u32 2147483647, %v183_v39  ;;  %v184_v46 = vsub.f32 %v178_v36, %v182_v40  ;;  %v491_v52 = vpop.eup %490  ;;  %vm637_vm8 = vmand %vm253_vm6, %vm255_vm7 }
  0x14   :  { %vm101_vm14 = vmand %vm537_vm5, %vm99_vm12  ;;  %v104_v47 = vmul.f32 %v102_v43, %v102_v43  ;;  %v127_v48 = vsel %vm106_vm0, %v102_v43, 0.0  ;;  %v264_v49 = vmul.f32 0.6931472, %v489_v41  ;;  %v493_v61 = vpop.eup %492  ;;  %v262_v2 = vmul.f32 0.6931472, %v491_v52 }
  0x15   :  { %v103_v50 = vsel %vm101_vm14, %v95_v32, 0.0  ;;  %vm187_vm1 = vcmp.gt.f32.partialorder %v185_v45, 0.001  ;;  %128 = vadd.xlane.f32.xlu1 %v127_v48  ;;  %v186_v51 = vand.u32 2147483647, %v184_v46  ;;  %v495_v9 = vpop.eup %494  ;;  %500 = vlog2.f32 %v466_v14 }
  0x16   :  { %v130_v53 = vsel %vm106_vm0, %v103_v50, 0.0  ;;  %v107_v54 = vsel %vm106_vm0, %v104_v47, 0.0  ;;  %vm189_vm2 = vmand %vm594_vm13, %vm187_vm1  ;;  %v267_v59 = vsub.f32 %v260_v42, %v264_v49  ;;  %v105_v62 = vmul.f32 %v103_v50, %v103_v50  ;;  %v497_v15 = vpop.eup %496 }
  0x17   :  { %131 = vadd.xlane.f32.xlu2 %v130_v53  ;;  %108 = vadd.xlane.f32.xlu0 %v107_v54  ;;  %v191_v56 = vsel %vm189_vm2, %v183_v39, 0.0  ;;  %vm615_vm4 = vcmp.gt.f32.partialorder %v186_v51, 0.001  ;;  %v266_v3 = vmul.f32 0.6931472, %v493_v61  ;;  %vm256_vm12 = vcmp.lt.f32.partialorder %v586_v34, 10.0 }
  0x18   :  { %v193_v63 = vmul.f32 %v191_v56, %v191_v56  ;;  %vm190_vm5 = vmand %vm611_vm3, %vm615_vm4  ;;  %v211_v0 = vsel %vm106_vm0, %v191_v56, 0.0  ;;  %v269_v1 = vand.u32 2147483647, %v267_v59  ;;  %v110_v6 = vsel %vm106_vm0, %v105_v62, 0.0  ;;  %v499_v24 = vpop.eup %498 }
  0x19   :  { %v192_v7 = vsel %vm190_vm5, %v184_v46, 0.0  ;;  %v268_v13 = vsub.f32 %v262_v2, %v266_v3  ;;  %v344_v19 = vmul.f32 0.6931472, %v495_v9  ;;  %v348_v20 = vmul.f32 0.6931472, %v497_v15  ;;  %vm660_vm14 = vmand %vm254_vm11, %vm256_vm12 }
  0x1a   :  { %v195_v4 = vsel %vm106_vm0, %v193_v63, 0.0  ;;  %vm641_vm9 = vcmp.gt.f32.partialorder %v269_v1, 0.001  ;;  %v194_v16 = vmul.f32 %v192_v7, %v192_v7  ;;  %v214_v21 = vsel %vm106_vm0, %v192_v7, 0.0 }
  0x1b   :  { %vm273_vm10 = vmand %vm637_vm8, %vm641_vm9  ;;  %v270_v18 = vand.u32 2147483647, %v268_v13  ;;  %v351_v26 = vsub.f32 %v344_v19, %v348_v20  ;;  %v501_v27 = vpop.eup %500  ;;  %v455_v29 = vsel %vm594_vm13, 1.0, %v502_v5  ;;  %v346_v32 = vmul.f32 0.6931472, %v499_v24 }
  0x1c   :  { %v198_v22 = vsel %vm106_vm0, %v194_v16, 0.0  ;;  %v275_v23 = vsel %vm273_vm10, %v267_v59, 0.0  ;;  %v350_v33 = vmul.f32 0.6931472, %v501_v27  ;;  %v231_v35 = vsel %vm106_vm0, %v455_v29, 0.0 }
  0x1d   :  { %212 = vadd.xlane.f32.xlu1 %v211_v0  ;;  %vm272_vm15 = vcmp.gt.f32.partialorder %v270_v18, 0.001  ;;  %v277_v28 = vmul.f32 %v275_v23, %v275_v23  ;;  %v295_v30 = vsel %vm106_vm0, %v275_v23, 0.0  ;;  %v353_v31 = vand.u32 2147483647, %v351_v26 }
  0x1e   :  { %vm274_vm1 = vmand %vm660_vm14, %vm272_vm15  ;;  %vm337_vm2 = vcmp.gt.f32.partialorder %v622_v60, 0.1  ;;  %vm339_vm3 = vcmp.lt.f32.partialorder %v622_v60, 10.0  ;;  %v462_v38 = vsel %vm660_vm14, 1.0, %v502_v5  ;;  %v352_v39 = vsub.f32 %v346_v32, %v350_v33 }
  0x1f   :  { %196 = vadd.xlane.f32.xlu2 %v195_v4  ;;  %111 = vadd.xlane.f32.xlu0 %v110_v6  ;;  %v279_v34 = vsel %vm106_vm0, %v277_v28, 0.0  ;;  %v276_v36 = vsel %vm274_vm1, %v268_v13, 0.0  ;;  %vm674_vm13 = vmand %vm337_vm2, %vm339_vm3  ;;  %vm355_vm4 = vcmp.gt.f32.partialorder %v353_v31, 0.001  ;;  %v318_v41 = vsel %vm106_vm0, %v462_v38, 0.0 }
  0x20   :  { %v278_v40 = vmul.f32 %v276_v36, %v276_v36  ;;  %vm357_vm5 = vmand %vm674_vm13, %vm355_vm4  ;;  %v354_v42 = vand.u32 2147483647, %v352_v39  ;;  %v298_v43 = vsel %vm106_vm0, %v276_v36, 0.0  ;;  %vm338_vm6 = vcmp.gt.f32.partialorder %v466_v14, 0.1 }
  0x21   :  { %vm340_vm7 = vcmp.lt.f32.partialorder %v466_v14, 10.0  ;;  %v359_v45 = vsel %vm357_vm5, %v351_v26, 0.0  ;;  %v461_v47 = vsel %vm637_vm8, 1.0, %v502_v5  ;;  %v467_v57 = vsel %vm674_vm13, 1.0, %v502_v5 }
  0x22   :  { %v282_v44 = vsel %vm106_vm0, %v278_v40, 0.0  ;;  %vm342_vm9 = vmand %vm338_vm6, %vm340_vm7  ;;  %vm356_vm10 = vcmp.gt.f32.partialorder %v354_v42, 0.001  ;;  %v361_v46 = vmul.f32 %v359_v45, %v359_v45  ;;  %v379_v48 = vsel %vm106_vm0, %v359_v45, 0.0 }
  0x23   :  { %vm358_vm11 = vmand %vm342_vm9, %vm356_vm10  ;;  %v315_v50 = vsel %vm106_vm0, %v461_v47, 0.0  ;;  %v468_v52 = vsel %vm342_vm9, 1.0, %v502_v5  ;;  %v399_v58 = vsel %vm106_vm0, %v467_v57, 0.0  ;;  %v115_v59 = vlaneseq }
  0x24   :  { %v363_v49 = vsel %vm106_vm0, %v361_v46, 0.0  ;;  %v360_v51 = vsel %vm358_vm11, %v352_v39, 0.0  ;;  %v402_v54 = vsel %vm106_vm0, %v468_v52, 0.0  ;;  %vm119_vm8 = vcmask 1041409  }
  0x25   :  { %235 = vadd.xlane.f32.xlu1 %v234_v17  ;;  %v362_v53 = vmul.f32 %v360_v51, %v360_v51  ;;  %v382_v55 = vsel %vm106_vm0, %v360_v51, 0.0  ;;  %v700_v60 = vand.u32 127, %v115_v59  ;;  %vm122_vm12 = vcmask 58368  }
  0x27   :  { %215 = vadd.xlane.f32.xlu2 %v214_v21  ;;  %199 = vadd.xlane.f32.xlu0 %v198_v22  ;;  %v366_v56 = vsel %vm106_vm0, %v362_v53, 0.0  ;;  %vm72_vm0 = vcmask 1024  }
  0x28   :  { %74 = vst.msk [vmem:[%s791_s3] sm:$0x3] %vm72_vm0, %v502_v5 }
  0x29   :  { %73 = vst.msk [vmem:[%s792_s2] sm:$0x3] %vm72_vm0, %v502_v5 }
  0x2a   :  { %75 = vst.msk [vmem:[%s793_s4] sm:$0x3] %vm72_vm0, %v502_v5 }
  0x2d   :  { %296 = vadd.xlane.f32.xlu1 %v295_v30 }
  0x2f   :  { %280 = vadd.xlane.f32.xlu2 %v279_v34  ;;  %232 = vadd.xlane.f32.xlu0 %v231_v35 }
  0x35   :  { %319 = vadd.xlane.f32.xlu1 %v318_v41 }
  0x37   :  { %299 = vadd.xlane.f32.xlu2 %v298_v43  ;;  %283 = vadd.xlane.f32.xlu0 %v282_v44 }
  0x3d   :  { %380 = vadd.xlane.f32.xlu1 %v379_v48 }
  0x3f   :  { %364 = vadd.xlane.f32.xlu2 %v363_v49  ;;  %316 = vadd.xlane.f32.xlu0 %v315_v50 }
  0x45   :  { %403 = vadd.xlane.f32.xlu1 %v402_v54 }
  0x47   :  { %383 = vadd.xlane.f32.xlu2 %v382_v55  ;;  %367 = vadd.xlane.f32.xlu0 %v366_v56 }
  0x4f   :  { %400 = vadd.xlane.f32.xlu0 %v399_v58 }
  0x79   :  { %v152_v61 = vpop.xlane.xlu1 %151 }
  0x7a   :  { %v156_v62 = vperm.slane %v152_v61, %v700_v60  ;;  %v149_v63 = vpop.xlane.xlu0 %148 }
  0x7b   :  { %v155_v0 = vperm.slane %v149_v63, %v700_v60 }
  0x7d   :  { %v157_v1 = vsel %vm119_vm8, %v156_v62, %v155_v0 }
  0x7e   :  { %v159_v2 = vsel %vm122_vm12, %v157_v1, 0.0 }
  0x7f   :  { %160 = vadd.xlane.f32.xlu2 %v159_v2 }
  0x88   :  { %v706_v3 = vpop.xlane.xlu1 %128 }
  0x89   :  { %v135_v51 = vperm.slane %v706_v3, %v700_v60 }
  0x8a   :  { %v132_v4 = vpop.xlane.xlu2 %131  ;;  %v109_v6 = vpop.xlane.xlu0 %108 }
  0x8b   :  { %v117_v40 = vperm.slane %v109_v6, %v700_v60  ;;  %v136_v50 = vperm.slane %v132_v4, %v700_v60 }
  0x8d   :  { %v137_v58 = vsel %vm119_vm8, %v136_v50, %v135_v51 }
  0x8e   :  { %v139_v63 = vsel %vm122_vm12, %v137_v58, 0.0 }
  0x90   :  { %v213_v7 = vpop.xlane.xlu1 %212 }
  0x91   :  { %v219_v12 = vperm.slane %v213_v7, %v700_v60 }
  0x92   :  { %v197_v8 = vpop.xlane.xlu2 %196  ;;  %v112_v9 = vpop.xlane.xlu0 %111 }
  0x93   :  { %v203_v11 = vperm.slane %v197_v8, %v700_v60  ;;  %v118_v39 = vperm.slane %v112_v9, %v700_v60 }
  0x95   :  { %v120_v45 = vsel %vm119_vm8, %v118_v39, %v117_v40 }
  0x96   :  { %v123_v48 = vsel %vm122_vm12, %v120_v45, 0.0 }
  0x98   :  { %v236_v10 = vpop.xlane.xlu1 %235 }
  0x99   :  { %v240_v21 = vperm.slane %v236_v10, %v700_v60 }
  0x9a   :  { %v216_v13 = vpop.xlane.xlu2 %215  ;;  %v200_v14 = vpop.xlane.xlu0 %199 }
  0x9b   :  { %v220_v15 = vperm.slane %v216_v13, %v700_v60  ;;  %v204_v16 = vperm.slane %v200_v14, %v700_v60 }
  0x9d   :  { %v221_v17 = vsel %vm119_vm8, %v220_v15, %v219_v12  ;;  %v205_v18 = vsel %vm119_vm8, %v204_v16, %v203_v11 }
  0x9e   :  { %v223_v19 = vsel %vm122_vm12, %v221_v17, 0.0  ;;  %v207_v20 = vsel %vm122_vm12, %v205_v18, 0.0 }
  0x9f   :  { %224 = vadd.xlane.f32.xlu1 %v223_v19  ;;  %208 = vadd.xlane.f32.xlu0 %v207_v20  ;;  %v415_v19 = vld [vmem:[%s792_s2] sm:$0x3] }
  0xa0   :  { %v297_v22 = vpop.xlane.xlu1 %296 }
  0xa1   :  { %v303_v29 = vperm.slane %v297_v22, %v700_v60 }
  0xa2   :  { %v281_v23 = vpop.xlane.xlu2 %280  ;;  %v233_v24 = vpop.xlane.xlu0 %232 }
  0xa3   :  { %v239_v25 = vperm.slane %v233_v24, %v700_v60  ;;  %v287_v28 = vperm.slane %v281_v23, %v700_v60  ;;  %v419_v23 = vld [vmem:[%s791_s3] sm:$0x3] }
  0xa5   :  { %v241_v26 = vsel %vm119_vm8, %v240_v21, %v239_v25 }
  0xa6   :  { %v243_v27 = vsel %vm122_vm12, %v241_v26, 0.0 }
  0xa7   :  { %244 = vadd.xlane.f32.xlu2 %v243_v27 }
  0xa8   :  { %v320_v30 = vpop.xlane.xlu1 %319 }
  0xa9   :  { %v324_v41 = vperm.slane %v320_v30, %v700_v60 }
  0xaa   :  { %v300_v31 = vpop.xlane.xlu2 %299  ;;  %v284_v32 = vpop.xlane.xlu0 %283 }
  0xab   :  { %v304_v33 = vperm.slane %v300_v31, %v700_v60  ;;  %v288_v34 = vperm.slane %v284_v32, %v700_v60 }
  0xad   :  { %v305_v35 = vsel %vm119_vm8, %v304_v33, %v303_v29  ;;  %v289_v36 = vsel %vm119_vm8, %v288_v34, %v287_v28  ;;  %v422_v29 = vld [vmem:[%s793_s4] sm:$0x3] }
  0xae   :  { %v307_v37 = vsel %vm122_vm12, %v305_v35, 0.0  ;;  %v291_v38 = vsel %vm122_vm12, %v289_v36, 0.0 }
  0xaf   :  { %308 = vadd.xlane.f32.xlu1 %v307_v37  ;;  %292 = vadd.xlane.f32.xlu0 %v291_v38 }
  0xb0   :  { %v381_v46 = vpop.xlane.xlu1 %380 }
  0xb1   :  { %v387_v53 = vperm.slane %v381_v46, %v700_v60 }
  0xb2   :  { %v365_v42 = vpop.xlane.xlu2 %364  ;;  %v317_v43 = vpop.xlane.xlu0 %316 }
  0xb3   :  { %v323_v44 = vperm.slane %v317_v43, %v700_v60  ;;  %v371_v52 = vperm.slane %v365_v42, %v700_v60 }
  0xb5   :  { %v325_v47 = vsel %vm119_vm8, %v324_v41, %v323_v44 }
  0xb6   :  { %v327_v49 = vsel %vm122_vm12, %v325_v47, 0.0 }
  0xb7   :  { %124 = vadd.xlane.f32.xlu1 %v123_v48  ;;  %328 = vadd.xlane.f32.xlu2 %v327_v49 }
  0xb8   :  { %v404_v1 = vpop.xlane.xlu1 %403 }
  0xb9   :  { %v408_v2 = vperm.slane %v404_v1, %v700_v60 }
  0xba   :  { %v384_v54 = vpop.xlane.xlu2 %383  ;;  %v368_v55 = vpop.xlane.xlu0 %367 }
  0xbb   :  { %v388_v56 = vperm.slane %v384_v54, %v700_v60  ;;  %v372_v57 = vperm.slane %v368_v55, %v700_v60 }
  0xbd   :  { %v389_v59 = vsel %vm119_vm8, %v388_v56, %v387_v53  ;;  %v373_v61 = vsel %vm119_vm8, %v372_v57, %v371_v52 }
  0xbe   :  { %v391_v62 = vsel %vm122_vm12, %v389_v59, 0.0  ;;  %v375_v0 = vsel %vm122_vm12, %v373_v61, 0.0 }
  0xbf   :  { %392 = vadd.xlane.f32.xlu1 %v391_v62  ;;  %140 = vadd.xlane.f32.xlu2 %v139_v63 }
  0xc0   :  { %376 = vadd.xlane.f32.xlu0 %v375_v0 }
  0xc2   :  { %v401_v3 = vpop.xlane.xlu0 %400 }
  0xc3   :  { %v407_v4 = vperm.slane %v401_v3, %v700_v60 }
  0xc5   :  { %v409_v6 = vsel %vm119_vm8, %v408_v2, %v407_v4 }
  0xc6   :  { %v411_v7 = vsel %vm122_vm12, %v409_v6, 0.0 }
  0xc7   :  { %412 = vadd.xlane.f32.xlu2 %v411_v7 }
  0xf2   :  { %v161_v60 = vpop.xlane.xlu2 %160 }
 0x112   :  { %v225_v8 = vpop.xlane.xlu1 %224  ;;  %v209_v11 = vpop.xlane.xlu0 %208 }
 0x11a   :  { %v245_v9 = vpop.xlane.xlu2 %244 }
 0x11b   :  { %v246_v25 = vadd.f32 %v245_v9, %v161_v60 }
 0x122   :  { %v309_v10 = vpop.xlane.xlu1 %308  ;;  %v293_v13 = vpop.xlane.xlu0 %292 }
 0x12a   :  { %v329_v12 = vpop.xlane.xlu2 %328  ;;  %v125_v14 = vpop.xlane.xlu1 %124 }
 0x12b   :  { %v210_v15 = vadd.f32 %v209_v11, %v125_v14  ;;  %v330_v27 = vadd.f32 %v329_v12, %v246_v25 }
 0x12d   :  { %v294_v17 = vadd.f32 %v293_v13, %v210_v15 }
 0x132   :  { %v141_v16 = vpop.xlane.xlu2 %140  ;;  %v393_v5 = vpop.xlane.xlu1 %392 }
 0x133   :  { %v226_v18 = vadd.f32 %v225_v8, %v141_v16  ;;  %v377_v20 = vpop.xlane.xlu0 %376 }
 0x134   :  { %v378_v21 = vadd.f32 %v377_v20, %v294_v17 }
 0x135   :  { %v310_v22 = vadd.f32 %v309_v10, %v226_v18 }
 0x136   :  { %v416_v24 = vadd.f32 %v415_v19, %v378_v21 }
 0x137   :  { %v394_v26 = vadd.f32 %v393_v5, %v310_v22 }
 0x138   :  { %418 = vst.msk [vmem:[%s792_s2] sm:$0x3] %vm72_vm0, %v416_v24 }
 0x139   :  { %v420_v28 = vadd.f32 %v419_v23, %v394_v26 }
 0x13a   :  { %v413_v30 = vpop.xlane.xlu2 %412 }
 0x13b   :  { %421 = vst.msk [vmem:[%s791_s3] sm:$0x3] %vm72_vm0, %v420_v28  ;;  %v414_v31 = vadd.f32 %v413_v30, %v330_v27 }
 0x13d   :  { %v423_v32 = vadd.f32 %v422_v29, %v414_v31 }
 0x13f   :  { %424 = vst.msk [vmem:[%s793_s4] sm:$0x3] %vm72_vm0, %v423_v32 }

// kernel: silog_loss.3
= control target key start
LH: loop header
LB: loop body
LE: loop exit
PB: predicated region body
PF: predicated region fallthrough
CT: control target
= control target key end

     0   :  { %vm106_vm0 = vcmask 27648   ;;  %v1678_v5 = vmov 0.0   ;;  %s2732_s1 = inlined_call_operand.vmem [shape: f32[2,16,4,4], index: 1, kind: input, shape index: {}]   ;;  %s2733_s0 = inlined_call_operand.vmem [shape: f32[2,16,4,4], index: 0, kind: input, shape index: {}]   ;;  %s2734_s3 = inlined_call_operand.vmem [shape: f32[1,2,1], index: 3, kind: output, shape index: {1}]   ;;  %s2735_s2 = inlined_call_operand.vmem [shape: f32[1,2,1], index: 2, kind: output, shape index: {0}]   ;;  %s2736_s4 = inlined_call_operand.vmem [shape: f32[1,2,1], index: 4, kind: output, shape index: {2}]  }
   0x1   :  { %v79_v0 = vld [vmem:[%s2732_s1 + $0x40] sm:$0xf]  ;;  %v1460_v8 = vld [vmem:[%s2733_s0 + $0x44] sm:$0xf]  ;;  %v1466_v22 = vld [vmem:[%s2733_s0 + $0x48] sm:$0xf] }
   0x2   :  { %v78_v1 = vld [vmem:[%s2732_s1] sm:$0xf]  ;;  %vm81_vm1 = vcmp.gt.f32.partialorder %v79_v0, 0.1  ;;  %vm83_vm2 = vcmp.lt.f32.partialorder %v79_v0, 10.0 }
   0x3   :  { %v76_v2 = vld [vmem:[%s2733_s0] sm:$0xf]  ;;  %vm80_vm3 = vcmp.gt.f32.partialorder %v78_v1, 0.1  ;;  %vm82_vm4 = vcmp.lt.f32.partialorder %v78_v1, 10.0  ;;  %vm1713_vm5 = vmand %vm81_vm1, %vm83_vm2 }
   0x4   :  { %1550 = vlog2.f32 %v76_v2  ;;  %v77_v4 = vld [vmem:[%s2733_s0 + $0x40] sm:$0xf]  ;;  %v1458_v6 = vsel %vm1713_vm5, 1.0, %v1678_v5  ;;  %vm1723_vm6 = vmand %vm80_vm3, %vm82_vm4  ;;  %v1462_v11 = vld [vmem:[%s2732_s1 + $0x44] sm:$0xf] }
   0x5   :  { %1552 = vlog2.f32 %v78_v1  ;;  %v150_v9 = vsel %vm106_vm0, %v1458_v6, 0.0  ;;  %v1457_v10 = vsel %vm1723_vm6, 1.0, %v1678_v5  ;;  %v1459_v13 = vld [vmem:[%s2733_s0 + $0x4] sm:$0xf]  ;;  %v1750_v26 = vld [vmem:[%s2732_s1 + $0x48] sm:$0xf] }
   0x6   :  { %1554 = vlog2.f32 %v77_v4  ;;  %151 = vadd.xlane.f32.xlu1 %v150_v9  ;;  %v147_v12 = vsel %vm106_vm0, %v1457_v10, 0.0  ;;  %v1461_v14 = vld [vmem:[%s2732_s1 + $0x4] sm:$0xf]  ;;  %vm170_vm7 = vcmp.gt.f32.partialorder %v1462_v11, 0.1  ;;  %vm172_vm8 = vcmp.lt.f32.partialorder %v1462_v11, 10.0 }
   0x7   :  { %1556 = vlog2.f32 %v79_v0  ;;  %148 = vadd.xlane.f32.xlu0 %v147_v12  ;;  %vm1755_vm12 = vmand %vm170_vm7, %vm172_vm8  ;;  %vm169_vm14 = vcmp.gt.f32.partialorder %v1461_v14, 0.1  ;;  %vm171_vm15 = vcmp.lt.f32.partialorder %v1461_v14, 10.0  ;;  %v1465_v50 = vld [vmem:[%s2733_s0 + $0x8] sm:$0xf]  ;;  %vm256_vm7 = vcmp.lt.f32.partialorder %v1750_v26, 10.0 }
   0x8   :  { %1558 = vlog2.f32 %v1460_v8  ;;  %vm1770_vm3 = vmand %vm169_vm14, %vm171_vm15  ;;  %v1467_v53 = vld [vmem:[%s2732_s1 + $0x8] sm:$0xf]  ;;  %v1472_v7 = vld [vmem:[%s2733_s0 + $0x4c] sm:$0xf]  ;;  %v1464_v10 = vsel %vm1755_vm12, 1.0, %v1678_v5 }
   0x9   :  { %1560 = vlog2.f32 %v1462_v11  ;;  %v1474_v9 = vld [vmem:[%s2732_s1 + $0x4c] sm:$0xf]  ;;  %v234_v12 = vsel %vm106_vm0, %v1464_v10, 0.0  ;;  %v1480_v39 = vld [vmem:[%s2732_s1 + $0x50] sm:$0xf] }
   0xa   :  { %v1551_v15 = vpop.eup %1550  ;;  %1562 = vlog2.f32 %v1459_v13 }
   0xb   :  { %v1553_v16 = vpop.eup %1552  ;;  %v87_v17 = vmul.f32 0.6931472, %v1551_v15  ;;  %1564 = vlog2.f32 %v1461_v14 }
   0xc   :  { %v1555_v18 = vpop.eup %1554  ;;  %v91_v19 = vmul.f32 0.6931472, %v1553_v16  ;;  %1566 = vlog2.f32 %v1466_v22  ;;  %v1463_v22 = vsel %vm1770_vm3, 1.0, %v1678_v5 }
   0xd   :  { %v1557_v20 = vpop.eup %1556  ;;  %v89_v21 = vmul.f32 0.6931472, %v1555_v18  ;;  %1568 = vlog2.f32 %v1750_v26 }
   0xe   :  { %v1559_v23 = vpop.eup %1558  ;;  %v94_v24 = vsub.f32 %v87_v17, %v91_v19  ;;  %v93_v25 = vmul.f32 0.6931472, %v1557_v20  ;;  %1570 = vlog2.f32 %v1465_v50  ;;  %v1471_v19 = vld [vmem:[%s2733_s0 + $0xc] sm:$0xf] }
   0xf   :  { %v1561_v27 = vpop.eup %1560  ;;  %v178_v28 = vmul.f32 0.6931472, %v1559_v23  ;;  %1572 = vlog2.f32 %v1467_v53 }
  0x10   :  { %v1563_v29 = vpop.eup %1562  ;;  %v96_v30 = vand.u32 2147483647, %v94_v24  ;;  %v95_v31 = vsub.f32 %v89_v21, %v93_v25  ;;  %v182_v32 = vmul.f32 0.6931472, %v1561_v27  ;;  %1574 = vlog2.f32 %v1472_v7  ;;  %v1473_v21 = vld [vmem:[%s2732_s1 + $0xc] sm:$0xf] }
  0x11   :  { %v1565_v33 = vpop.eup %1564  ;;  %v176_v34 = vmul.f32 0.6931472, %v1563_v29  ;;  %1576 = vlog2.f32 %v1474_v9 }
  0x12   :  { %vm98_vm9 = vcmp.gt.f32.partialorder %v96_v30, 0.001  ;;  %v97_v35 = vand.u32 2147483647, %v95_v31  ;;  %v184_v36 = vsub.f32 %v178_v28, %v182_v32  ;;  %v180_v37 = vmul.f32 0.6931472, %v1565_v33  ;;  %v1567_v44 = vpop.eup %1566 }
  0x13   :  { %vm100_vm10 = vmand %vm1723_vm6, %vm98_vm9  ;;  %v1569_v47 = vpop.eup %1568  ;;  %v262_v56 = vmul.f32 0.6931472, %v1567_v44  ;;  %vm254_vm6 = vcmp.gt.f32.partialorder %v1750_v26, 0.1  ;;  %1578 = vlog2.f32 %v1471_v19  ;;  %v231_v26 = vsel %vm106_vm0, %v1463_v22, 0.0 }
  0x14   :  { %v102_v38 = vsel %vm100_vm10, %v94_v24, 0.0  ;;  %vm99_vm11 = vcmp.gt.f32.partialorder %v97_v35, 0.001  ;;  %v186_v40 = vand.u32 2147483647, %v184_v36  ;;  %v183_v41 = vsub.f32 %v176_v34, %v180_v37  ;;  %v1571_v62 = vpop.eup %1570  ;;  %vm1788_vm8 = vmand %vm254_vm6, %vm256_vm7 }
  0x15   :  { %v127_v42 = vsel %vm106_vm0, %v102_v38, 0.0  ;;  %v104_v43 = vmul.f32 %v102_v38, %v102_v38  ;;  %vm101_vm13 = vmand %vm1713_vm5, %vm99_vm11  ;;  %v266_v57 = vmul.f32 0.6931472, %v1569_v47  ;;  %v1573_v63 = vpop.eup %1572  ;;  %v260_v3 = vmul.f32 0.6931472, %v1571_v62 }
  0x16   :  { %128 = vadd.xlane.f32.xlu1 %v127_v42  ;;  %v103_v45 = vsel %vm101_vm13, %v95_v31, 0.0  ;;  %vm188_vm1 = vcmp.gt.f32.partialorder %v186_v40, 0.001  ;;  %v185_v46 = vand.u32 2147483647, %v183_v41  ;;  %vm255_vm13 = vcmp.lt.f32.partialorder %v1467_v53, 10.0  ;;  %v1575_v16 = vpop.eup %1574 }
  0x17   :  { %v107_v48 = vsel %vm106_vm0, %v104_v43, 0.0  ;;  %v130_v49 = vsel %vm106_vm0, %v103_v45, 0.0  ;;  %vm190_vm2 = vmand %vm1755_vm12, %vm188_vm1  ;;  %v105_v54 = vmul.f32 %v103_v45, %v103_v45  ;;  %v268_v61 = vsub.f32 %v262_v56, %v266_v57  ;;  %v1577_v17 = vpop.eup %1576  ;;  %v1478_v37 = vld [vmem:[%s2733_s0 + $0x50] sm:$0xf] }
  0x18   :  { %108 = vadd.xlane.f32.xlu0 %v107_v48  ;;  %131 = vadd.xlane.f32.xlu2 %v130_v49  ;;  %v192_v51 = vsel %vm190_vm2, %v184_v36, 0.0  ;;  %vm187_vm4 = vcmp.gt.f32.partialorder %v185_v46, 0.001  ;;  %v264_v4 = vmul.f32 0.6931472, %v1573_v63  ;;  %1580 = vlog2.f32 %v1473_v21 }
  0x19   :  { %v194_v55 = vmul.f32 %v192_v51, %v192_v51  ;;  %vm189_vm5 = vmand %vm1770_vm3, %vm187_vm4  ;;  %v110_v59 = vsel %vm106_vm0, %v105_v54, 0.0  ;;  %v270_v1 = vand.u32 2147483647, %v268_v61  ;;  %v214_v2 = vsel %vm106_vm0, %v192_v51, 0.0  ;;  %v1579_v29 = vpop.eup %1578  ;;  %v1477_v49 = vld [vmem:[%s2733_s0 + $0x10] sm:$0xf] }
  0x1a   :  { %v191_v60 = vsel %vm189_vm5, %v183_v41, 0.0  ;;  %v267_v11 = vsub.f32 %v260_v3, %v264_v4  ;;  %vm253_vm11 = vcmp.gt.f32.partialorder %v1467_v53, 0.1  ;;  %v346_v23 = vmul.f32 0.6931472, %v1575_v16 }
  0x1b   :  { %v198_v58 = vsel %vm106_vm0, %v194_v55, 0.0  ;;  %v193_v0 = vmul.f32 %v191_v60, %v191_v60  ;;  %vm272_vm9 = vcmp.gt.f32.partialorder %v270_v1, 0.001  ;;  %v211_v15 = vsel %vm106_vm0, %v191_v60, 0.0  ;;  %vm1805_vm12 = vmand %vm253_vm11, %vm255_vm13  ;;  %v1479_v51 = vld [vmem:[%s2732_s1 + $0x10] sm:$0xf] }
  0x1c   :  { %vm274_vm10 = vmand %vm1788_vm8, %vm272_vm9  ;;  %v269_v14 = vand.u32 2147483647, %v267_v11  ;;  %v350_v24 = vmul.f32 0.6931472, %v1577_v17  ;;  %vm338_vm1 = vcmp.gt.f32.partialorder %v1474_v9, 0.1  ;;  %1582 = vlog2.f32 %v1478_v37 }
  0x1d   :  { %v195_v6 = vsel %vm106_vm0, %v193_v0, 0.0  ;;  %v276_v13 = vsel %vm274_vm10, %v268_v61, 0.0  ;;  %vm340_vm2 = vcmp.lt.f32.partialorder %v1474_v9, 10.0  ;;  %v344_v34 = vmul.f32 0.6931472, %v1579_v29 }
  0x1e   :  { %199 = vadd.xlane.f32.xlu1 %v198_v58  ;;  %v278_v18 = vmul.f32 %v276_v13, %v276_v13  ;;  %vm271_vm14 = vcmp.gt.f32.partialorder %v269_v14, 0.001  ;;  %v352_v28 = vsub.f32 %v346_v23, %v350_v24  ;;  %v1581_v30 = vpop.eup %1580  ;;  %v298_v33 = vsel %vm106_vm0, %v276_v13, 0.0  ;;  %vm1824_vm3 = vmand %vm338_vm1, %vm340_vm2  ;;  %v1484_v3 = vld [vmem:[%s2733_s0 + $0x54] sm:$0xf] }
  0x1f   :  { %vm273_vm15 = vmand %vm1805_vm12, %vm271_vm14  ;;  %v348_v35 = vmul.f32 0.6931472, %v1581_v30  ;;  %v1470_v40 = vsel %vm1788_vm8, 1.0, %v1678_v5  ;;  %1584 = vlog2.f32 %v1480_v39  ;;  %vm337_vm6 = vcmp.gt.f32.partialorder %v1473_v21, 0.1 }
  0x20   :  { %111 = vadd.xlane.f32.xlu0 %v110_v59  ;;  %v282_v25 = vsel %vm106_vm0, %v278_v18, 0.0  ;;  %v275_v27 = vsel %vm273_vm15, %v267_v11, 0.0  ;;  %v354_v32 = vand.u32 2147483647, %v352_v28  ;;  %v318_v42 = vsel %vm106_vm0, %v1470_v40, 0.0 }
  0x21   :  { %v277_v31 = vmul.f32 %v275_v27, %v275_v27  ;;  %v351_v41 = vsub.f32 %v344_v34, %v348_v35  ;;  %v295_v45 = vsel %vm106_vm0, %v275_v27, 0.0  ;;  %vm339_vm7 = vcmp.lt.f32.partialorder %v1473_v21, 10.0  ;;  %v1483_v16 = vld [vmem:[%s2733_s0 + $0x14] sm:$0xf]  ;;  %v1495_v34 = vld [vmem:[%s2733_s0 + $0x1c] sm:$0xf] }
  0x22   :  { %vm356_vm4 = vcmp.gt.f32.partialorder %v354_v32, 0.001  ;;  %v1583_v46 = vpop.eup %1582  ;;  %vm1841_vm8 = vmand %vm337_vm6, %vm339_vm7  ;;  %v1469_v52 = vsel %vm1805_vm12, 1.0, %v1678_v5  ;;  %1586 = vlog2.f32 %v1477_v49  ;;  %vm422_vm11 = vcmp.gt.f32.partialorder %v1480_v39, 0.1 }
  0x23   :  { %v279_v36 = vsel %vm106_vm0, %v277_v31, 0.0  ;;  %vm358_vm5 = vmand %vm1824_vm3, %vm356_vm4  ;;  %v353_v44 = vand.u32 2147483647, %v351_v41  ;;  %v430_v53 = vmul.f32 0.6931472, %v1583_v46  ;;  %1588 = vlog2.f32 %v1479_v51 }
  0x24   :  { %v360_v43 = vsel %vm358_vm5, %v352_v28, 0.0  ;;  %v315_v56 = vsel %vm106_vm0, %v1469_v52, 0.0  ;;  %vm424_vm13 = vcmp.lt.f32.partialorder %v1480_v39, 10.0  ;;  %v1476_v7 = vsel %vm1824_vm3, 1.0, %v1678_v5  ;;  %v1485_v18 = vld [vmem:[%s2732_s1 + $0x14] sm:$0xf] }
  0x25   :  { %v1585_v47 = vpop.eup %1584  ;;  %v362_v48 = vmul.f32 %v360_v43, %v360_v43  ;;  %vm355_vm9 = vcmp.gt.f32.partialorder %v353_v44, 0.001  ;;  %v382_v63 = vsel %vm106_vm0, %v360_v43, 0.0  ;;  %vm1860_vm12 = vmand %vm422_vm11, %vm424_vm13  ;;  %1590 = vlog2.f32 %v1484_v3 }
  0x26   :  { %215 = vadd.xlane.f32.xlu1 %v214_v2  ;;  %v434_v54 = vmul.f32 0.6931472, %v1585_v47  ;;  %vm357_vm10 = vmand %vm1841_vm8, %vm355_vm9  ;;  %v402_v9 = vsel %vm106_vm0, %v1476_v7, 0.0  ;;  %vm421_vm1 = vcmp.gt.f32.partialorder %v1479_v51, 0.1  ;;  %vm423_vm2 = vcmp.lt.f32.partialorder %v1479_v51, 10.0 }
  0x27   :  { %v366_v55 = vsel %vm106_vm0, %v362_v48, 0.0  ;;  %v359_v57 = vsel %vm357_vm10, %v351_v41, 0.0  ;;  %vm1877_vm3 = vmand %vm421_vm1, %vm423_vm2  ;;  %v1475_v19 = vsel %vm1841_vm8, 1.0, %v1678_v5  ;;  %v1482_v35 = vsel %vm1860_vm12, 1.0, %v1678_v5 }
  0x28   :  { %196 = vadd.xlane.f32.xlu0 %v195_v6  ;;  %v436_v58 = vsub.f32 %v430_v53, %v434_v54  ;;  %v1587_v59 = vpop.eup %1586  ;;  %v361_v61 = vmul.f32 %v359_v57, %v359_v57  ;;  %v1486_v6 = vld [vmem:[%s2732_s1 + $0x54] sm:$0xf]  ;;  %v399_v23 = vsel %vm106_vm0, %v1475_v19, 0.0  ;;  %v486_v37 = vsel %vm106_vm0, %v1482_v35, 0.0  ;;  %v1497_v35 = vld [vmem:[%s2732_s1 + $0x1c] sm:$0xf] }
  0x29   :  { %v1589_v60 = vpop.eup %1588  ;;  %v428_v0 = vmul.f32 0.6931472, %v1587_v59  ;;  %1592 = vlog2.f32 %v1486_v6  ;;  %vm506_vm6 = vcmp.gt.f32.partialorder %v1486_v6, 0.1  ;;  %vm508_vm7 = vcmp.lt.f32.partialorder %v1486_v6, 10.0 }
  0x2a   :  { %v438_v62 = vand.u32 2147483647, %v436_v58  ;;  %v432_v1 = vmul.f32 0.6931472, %v1589_v60  ;;  %v363_v2 = vsel %vm106_vm0, %v361_v61, 0.0  ;;  %1594 = vlog2.f32 %v1483_v16  ;;  %vm1893_vm8 = vmand %vm506_vm6, %vm508_vm7 }
  0x2b   :  { %v1591_v13 = vpop.eup %1590  ;;  %1596 = vlog2.f32 %v1485_v18  ;;  %v115_v38 = vlaneseq  ;;  %vm505_vm11 = vcmp.gt.f32.partialorder %v1485_v18, 0.1  ;;  %vm507_vm13 = vcmp.lt.f32.partialorder %v1485_v18, 10.0  ;;  %v1490_v59 = vld [vmem:[%s2733_s0 + $0x58] sm:$0xf] }
  0x2c   :  { %vm440_vm14 = vcmp.gt.f32.partialorder %v438_v62, 0.001  ;;  %v435_v8 = vsub.f32 %v428_v0, %v432_v1  ;;  %v514_v20 = vmul.f32 0.6931472, %v1591_v13  ;;  %vm122_vm2 = vcmask 25600  }
  0x2d   :  { %vm442_vm15 = vmand %vm1860_vm12, %vm440_vm14  ;;  %v1904_v43 = vand.u32 127, %v115_v38  ;;  %v1492_v61 = vld [vmem:[%s2732_s1 + $0x58] sm:$0xf]  ;;  %v1488_v62 = vsel %vm1893_vm8, 1.0, %v1678_v5  ;;  %v1496_v38 = vld [vmem:[%s2733_s0 + $0x5c] sm:$0xf] }
  0x2e   :  { %235 = vadd.xlane.f32.xlu1 %v234_v12  ;;  %v444_v10 = vsel %vm442_vm15, %v436_v58, 0.0  ;;  %v437_v11 = vand.u32 2147483647, %v435_v8  ;;  %v379_v12 = vsel %vm106_vm0, %v359_v57, 0.0  ;;  %vm1906_vm14 = vmand %vm505_vm11, %vm507_vm13  ;;  %vm119_vm15 = vcmask 1041409  }
  0x2f   :  { %v1593_v14 = vpop.eup %1592  ;;  %v466_v30 = vsel %vm106_vm0, %v444_v10, 0.0  ;;  %v1489_v57 = vld [vmem:[%s2733_s0 + $0x18] sm:$0xf]  ;;  %vm590_vm7 = vcmp.gt.f32.partialorder %v1492_v61, 0.1 }
  0x30   :  { %212 = vadd.xlane.f32.xlu0 %v211_v15  ;;  %v446_v15 = vmul.f32 %v444_v10, %v444_v10  ;;  %vm439_vm4 = vcmp.gt.f32.partialorder %v437_v11, 0.001  ;;  %v518_v21 = vmul.f32 0.6931472, %v1593_v14  ;;  %v1491_v58 = vld [vmem:[%s2732_s1 + $0x18] sm:$0xf]  ;;  %1598 = vlog2.f32 %v1489_v57 }
  0x31   :  { %vm441_vm5 = vmand %vm1877_vm3, %vm439_vm4  ;;  %1600 = vlog2.f32 %v1491_v58  ;;  %vm591_vm4 = vcmp.lt.f32.partialorder %v1491_v58, 10.0  ;;  %v1501_v19 = vld [vmem:[%s2733_s0 + $0x20] sm:$0xf] }
  0x32   :  { %v450_v22 = vsel %vm106_vm0, %v446_v15, 0.0  ;;  %v443_v24 = vsel %vm441_vm5, %v435_v8, 0.0  ;;  %1602 = vlog2.f32 %v1490_v59  ;;  %vm592_vm5 = vcmp.lt.f32.partialorder %v1492_v61, 10.0 }
  0x33   :  { %v445_v28 = vmul.f32 %v443_v24, %v443_v24  ;;  %v463_v41 = vsel %vm106_vm0, %v443_v24, 0.0  ;;  %1604 = vlog2.f32 %v1492_v61  ;;  %v1487_v15 = vsel %vm1906_vm14, 1.0, %v1678_v5 }
  0x34   :  { %1606 = vlog2.f32 %v1495_v34 }
  0x35   :  { %1608 = vlog2.f32 %v1497_v35 }
  0x36   :  { %283 = vadd.xlane.f32.xlu1 %v282_v25  ;;  %v520_v25 = vsub.f32 %v514_v20, %v518_v21  ;;  %1610 = vlog2.f32 %v1496_v38 }
  0x38   :  { %232 = vadd.xlane.f32.xlu0 %v231_v26  ;;  %v1595_v26 = vpop.eup %1594  ;;  %v522_v29 = vand.u32 2147483647, %v520_v25 }
  0x39   :  { %v1597_v27 = vpop.eup %1596  ;;  %v512_v31 = vmul.f32 0.6931472, %v1595_v26 }
  0x3a   :  { %v516_v32 = vmul.f32 0.6931472, %v1597_v27  ;;  %vm524_vm9 = vcmp.gt.f32.partialorder %v522_v29, 0.001  ;;  %v1599_v0 = vpop.eup %1598 }
  0x3b   :  { %vm526_vm10 = vmand %vm1893_vm8, %vm524_vm9  ;;  %v1601_v3 = vpop.eup %1600  ;;  %v596_v4 = vmul.f32 0.6931472, %v1599_v0 }
  0x3c   :  { %v528_v39 = vsel %vm526_vm10, %v520_v25, 0.0  ;;  %v1603_v6 = vpop.eup %1602  ;;  %v600_v8 = vmul.f32 0.6931472, %v1601_v3  ;;  %vm1949_vm9 = vmand %vm590_vm7, %vm592_vm5 }
  0x3d   :  { %v598_v10 = vmul.f32 0.6931472, %v1603_v6 }
  0x3e   :  { %299 = vadd.xlane.f32.xlu1 %v298_v33  ;;  %v447_v33 = vsel %vm106_vm0, %v445_v28, 0.0  ;;  %v603_v11 = vsub.f32 %v596_v4, %v600_v8 }
  0x40   :  { %280 = vadd.xlane.f32.xlu0 %v279_v36  ;;  %v519_v36 = vsub.f32 %v512_v31, %v516_v32  ;;  %v605_v14 = vand.u32 2147483647, %v603_v11 }
  0x42   :  { %v521_v40 = vand.u32 2147483647, %v519_v36  ;;  %vm607_vm8 = vcmp.gt.f32.partialorder %v605_v14, 0.001 }
  0x44   :  { %vm523_vm12 = vcmp.gt.f32.partialorder %v521_v40, 0.001 }
  0x45   :  { %vm525_vm1 = vmand %vm1906_vm14, %vm523_vm12  ;;  %vm673_vm14 = vcmp.gt.f32.partialorder %v1497_v35, 0.1  ;;  %vm675_vm12 = vcmp.lt.f32.partialorder %v1497_v35, 10.0 }
  0x46   :  { %319 = vadd.xlane.f32.xlu1 %v318_v42  ;;  %v530_v42 = vmul.f32 %v528_v39, %v528_v39  ;;  %v527_v53 = vsel %vm525_vm1, %v519_v36, 0.0 }
  0x47   :  { %v547_v7 = vsel %vm106_vm0, %v527_v53, 0.0 }
  0x48   :  { %296 = vadd.xlane.f32.xlu0 %v295_v45  ;;  %v1481_v45 = vsel %vm1877_vm3, 1.0, %v1678_v5  ;;  %v534_v47 = vsel %vm106_vm0, %v530_v42, 0.0  ;;  %vm589_vm3 = vcmp.gt.f32.partialorder %v1491_v58, 0.1 }
  0x49   :  { %v483_v51 = vsel %vm106_vm0, %v1481_v45, 0.0  ;;  %vm1945_vm6 = vmand %vm589_vm3, %vm591_vm4 }
  0x4a   :  { %vm609_vm10 = vmand %vm1945_vm6, %vm607_vm8  ;;  %v1493_v61 = vsel %vm1945_vm6, 1.0, %v1678_v5 }
  0x4b   :  { %v611_v25 = vsel %vm609_vm10, %v603_v11, 0.0  ;;  %vm1992_vm3 = vmand %vm673_vm14, %vm675_vm12 }
  0x4c   :  { %v613_v29 = vmul.f32 %v611_v25, %v611_v25 }
  0x4e   :  { %367 = vadd.xlane.f32.xlu1 %v366_v55  ;;  %v529_v55 = vmul.f32 %v527_v53, %v527_v53  ;;  %v615_v36 = vsel %vm106_vm0, %v613_v29, 0.0 }
  0x50   :  { %316 = vadd.xlane.f32.xlu0 %v315_v56  ;;  %v550_v56 = vsel %vm106_vm0, %v528_v39, 0.0  ;;  %v531_v60 = vsel %vm106_vm0, %v529_v55, 0.0  ;;  %v1498_v39 = vld [vmem:[%s2732_s1 + $0x5c] sm:$0xf] }
  0x51   :  { %1612 = vlog2.f32 %v1498_v39  ;;  %vm676_vm1 = vcmp.lt.f32.partialorder %v1498_v39, 10.0  ;;  %vm674_vm4 = vcmp.gt.f32.partialorder %v1498_v39, 0.1 }
  0x52   :  { %vm1999_vm7 = vmand %vm674_vm4, %vm676_vm1  ;;  %1614 = vlog2.f32 %v1501_v19 }
  0x56   :  { %383 = vadd.xlane.f32.xlu1 %v382_v63 }
  0x58   :  { %364 = vadd.xlane.f32.xlu0 %v363_v2  ;;  %v570_v2 = vsel %vm106_vm0, %v1488_v62, 0.0 }
  0x5e   :  { %403 = vadd.xlane.f32.xlu1 %v402_v9  ;;  %v1605_v9 = vpop.eup %1604 }
  0x5f   :  { %v1607_v44 = vpop.eup %1606 }
  0x60   :  { %380 = vadd.xlane.f32.xlu0 %v379_v12  ;;  %v602_v12 = vmul.f32 0.6931472, %v1605_v9 }
  0x62   :  { %v604_v17 = vsub.f32 %v598_v10, %v602_v12 }
  0x66   :  { %451 = vadd.xlane.f32.xlu1 %v450_v22  ;;  %v606_v22 = vand.u32 2147483647, %v604_v17 }
  0x68   :  { %400 = vadd.xlane.f32.xlu0 %v399_v23  ;;  %v567_v23 = vsel %vm106_vm0, %v1487_v15, 0.0  ;;  %vm608_vm11 = vcmp.gt.f32.partialorder %v606_v22, 0.001  ;;  %v1502_v22 = vld [vmem:[%s2733_s0 + $0x60] sm:$0xf] }
  0x69   :  { %vm610_vm13 = vmand %vm1949_vm9, %vm608_vm11 }
  0x6a   :  { %v612_v27 = vsel %vm610_vm13, %v604_v17, 0.0 }
  0x6e   :  { %467 = vadd.xlane.f32.xlu1 %v466_v30  ;;  %v614_v30 = vmul.f32 %v612_v27, %v612_v27 }
  0x70   :  { %448 = vadd.xlane.f32.xlu0 %v447_v33 }
  0x76   :  { %487 = vadd.xlane.f32.xlu1 %v486_v37  ;;  %v618_v37 = vsel %vm106_vm0, %v614_v30, 0.0 }
  0x78   :  { %464 = vadd.xlane.f32.xlu0 %v463_v41 }
  0x79   :  { %v152_v46 = vpop.xlane.xlu1 %151 }
  0x7a   :  { %v156_v48 = vperm.slane %v152_v46, %v1904_v43  ;;  %v149_v49 = vpop.xlane.xlu0 %148  ;;  %v1609_v46 = vpop.eup %1608 }
  0x7b   :  { %v155_v50 = vperm.slane %v149_v49, %v1904_v43  ;;  %v1611_v49 = vpop.eup %1610 }
  0x7c   :  { %v1613_v53 = vpop.eup %1612 }
  0x7d   :  { %v157_v52 = vsel %vm119_vm15, %v156_v48, %v155_v50  ;;  %v680_v48 = vmul.f32 0.6931472, %v1607_v44  ;;  %v631_v50 = vsel %vm106_vm0, %v611_v25, 0.0  ;;  %v686_v57 = vmul.f32 0.6931472, %v1613_v53 }
  0x7e   :  { %535 = vadd.xlane.f32.xlu1 %v534_v47  ;;  %v159_v54 = vsel %vm122_vm2, %v157_v52, 0.0  ;;  %v684_v52 = vmul.f32 0.6931472, %v1609_v46 }
  0x7f   :  { %160 = vadd.xlane.f32.xlu2 %v159_v54  ;;  %v682_v54 = vmul.f32 0.6931472, %v1611_v49 }
  0x80   :  { %484 = vadd.xlane.f32.xlu0 %v483_v51  ;;  %v634_v51 = vsel %vm106_vm0, %v612_v27, 0.0 }
  0x81   :  { %v688_v0 = vsub.f32 %v682_v54, %v686_v57 }
  0x83   :  { %v690_v6 = vand.u32 2147483647, %v688_v0 }
  0x85   :  { %vm692_vm8 = vcmp.gt.f32.partialorder %v690_v6, 0.001  ;;  %v1507_v6 = vld [vmem:[%s2733_s0 + $0x24] sm:$0xf] }
  0x86   :  { %551 = vadd.xlane.f32.xlu1 %v550_v56  ;;  %v687_v56 = vsub.f32 %v680_v48, %v684_v52 }
  0x88   :  { %532 = vadd.xlane.f32.xlu0 %v531_v60  ;;  %v689_v59 = vand.u32 2147483647, %v687_v56 }
  0x89   :  { %v1938_v63 = vpop.xlane.xlu1 %128 }
  0x8a   :  { %vm691_vm5 = vcmp.gt.f32.partialorder %v689_v59, 0.001 }
  0x8b   :  { %v109_v1 = vpop.xlane.xlu0 %108  ;;  %vm693_vm6 = vmand %vm1992_vm3, %vm691_vm5 }
  0x8c   :  { %v117_v20 = vperm.slane %v109_v1, %v1904_v43  ;;  %v695_v10 = vsel %vm693_vm6, %v687_v56, 0.0 }
  0x8d   :  { %v697_v14 = vmul.f32 %v695_v10, %v695_v10  ;;  %v715_v34 = vsel %vm106_vm0, %v695_v10, 0.0  ;;  %v1510_v10 = vld [vmem:[%s2732_s1 + $0x64] sm:$0xf] }
  0x8e   :  { %571 = vadd.xlane.f32.xlu1 %v570_v2  ;;  %v1494_v2 = vsel %vm1949_vm9, 1.0, %v1678_v5  ;;  %vm694_vm9 = vmand %vm1999_vm7, %vm692_vm8 }
  0x8f   :  { %v654_v9 = vsel %vm106_vm0, %v1494_v2, 0.0  ;;  %v696_v12 = vsel %vm694_vm9, %v688_v0, 0.0  ;;  %vm844_vm9 = vcmp.lt.f32.partialorder %v1510_v10, 10.0 }
  0x90   :  { %548 = vadd.xlane.f32.xlu0 %v547_v7  ;;  %v651_v7 = vsel %vm106_vm0, %v1493_v61, 0.0  ;;  %v698_v16 = vmul.f32 %v696_v12, %v696_v12 }
  0x91   :  { %v200_v13 = vpop.xlane.xlu1 %199 }
  0x92   :  { %v204_v31 = vperm.slane %v200_v13, %v1904_v43 }
  0x93   :  { %v112_v18 = vpop.xlane.xlu0 %111 }
  0x94   :  { %v118_v21 = vperm.slane %v112_v18, %v1904_v43 }
  0x96   :  { %v120_v24 = vsel %vm119_vm15, %v118_v21, %v117_v20  ;;  %v1503_v20 = vld [vmem:[%s2732_s1 + $0x20] sm:$0xf]  ;;  %v699_v21 = vsel %vm106_vm0, %v697_v14, 0.0 }
  0x97   :  { %v123_v26 = vsel %vm122_vm2, %v120_v24, 0.0  ;;  %v702_v24 = vsel %vm106_vm0, %v698_v16, 0.0  ;;  %1616 = vlog2.f32 %v1503_v20  ;;  %vm757_vm10 = vcmp.gt.f32.partialorder %v1503_v20, 0.1 }
  0x98   :  { %568 = vadd.xlane.f32.xlu0 %v567_v23  ;;  %124 = vadd.xlane.f32.xlu1 %v123_v26  ;;  %v1504_v23 = vld [vmem:[%s2732_s1 + $0x60] sm:$0xf]  ;;  %1618 = vlog2.f32 %v1502_v22  ;;  %vm759_vm11 = vcmp.lt.f32.partialorder %v1503_v20, 10.0 }
  0x99   :  { %v216_v28 = vpop.xlane.xlu1 %215  ;;  %1620 = vlog2.f32 %v1504_v23  ;;  %vm760_vm13 = vcmp.lt.f32.partialorder %v1504_v23, 10.0  ;;  %vm2042_vm14 = vmand %vm757_vm10, %vm759_vm11  ;;  %vm758_vm12 = vcmp.gt.f32.partialorder %v1504_v23, 0.1  ;;  %vm842_vm11 = vcmp.gt.f32.partialorder %v1510_v10, 0.1 }
  0x9a   :  { %v220_v42 = vperm.slane %v216_v28, %v1904_v43  ;;  %v1615_v28 = vpop.eup %1614  ;;  %vm2049_vm4 = vmand %vm758_vm12, %vm760_vm13  ;;  %1622 = vlog2.f32 %v1507_v6 }
  0x9b   :  { %v197_v32 = vpop.xlane.xlu0 %196  ;;  %vm2099_vm12 = vmand %vm842_vm11, %vm844_vm9 }
  0x9c   :  { %v203_v33 = vperm.slane %v197_v32, %v1904_v43  ;;  %v764_v32 = vmul.f32 0.6931472, %v1615_v28 }
  0x9d   :  { %v1617_v30 = vpop.eup %1616 }
  0x9e   :  { %v1979_v40 = vsel %vm119_vm15, %v204_v31, %v203_v33  ;;  %v1619_v33 = vpop.eup %1618  ;;  %v768_v35 = vmul.f32 0.6931472, %v1617_v30 }
  0x9f   :  { %v766_v38 = vmul.f32 0.6931472, %v1619_v33  ;;  %v1505_v33 = vsel %vm2042_vm14, 1.0, %v1678_v5 }
  0xa0   :  { %616 = vadd.xlane.f32.xlu0 %v615_v36  ;;  %619 = vadd.xlane.f32.xlu1 %v618_v37  ;;  %v1621_v36 = vpop.eup %1620  ;;  %v718_v37 = vsel %vm106_vm0, %v696_v12, 0.0 }
  0xa1   :  { %v236_v41 = vpop.xlane.xlu1 %235 }
  0xa2   :  { %v240_v60 = vperm.slane %v236_v41, %v1904_v43  ;;  %v771_v41 = vsub.f32 %v764_v32, %v768_v35 }
  0xa3   :  { %v213_v45 = vpop.xlane.xlu0 %212 }
  0xa4   :  { %v219_v47 = vperm.slane %v213_v45, %v1904_v43  ;;  %v773_v45 = vand.u32 2147483647, %v771_v41 }
  0xa6   :  { %v1986_v55 = vsel %vm119_vm15, %v220_v42, %v219_v47  ;;  %v770_v42 = vmul.f32 0.6931472, %v1621_v36  ;;  %v1499_v47 = vsel %vm1992_vm3, 1.0, %v1678_v5  ;;  %vm775_vm1 = vcmp.gt.f32.partialorder %v773_v45, 0.001 }
  0xa7   :  { %vm777_vm3 = vmand %vm2042_vm14, %vm775_vm1  ;;  %v735_v56 = vsel %vm106_vm0, %v1499_v47, 0.0 }
  0xa8   :  { %632 = vadd.xlane.f32.xlu0 %v631_v50  ;;  %635 = vadd.xlane.f32.xlu1 %v634_v51  ;;  %v772_v49 = vsub.f32 %v766_v38, %v770_v42  ;;  %v1500_v51 = vsel %vm1999_vm7, 1.0, %v1678_v5  ;;  %v779_v59 = vsel %vm777_vm3, %v771_v41, 0.0 }
  0xa9   :  { %v284_v58 = vpop.xlane.xlu1 %283  ;;  %v781_v0 = vmul.f32 %v779_v59, %v779_v59 }
  0xaa   :  { %v288_v15 = vperm.slane %v284_v58, %v1904_v43  ;;  %v774_v54 = vand.u32 2147483647, %v772_v49  ;;  %v738_v58 = vsel %vm106_vm0, %v1500_v51, 0.0 }
  0xab   :  { %v233_v1 = vpop.xlane.xlu0 %232 }
  0xac   :  { %v239_v4 = vperm.slane %v233_v1, %v1904_v43  ;;  %vm776_vm5 = vcmp.gt.f32.partialorder %v774_v54, 0.001 }
  0xad   :  { %vm778_vm7 = vmand %vm2049_vm4, %vm776_vm5 }
  0xae   :  { %v241_v8 = vsel %vm119_vm15, %v240_v60, %v239_v4  ;;  %v780_v61 = vsel %vm778_vm7, %v772_v49, 0.0 }
  0xaf   :  { %v243_v11 = vsel %vm122_vm2, %v241_v8, 0.0  ;;  %v782_v2 = vmul.f32 %v780_v61, %v780_v61  ;;  %v783_v8 = vsel %vm106_vm0, %v781_v0, 0.0 }
  0xb0   :  { %244 = vadd.xlane.f32.xlu2 %v243_v11  ;;  %652 = vadd.xlane.f32.xlu0 %v651_v7  ;;  %v1509_v7 = vld [vmem:[%s2732_s1 + $0x24] sm:$0xf] }
  0xb1   :  { %v300_v13 = vpop.xlane.xlu1 %299  ;;  %655 = vadd.xlane.f32.xlu1 %v654_v9  ;;  %v1508_v9 = vld [vmem:[%s2733_s0 + $0x64] sm:$0xf]  ;;  %v786_v11 = vsel %vm106_vm0, %v782_v2, 0.0  ;;  %1624 = vlog2.f32 %v1509_v7  ;;  %vm841_vm6 = vcmp.gt.f32.partialorder %v1509_v7, 0.1  ;;  %vm843_vm8 = vcmp.lt.f32.partialorder %v1509_v7, 10.0 }
  0xb2   :  { %v304_v27 = vperm.slane %v300_v13, %v1904_v43  ;;  %1626 = vlog2.f32 %v1508_v9  ;;  %vm2092_vm10 = vmand %vm841_vm6, %vm843_vm8 }
  0xb3   :  { %v281_v17 = vpop.xlane.xlu0 %280  ;;  %1628 = vlog2.f32 %v1510_v10 }
  0xb4   :  { %v287_v18 = vperm.slane %v281_v17, %v1904_v43 }
  0xb6   :  { %v2029_v25 = vsel %vm119_vm15, %v288_v15, %v287_v18  ;;  %v1623_v15 = vpop.eup %1622 }
  0xb7   :  { %v1625_v17 = vpop.eup %1624  ;;  %v848_v19 = vmul.f32 0.6931472, %v1623_v15 }
  0xb8   :  { %700 = vadd.xlane.f32.xlu0 %v699_v21  ;;  %v1627_v20 = vpop.eup %1626  ;;  %v799_v21 = vsel %vm106_vm0, %v779_v59, 0.0  ;;  %v852_v22 = vmul.f32 0.6931472, %v1625_v17 }
  0xb9   :  { %v320_v26 = vpop.xlane.xlu1 %319  ;;  %703 = vadd.xlane.f32.xlu1 %v702_v24  ;;  %v1629_v23 = vpop.eup %1628  ;;  %v802_v24 = vsel %vm106_vm0, %v780_v61, 0.0  ;;  %v1516_v61 = vld [vmem:[%s2732_s1 + $0x68] sm:$0xf] }
  0xba   :  { %v324_v46 = vperm.slane %v320_v26, %v1904_v43  ;;  %v850_v26 = vmul.f32 0.6931472, %v1627_v20  ;;  %v855_v28 = vsub.f32 %v848_v19, %v852_v22  ;;  %vm926_vm7 = vcmp.gt.f32.partialorder %v1516_v61, 0.1  ;;  %v132_v20 = vpop.xlane.xlu2 %131 }
  0xbb   :  { %v297_v29 = vpop.xlane.xlu0 %296  ;;  %vm928_vm6 = vcmp.lt.f32.partialorder %v1516_v61, 10.0 }
  0xbc   :  { %v303_v31 = vperm.slane %v297_v29, %v1904_v43  ;;  %v854_v29 = vmul.f32 0.6931472, %v1629_v23  ;;  %vm2149_vm11 = vmand %vm926_vm7, %vm928_vm6 }
  0xbe   :  { %v2036_v39 = vsel %vm119_vm15, %v304_v27, %v303_v31  ;;  %v857_v31 = vand.u32 2147483647, %v855_v28  ;;  %v856_v35 = vsub.f32 %v850_v26, %v854_v29  ;;  %v135_v29 = vperm.slane %v1938_v63, %v1904_v43  ;;  %v1527_v63 = vld [vmem:[%s2732_s1 + $0x30] sm:$0xf] }
  0xc0   :  { %716 = vadd.xlane.f32.xlu0 %v715_v34  ;;  %vm859_vm13 = vcmp.gt.f32.partialorder %v857_v31, 0.001  ;;  %v858_v42 = vand.u32 2147483647, %v856_v35 }
  0xc1   :  { %v368_v44 = vpop.xlane.xlu1 %367  ;;  %719 = vadd.xlane.f32.xlu1 %v718_v37  ;;  %v1506_v37 = vsel %vm2049_vm4, 1.0, %v1678_v5  ;;  %vm861_vm14 = vmand %vm2092_vm10, %vm859_vm13 }
  0xc2   :  { %v372_v1 = vperm.slane %v368_v44, %v1904_v43  ;;  %v819_v44 = vsel %vm106_vm0, %v1505_v33, 0.0  ;;  %v863_v47 = vsel %vm861_vm14, %v855_v28, 0.0  ;;  %vm860_vm1 = vcmp.gt.f32.partialorder %v858_v42, 0.001 }
  0xc3   :  { %v317_v50 = vpop.xlane.xlu0 %316  ;;  %vm862_vm4 = vmand %vm2099_vm12, %vm860_vm1  ;;  %v865_v51 = vmul.f32 %v863_v47, %v863_v47  ;;  %v883_v10 = vsel %vm106_vm0, %v863_v47, 0.0  ;;  %v1512_v28 = vsel %vm2099_vm12, 1.0, %v1678_v5  ;;  %v1519_v47 = vld [vmem:[%s2733_s0 + $0x2c] sm:$0xf] }
  0xc4   :  { %v323_v53 = vperm.slane %v317_v50, %v1904_v43  ;;  %v864_v49 = vsel %vm862_vm4, %v856_v35, 0.0  ;;  %v906_v34 = vsel %vm106_vm0, %v1512_v28, 0.0 }
  0xc5   :  { %v867_v59 = vsel %vm106_vm0, %v865_v51, 0.0  ;;  %v1522_v51 = vld [vmem:[%s2732_s1 + $0x6c] sm:$0xf] }
  0xc6   :  { %v325_v57 = vsel %vm119_vm15, %v324_v46, %v323_v53  ;;  %v822_v46 = vsel %vm106_vm0, %v1506_v37, 0.0  ;;  %v866_v53 = vmul.f32 %v864_v49, %v864_v49  ;;  %vm1010_vm4 = vcmp.gt.f32.partialorder %v1522_v51, 0.1 }
  0xc7   :  { %v327_v60 = vsel %vm122_vm2, %v325_v57, 0.0  ;;  %v1513_v57 = vld [vmem:[%s2733_s0 + $0x28] sm:$0xf] }
  0xc8   :  { %328 = vadd.xlane.f32.xlu2 %v327_v60  ;;  %736 = vadd.xlane.f32.xlu0 %v735_v56  ;;  %1630 = vlog2.f32 %v1513_v57  ;;  %v1514_v60 = vld [vmem:[%s2733_s0 + $0x68] sm:$0xf] }
  0xc9   :  { %v384_v62 = vpop.xlane.xlu1 %383  ;;  %739 = vadd.xlane.f32.xlu1 %v738_v58  ;;  %v1515_v58 = vld [vmem:[%s2732_s1 + $0x28] sm:$0xf] }
  0xca   :  { %v388_v14 = vperm.slane %v384_v62, %v1904_v43  ;;  %v870_v62 = vsel %vm106_vm0, %v866_v53, 0.0  ;;  %1632 = vlog2.f32 %v1515_v58  ;;  %vm925_vm3 = vcmp.gt.f32.partialorder %v1515_v58, 0.1 }
  0xcb   :  { %v365_v3 = vpop.xlane.xlu0 %364  ;;  %1634 = vlog2.f32 %v1514_v60  ;;  %vm927_vm5 = vcmp.lt.f32.partialorder %v1515_v58, 10.0 }
  0xcc   :  { %v371_v4 = vperm.slane %v365_v3, %v1904_v43  ;;  %1636 = vlog2.f32 %v1516_v61  ;;  %vm2138_vm8 = vmand %vm925_vm3, %vm927_vm5  ;;  %vm1012_vm3 = vcmp.lt.f32.partialorder %v1522_v51, 10.0 }
  0xcd   :  { %1638 = vlog2.f32 %v1519_v47  ;;  %vm2200_vm6 = vmand %vm1010_vm4, %vm1012_vm3 }
  0xce   :  { %v2079_v12 = vsel %vm119_vm15, %v372_v1, %v371_v4  ;;  %v1631_v3 = vpop.eup %1630 }
  0xd0   :  { %784 = vadd.xlane.f32.xlu0 %v783_v8  ;;  %v1633_v6 = vpop.eup %1632  ;;  %v932_v8 = vmul.f32 0.6931472, %v1631_v3 }
  0xd1   :  { %v404_v13 = vpop.xlane.xlu1 %403  ;;  %787 = vadd.xlane.f32.xlu1 %v786_v11  ;;  %v1635_v9 = vpop.eup %1634  ;;  %v936_v11 = vmul.f32 0.6931472, %v1633_v6 }
  0xd2   :  { %v408_v32 = vperm.slane %v404_v13, %v1904_v43  ;;  %v1637_v13 = vpop.eup %1636  ;;  %v934_v15 = vmul.f32 0.6931472, %v1635_v9 }
  0xd3   :  { %v381_v16 = vpop.xlane.xlu0 %380  ;;  %v939_v17 = vsub.f32 %v932_v8, %v936_v11  ;;  %v1517_v11 = vsel %vm2138_vm8, 1.0, %v1678_v5 }
  0xd4   :  { %v387_v18 = vperm.slane %v381_v16, %v1904_v43 }
  0xd6   :  { %v2086_v27 = vsel %vm119_vm15, %v388_v14, %v387_v18  ;;  %v886_v14 = vsel %vm106_vm0, %v864_v49, 0.0  ;;  %v938_v18 = vmul.f32 0.6931472, %v1637_v13  ;;  %v1520_v49 = vld [vmem:[%s2733_s0 + $0x6c] sm:$0xf] }
  0xd8   :  { %800 = vadd.xlane.f32.xlu0 %v799_v21  ;;  %v941_v21 = vand.u32 2147483647, %v939_v17  ;;  %v940_v22 = vsub.f32 %v934_v15, %v938_v18  ;;  %v1518_v15 = vsel %vm2149_vm11, 1.0, %v1678_v5 }
  0xd9   :  { %v452_v30 = vpop.xlane.xlu1 %451  ;;  %803 = vadd.xlane.f32.xlu1 %v802_v24  ;;  %v1511_v24 = vsel %vm2092_vm10, 1.0, %v1678_v5 }
  0xda   :  { %v456_v52 = vperm.slane %v452_v30, %v1904_v43  ;;  %vm943_vm9 = vcmp.gt.f32.partialorder %v941_v21, 0.001  ;;  %v942_v30 = vand.u32 2147483647, %v940_v22  ;;  %v987_v21 = vsel %vm106_vm0, %v1517_v11, 0.0 }
  0xdb   :  { %v401_v36 = vpop.xlane.xlu0 %400  ;;  %vm945_vm13 = vmand %vm2138_vm8, %vm943_vm9 }
  0xdc   :  { %v407_v41 = vperm.slane %v401_v36, %v1904_v43  ;;  %vm944_vm14 = vcmp.gt.f32.partialorder %v942_v30, 0.001  ;;  %v947_v35 = vsel %vm945_vm13, %v939_v17, 0.0  ;;  %v136_v30 = vperm.slane %v132_v20, %v1904_v43  ;;  %v1533_v17 = vld [vmem:[%s2732_s1 + $0x34] sm:$0xf] }
  0xdd   :  { %vm946_vm10 = vmand %vm2149_vm11, %vm944_vm14  ;;  %v967_v61 = vsel %vm106_vm0, %v947_v35, 0.0  ;;  %vm1093_vm13 = vcmp.gt.f32.partialorder %v1527_v63, 0.1  ;;  %vm1095_vm14 = vcmp.lt.f32.partialorder %v1527_v63, 10.0 }
  0xde   :  { %v409_v45 = vsel %vm119_vm15, %v408_v32, %v407_v41  ;;  %v903_v32 = vsel %vm106_vm0, %v1511_v24, 0.0  ;;  %v948_v37 = vsel %vm946_vm10, %v940_v22, 0.0  ;;  %v949_v41 = vmul.f32 %v947_v35, %v947_v35 }
  0xdf   :  { %v411_v48 = vsel %vm122_vm2, %v409_v45, 0.0  ;;  %v137_v35 = vsel %vm119_vm15, %v136_v30, %v135_v29 }
  0xe0   :  { %412 = vadd.xlane.f32.xlu2 %v411_v48  ;;  %820 = vadd.xlane.f32.xlu0 %v819_v44  ;;  %v950_v44 = vmul.f32 %v948_v37, %v948_v37  ;;  %v1521_v48 = vld [vmem:[%s2732_s1 + $0x2c] sm:$0xf] }
  0xe1   :  { %v468_v50 = vpop.xlane.xlu1 %467  ;;  %823 = vadd.xlane.f32.xlu1 %v822_v46  ;;  %1640 = vlog2.f32 %v1521_v48  ;;  %vm1009_vm12 = vcmp.gt.f32.partialorder %v1521_v48, 0.1  ;;  %vm1011_vm1 = vcmp.lt.f32.partialorder %v1521_v48, 10.0 }
  0xe2   :  { %v472_v2 = vperm.slane %v468_v50, %v1904_v43  ;;  %v951_v50 = vsel %vm106_vm0, %v949_v41, 0.0  ;;  %1642 = vlog2.f32 %v1520_v49  ;;  %vm2187_vm5 = vmand %vm1009_vm12, %vm1011_vm1 }
  0xe3   :  { %v449_v54 = vpop.xlane.xlu0 %448  ;;  %1644 = vlog2.f32 %v1522_v51  ;;  %vm2244_vm1 = vmand %vm1093_vm13, %vm1095_vm14 }
  0xe4   :  { %v455_v56 = vperm.slane %v449_v54, %v1904_v43 }
  0xe6   :  { %v2129_v0 = vsel %vm119_vm15, %v456_v52, %v455_v56  ;;  %v954_v52 = vsel %vm106_vm0, %v950_v44, 0.0  ;;  %v1639_v56 = vpop.eup %1638 }
  0xe7   :  { %v1641_v58 = vpop.eup %1640 }
  0xe8   :  { %868 = vadd.xlane.f32.xlu0 %v867_v59  ;;  %v1016_v59 = vmul.f32 0.6931472, %v1639_v56  ;;  %v1643_v60 = vpop.eup %1642 }
  0xe9   :  { %v488_v1 = vpop.xlane.xlu1 %487  ;;  %871 = vadd.xlane.f32.xlu1 %v870_v62  ;;  %v1020_v62 = vmul.f32 0.6931472, %v1641_v58  ;;  %v1018_v3 = vmul.f32 0.6931472, %v1643_v60 }
  0xea   :  { %v492_v23 = vperm.slane %v488_v1, %v1904_v43  ;;  %v1645_v1 = vpop.eup %1644 }
  0xeb   :  { %v465_v4 = vpop.xlane.xlu0 %464  ;;  %v1022_v6 = vmul.f32 0.6931472, %v1645_v1 }
  0xec   :  { %v471_v7 = vperm.slane %v465_v4, %v1904_v43  ;;  %v1023_v4 = vsub.f32 %v1016_v59, %v1020_v62 }
  0xed   :  { %v1024_v9 = vsub.f32 %v1018_v3, %v1022_v6  ;;  %v1523_v6 = vsel %vm2187_vm5, 1.0, %v1678_v5 }
  0xee   :  { %v2136_v16 = vsel %vm119_vm15, %v472_v2, %v471_v7  ;;  %v970_v2 = vsel %vm106_vm0, %v948_v37, 0.0  ;;  %v1025_v8 = vand.u32 2147483647, %v1023_v4  ;;  %v1526_v37 = vld [vmem:[%s2733_s0 + $0x70] sm:$0xf] }
  0xef   :  { %v1026_v18 = vand.u32 2147483647, %v1024_v9  ;;  %v1531_v7 = vld [vmem:[%s2733_s0 + $0x34] sm:$0xf] }
  0xf0   :  { %884 = vadd.xlane.f32.xlu0 %v883_v10  ;;  %vm1027_vm7 = vcmp.gt.f32.partialorder %v1025_v8, 0.001 }
  0xf1   :  { %v536_v19 = vpop.xlane.xlu1 %535  ;;  %887 = vadd.xlane.f32.xlu1 %v886_v14  ;;  %vm1029_vm9 = vmand %vm2187_vm5, %vm1027_vm7  ;;  %vm1028_vm8 = vcmp.gt.f32.partialorder %v1026_v18, 0.001  ;;  %v1071_v18 = vsel %vm106_vm0, %v1523_v6, 0.0 }
  0xf2   :  { %v540_v42 = vperm.slane %v536_v19, %v1904_v43  ;;  %v1031_v24 = vsel %vm1029_vm9, %v1023_v4, 0.0  ;;  %vm1030_vm11 = vmand %vm2200_vm6, %vm1028_vm8  ;;  %vm1177_vm9 = vcmp.gt.f32.partialorder %v1533_v17, 0.1  ;;  %vm1179_vm8 = vcmp.lt.f32.partialorder %v1533_v17, 10.0 }
  0xf3   :  { %v485_v26 = vpop.xlane.xlu0 %484  ;;  %v1032_v28 = vsel %vm1030_vm11, %v1024_v9, 0.0  ;;  %v1524_v9 = vsel %vm2200_vm6, 1.0, %v1678_v5  ;;  %vm2292_vm11 = vmand %vm1177_vm9, %vm1179_vm8 }
  0xf4   :  { %v491_v31 = vperm.slane %v485_v26, %v1904_v43  ;;  %v1054_v59 = vsel %vm106_vm0, %v1032_v28, 0.0 }
  0xf6   :  { %v493_v33 = vsel %vm119_vm15, %v492_v23, %v491_v31  ;;  %v990_v23 = vsel %vm106_vm0, %v1518_v15, 0.0  ;;  %v1033_v31 = vmul.f32 %v1031_v24, %v1031_v24 }
  0xf7   :  { %v495_v36 = vsel %vm122_vm2, %v493_v33, 0.0 }
  0xf8   :  { %496 = vadd.xlane.f32.xlu2 %v495_v36  ;;  %904 = vadd.xlane.f32.xlu0 %v903_v32  ;;  %v1034_v32 = vmul.f32 %v1032_v28, %v1032_v28  ;;  %v1525_v36 = vld [vmem:[%s2733_s0 + $0x30] sm:$0xf]  ;;  %v1035_v41 = vsel %vm106_vm0, %v1033_v31, 0.0 }
  0xf9   :  { %v2162_v38 = vpop.xlane.xlu1 %551  ;;  %907 = vadd.xlane.f32.xlu1 %v906_v34  ;;  %1646 = vlog2.f32 %v1525_v36 }
  0xfa   :  { %v1038_v44 = vsel %vm106_vm0, %v1034_v32, 0.0  ;;  %1648 = vlog2.f32 %v1527_v63  ;;  %v1534_v63 = vld [vmem:[%s2732_s1 + $0x74] sm:$0xf] }
  0xfb   :  { %v533_v45 = vpop.xlane.xlu0 %532  ;;  %1650 = vlog2.f32 %v1526_v37  ;;  %v391_v37 = vsel %vm122_vm2, %v2086_v27, 0.0  ;;  %v1537_v27 = vld [vmem:[%s2733_s0 + $0x38] sm:$0xf] }
  0xfc   :  { %v539_v46 = vperm.slane %v533_v45, %v1904_v43  ;;  %v139_v45 = vsel %vm122_vm2, %v137_v35, 0.0 }
  0xfe   :  { %v2181_v53 = vsel %vm119_vm15, %v540_v42, %v539_v46  ;;  %v1528_v42 = vld [vmem:[%s2732_s1 + $0x70] sm:$0xf]  ;;  %v161_v46 = vpop.xlane.xlu2 %160 }
  0xff   :  { %1652 = vlog2.f32 %v1528_v42  ;;  %v1647_v47 = vpop.eup %1646  ;;  %vm1094_vm10 = vcmp.gt.f32.partialorder %v1528_v42, 0.1  ;;  %vm1096_vm12 = vcmp.lt.f32.partialorder %v1528_v42, 10.0 }
 0x100   :  { %952 = vadd.xlane.f32.xlu0 %v951_v50  ;;  %v1649_v50 = vpop.eup %1648  ;;  %vm2256_vm3 = vmand %vm1094_vm10, %vm1096_vm12  ;;  %1654 = vlog2.f32 %v1531_v7  ;;  %vm1178_vm10 = vcmp.gt.f32.partialorder %v1534_v63, 0.1  ;;  %vm1180_vm12 = vcmp.lt.f32.partialorder %v1534_v63, 10.0 }
 0x101   :  { %v572_v54 = vpop.xlane.xlu1 %571  ;;  %955 = vadd.xlane.f32.xlu1 %v954_v52  ;;  %v1651_v51 = vpop.eup %1650  ;;  %v1051_v52 = vsel %vm106_vm0, %v1031_v24, 0.0  ;;  %v1104_v56 = vmul.f32 0.6931472, %v1649_v50  ;;  %1656 = vlog2.f32 %v1533_v17 }
 0x102   :  { %v576_v10 = vperm.slane %v572_v54, %v1904_v43  ;;  %v1100_v54 = vmul.f32 0.6931472, %v1647_v47  ;;  %v1102_v60 = vmul.f32 0.6931472, %v1651_v51  ;;  %v1539_v47 = vld [vmem:[%s2732_s1 + $0x38] sm:$0xf] }
 0x103   :  { %v2183_v57 = vpop.xlane.xlu0 %548 }
 0x104   :  { %v1107_v62 = vsub.f32 %v1100_v54, %v1104_v56 }
 0x105   :  { %v1653_v58 = vpop.eup %1652 }
 0x106   :  { %v1106_v1 = vmul.f32 0.6931472, %v1653_v58  ;;  %v1109_v3 = vand.u32 2147483647, %v1107_v62  ;;  %v475_v58 = vsel %vm122_vm2, %v2136_v16, 0.0 }
 0x108   :  { %968 = vadd.xlane.f32.xlu0 %v967_v61  ;;  %v223_v61 = vsel %vm122_vm2, %v1986_v55, 0.0  ;;  %v1108_v4 = vsub.f32 %v1102_v60, %v1106_v1  ;;  %vm1111_vm4 = vcmp.gt.f32.partialorder %v1109_v3, 0.001  ;;  %v1530_v3 = vsel %vm2256_vm3, 1.0, %v1678_v5 }
 0x109   :  { %971 = vadd.xlane.f32.xlu1 %v970_v2  ;;  %vm1113_vm5 = vmand %vm2244_vm1, %vm1111_vm4 }
 0x10a   :  { %v1110_v11 = vand.u32 2147483647, %v1108_v4  ;;  %v1115_v20 = vsel %vm1113_vm5, %v1107_v62, 0.0  ;;  %v555_v62 = vperm.slane %v2183_v57, %v1904_v43  ;;  %vm2328_vm4 = vmand %vm1178_vm10, %vm1180_vm12 }
 0x10b   :  { %v2195_v13 = vpop.xlane.xlu1 %124  ;;  %v569_v14 = vpop.xlane.xlu0 %568  ;;  %v1135_v51 = vsel %vm106_vm0, %v1115_v20, 0.0 }
 0x10c   :  { %v575_v19 = vperm.slane %v569_v14, %v1904_v43  ;;  %vm1112_vm7 = vcmp.gt.f32.partialorder %v1110_v11, 0.001 }
 0x10d   :  { %vm1114_vm6 = vmand %vm2256_vm3, %vm1112_vm7  ;;  %vm1261_vm7 = vcmp.gt.f32.partialorder %v1539_v47, 0.1 }
 0x10e   :  { %v577_v22 = vsel %vm119_vm15, %v576_v10, %v575_v19  ;;  %v1074_v19 = vsel %vm106_vm0, %v1524_v9, 0.0  ;;  %v1158_v10 = vsel %vm106_vm0, %v1530_v3, 0.0 }
 0x10f   :  { %v579_v26 = vsel %vm122_vm2, %v577_v22, 0.0  ;;  %v1116_v22 = vsel %vm1114_vm6, %v1108_v4, 0.0  ;;  %vm1263_vm6 = vcmp.lt.f32.partialorder %v1539_v47, 10.0 }
 0x110   :  { %580 = vadd.xlane.f32.xlu2 %v579_v26  ;;  %988 = vadd.xlane.f32.xlu0 %v987_v21  ;;  %v307_v21 = vsel %vm122_vm2, %v2036_v39, 0.0  ;;  %v1118_v24 = vmul.f32 %v1116_v22, %v1116_v22  ;;  %v1655_v26 = vpop.eup %1654  ;;  %v1532_v39 = vld [vmem:[%s2733_s0 + $0x74] sm:$0xf]  ;;  %v1138_v54 = vsel %vm106_vm0, %v1116_v22, 0.0  ;;  %v1540_v22 = vld [vmem:[%s2732_s1 + $0x78] sm:$0xf]  ;;  %vm2348_vm9 = vmand %vm1261_vm7, %vm1263_vm6 }
 0x111   :  { %991 = vadd.xlane.f32.xlu1 %v990_v23  ;;  %v1117_v23 = vmul.f32 %v1115_v20, %v1115_v20  ;;  %v1657_v29 = vpop.eup %1656  ;;  %v1184_v31 = vmul.f32 0.6931472, %v1655_v26  ;;  %1658 = vlog2.f32 %v1532_v39  ;;  %v1545_v39 = vld [vmem:[%s2732_s1 + $0x3c] sm:$0xf]  ;;  %vm1264_vm10 = vcmp.lt.f32.partialorder %v1540_v22, 10.0 }
 0x112   :  { %v1188_v35 = vmul.f32 0.6931472, %v1657_v29  ;;  %v1122_v36 = vsel %vm106_vm0, %v1118_v24, 0.0  ;;  %1660 = vlog2.f32 %v1534_v63  ;;  %vm1347_vm7 = vcmp.lt.f32.partialorder %v1545_v39, 10.0 }
 0x113   :  { %v2216_v33 = vpop.xlane.xlu1 %619  ;;  %v2218_v34 = vpop.xlane.xlu0 %616  ;;  %v1119_v32 = vsel %vm106_vm0, %v1117_v23, 0.0  ;;  %1662 = vlog2.f32 %v1537_v27 }
 0x114   :  { %1664 = vlog2.f32 %v1539_v47  ;;  %v207_v47 = vsel %vm122_vm2, %v1979_v40, 0.0 }
 0x117   :  { %v1659_v50 = vpop.eup %1658 }
 0x118   :  { %140 = vadd.xlane.f32.xlu2 %v139_v45  ;;  %1036 = vadd.xlane.f32.xlu0 %v1035_v41  ;;  %v1191_v41 = vsub.f32 %v1184_v31, %v1188_v35  ;;  %v1186_v56 = vmul.f32 0.6931472, %v1659_v50 }
 0x119   :  { %1039 = vadd.xlane.f32.xlu1 %v1038_v44 }
 0x11a   :  { %v1193_v42 = vand.u32 2147483647, %v1191_v41 }
 0x11b   :  { %v2236_v48 = vpop.xlane.xlu1 %635  ;;  %v2238_v49 = vpop.xlane.xlu0 %632 }
 0x11c   :  { %vm1195_vm13 = vcmp.gt.f32.partialorder %v1193_v42, 0.001  ;;  %v639_v3 = vperm.slane %v2238_v49, %v1904_v43  ;;  %v291_v49 = vsel %vm122_vm2, %v2029_v25, 0.0 }
 0x11d   :  { %vm1197_vm14 = vmand %vm2292_vm11, %vm1195_vm13 }
 0x120   :  { %224 = vadd.xlane.f32.xlu2 %v223_v61  ;;  %1052 = vadd.xlane.f32.xlu0 %v1051_v52  ;;  %v1661_v52 = vpop.eup %1660  ;;  %v556_v61 = vperm.slane %v2162_v38, %v1904_v43 }
 0x121   :  { %1055 = vadd.xlane.f32.xlu1 %v1054_v59  ;;  %v1199_v59 = vsel %vm1197_vm14, %v1191_v41, 0.0  ;;  %v1190_v60 = vmul.f32 0.6931472, %v1661_v52  ;;  %v1663_v16 = vpop.eup %1662  ;;  %v623_v52 = vperm.slane %v2218_v34, %v1904_v43  ;;  %vm1262_vm14 = vcmp.gt.f32.partialorder %v1540_v22, 0.1 }
 0x122   :  { %v1201_v4 = vmul.f32 %v1199_v59, %v1199_v59  ;;  %v1665_v38 = vpop.eup %1664  ;;  %v557_v57 = vsel %vm119_vm15, %v556_v61, %v555_v62  ;;  %v1268_v17 = vmul.f32 0.6931472, %v1663_v16  ;;  %vm2390_vm12 = vmand %vm1262_vm14, %vm1264_vm10 }
 0x123   :  { %v245_v55 = vpop.xlane.xlu2 %244  ;;  %v2251_v8 = vpop.xlane.xlu0 %652  ;;  %v1192_v1 = vsub.f32 %v1186_v56, %v1190_v60  ;;  %v1272_v20 = vmul.f32 0.6931472, %v1665_v38  ;;  %v559_v23 = vsel %vm122_vm2, %v557_v57, 0.0  ;;  %v1536_v56 = vsel %vm2328_vm4, 1.0, %v1678_v5  ;;  %v1544_v57 = vld [vmem:[%s2733_s0 + $0x7c] sm:$0xf] }
 0x124   :  { %v2260_v14 = vadd.f32 %v245_v55, %v161_v46  ;;  %v2262_v15 = vpop.xlane.xlu1 %655 }
 0x125   :  { %v1194_v9 = vand.u32 2147483647, %v1192_v1  ;;  %v1275_v24 = vsub.f32 %v1268_v17, %v1272_v20 }
 0x127   :  { %vm2332_vm3 = vcmp.gt.f32.partialorder %v1194_v9, 0.001  ;;  %v1277_v29 = vand.u32 2147483647, %v1275_v24 }
 0x128   :  { %308 = vadd.xlane.f32.xlu2 %v307_v21  ;;  %1072 = vadd.xlane.f32.xlu0 %v1071_v18  ;;  %v1203_v21 = vsel %vm106_vm0, %v1201_v4, 0.0  ;;  %vm1198_vm5 = vmand %vm2328_vm4, %vm2332_vm3  ;;  %v1242_v4 = vsel %vm106_vm0, %v1536_v56, 0.0 }
 0x129   :  { %1075 = vadd.xlane.f32.xlu1 %v1074_v19  ;;  %vm1279_vm8 = vcmp.gt.f32.partialorder %v1277_v29, 0.001  ;;  %v660_v29 = vperm.slane %v2262_v15, %v1904_v43 }
 0x12a   :  { %vm1281_vm13 = vmand %vm2348_vm9, %vm1279_vm8 }
 0x12b   :  { %v2278_v28 = vpop.xlane.xlu0 %700  ;;  %v1283_v50 = vsel %vm1281_vm13, %v1275_v24, 0.0 }
 0x12c   :  { %v2280_v30 = vpop.xlane.xlu1 %703 }
 0x130   :  { %392 = vadd.xlane.f32.xlu2 %v391_v37  ;;  %1120 = vadd.xlane.f32.xlu0 %v1119_v32  ;;  %v2354_v32 = vsel %vm1198_vm5, %v1192_v1, 0.0  ;;  %v1219_v37 = vsel %vm106_vm0, %v1199_v59, 0.0  ;;  %vm1345_vm5 = vcmp.gt.f32.partialorder %v1545_v39, 0.1 }
 0x131   :  { %1123 = vadd.xlane.f32.xlu1 %v1122_v36  ;;  %v1543_v36 = vld [vmem:[%s2733_s0 + $0x3c] sm:$0xf]  ;;  %v1222_v41 = vsel %vm106_vm0, %v2354_v32, 0.0  ;;  %vm2411_vm6 = vmand %vm1345_vm5, %vm1347_vm7 }
 0x133   :  { %v2296_v45 = vpop.xlane.xlu0 %716 }
 0x134   :  { %v2298_v46 = vpop.xlane.xlu1 %719  ;;  %v723_v16 = vperm.slane %v2296_v45, %v1904_v43 }
 0x138   :  { %476 = vadd.xlane.f32.xlu2 %v475_v58  ;;  %1136 = vadd.xlane.f32.xlu0 %v1135_v51  ;;  %v624_v51 = vperm.slane %v2216_v33, %v1904_v43  ;;  %v1285_v58 = vmul.f32 %v1283_v50, %v1283_v50  ;;  %v640_v33 = vperm.slane %v2236_v48, %v1904_v43 }
 0x139   :  { %1139 = vadd.xlane.f32.xlu1 %v1138_v54 }
 0x13a   :  { %v2385_v1 = vsel %vm119_vm15, %v624_v51, %v623_v52  ;;  %v1287_v38 = vsel %vm106_vm0, %v1285_v58, 0.0  ;;  %v2416_v19 = vsel %vm119_vm15, %v640_v33, %v639_v3 }
 0x13b   :  { %v329_v6 = vpop.xlane.xlu2 %328  ;;  %v2319_v55 = vpop.xlane.xlu0 %736 }
 0x13c   :  { %v2322_v11 = vadd.f32 %v329_v6, %v2260_v14  ;;  %v2325_v7 = vpop.xlane.xlu1 %739  ;;  %v1538_v14 = vld [vmem:[%s2733_s0 + $0x78] sm:$0xf]  ;;  %v743_v45 = vperm.slane %v2319_v55, %v1904_v43 }
 0x13d   :  { %1666 = vlog2.f32 %v1538_v14 }
 0x13e   :  { %1668 = vlog2.f32 %v1540_v22 }
 0x13f   :  { %1670 = vlog2.f32 %v1543_v36  ;;  %v659_v36 = vperm.slane %v2251_v8, %v1904_v43  ;;  %v1542_v8 = vsel %vm2390_vm12, 1.0, %v1678_v5 }
 0x140   :  { %560 = vadd.xlane.f32.xlu2 %v559_v23  ;;  %1159 = vadd.xlane.f32.xlu0 %v1158_v10  ;;  %1672 = vlog2.f32 %v1545_v39  ;;  %v1546_v10 = vld [vmem:[%s2732_s1 + $0x7c] sm:$0xf]  ;;  %v1303_v39 = vsel %vm106_vm0, %v1283_v50, 0.0  ;;  %v1326_v52 = vsel %vm106_vm0, %v1542_v8, 0.0 }
 0x141   :  { %1204 = vadd.xlane.f32.xlu1 %v1203_v21  ;;  %1674 = vlog2.f32 %v1544_v57  ;;  %v661_v15 = vsel %vm119_vm15, %v660_v29, %v659_v36  ;;  %vm1346_vm14 = vcmp.gt.f32.partialorder %v1546_v10, 0.1  ;;  %vm1348_vm10 = vcmp.lt.f32.partialorder %v1546_v10, 10.0 }
 0x142   :  { %1676 = vlog2.f32 %v1546_v10  ;;  %v663_v29 = vsel %vm122_vm2, %v661_v15, 0.0 }
 0x143   :  { %v2352_v31 = vpop.xlane.xlu0 %784  ;;  %v1667_v63 = vpop.eup %1666 }
 0x144   :  { %v2356_v35 = vpop.xlane.xlu1 %787  ;;  %v1270_v42 = vmul.f32 0.6931472, %v1667_v63  ;;  %v1669_v27 = vpop.eup %1668 }
 0x145   :  { %v1274_v54 = vmul.f32 0.6931472, %v1669_v27  ;;  %v1671_v60 = vpop.eup %1670 }
 0x146   :  { %v1673_v40 = vpop.eup %1672  ;;  %v1352_v6 = vmul.f32 0.6931472, %v1671_v60  ;;  %v708_v60 = vperm.slane %v2280_v30, %v1904_v43 }
 0x147   :  { %v1276_v59 = vsub.f32 %v1270_v42, %v1274_v54  ;;  %v1356_v9 = vmul.f32 0.6931472, %v1673_v40  ;;  %v1675_v24 = vpop.eup %1674  ;;  %v707_v40 = vperm.slane %v2278_v28, %v1904_v43  ;;  %v724_v28 = vperm.slane %v2298_v46, %v1904_v43 }
 0x148   :  { %208 = vadd.xlane.f32.xlu2 %v207_v47  ;;  %1220 = vadd.xlane.f32.xlu0 %v1219_v37  ;;  %v1677_v42 = vpop.eup %1676  ;;  %v744_v46 = vperm.slane %v2325_v7, %v1904_v43 }
 0x149   :  { %1223 = vadd.xlane.f32.xlu1 %v1222_v41  ;;  %v1278_v62 = vand.u32 2147483647, %v1276_v59  ;;  %v1359_v17 = vsub.f32 %v1352_v6, %v1356_v9  ;;  %v1354_v41 = vmul.f32 0.6931472, %v1675_v24  ;;  %v1358_v27 = vmul.f32 0.6931472, %v1677_v42 }
 0x14a   :  { %v543_v6 = vsel %vm122_vm2, %v2181_v53, 0.0  ;;  %v725_v48 = vsel %vm119_vm15, %v724_v28, %v723_v16 }
 0x14b   :  { %v2378_v61 = vpop.xlane.xlu0 %800  ;;  %vm2395_vm4 = vcmp.gt.f32.partialorder %v1278_v62, 0.001  ;;  %v1361_v25 = vand.u32 2147483647, %v1359_v17  ;;  %v1360_v51 = vsub.f32 %v1354_v41, %v1358_v27  ;;  %v727_v8 = vsel %vm122_vm2, %v725_v48, 0.0 }
 0x14c   :  { %v2382_v34 = vpop.xlane.xlu1 %803  ;;  %vm1282_vm3 = vmand %vm2390_vm12, %vm2395_vm4 }
 0x14d   :  { %v2420_v14 = vsel %vm1282_vm3, %v1276_v59, 0.0  ;;  %vm1363_vm8 = vcmp.gt.f32.partialorder %v1361_v25, 0.001  ;;  %vm2445_vm4 = vmand %vm1346_vm14, %vm1348_vm10  ;;  %v1362_v56 = vand.u32 2147483647, %v1360_v51  ;;  %v459_v59 = vsel %vm122_vm2, %v2129_v0, 0.0 }
 0x14e   :  { %vm1365_vm13 = vmand %vm2411_vm6, %vm1363_vm8  ;;  %v1306_v63 = vsel %vm106_vm0, %v2420_v14, 0.0  ;;  %v709_v0 = vsel %vm119_vm15, %v708_v60, %v707_v40  ;;  %v745_v25 = vsel %vm119_vm15, %v744_v46, %v743_v45  ;;  %v808_v36 = vperm.slane %v2382_v34, %v1904_v43 }
 0x14f   :  { %v1367_v37 = vsel %vm1365_vm13, %v1359_v17, 0.0  ;;  %vm1364_vm12 = vcmp.gt.f32.partialorder %v1362_v56, 0.001  ;;  %v627_v17 = vsel %vm122_vm2, %v2385_v1, 0.0  ;;  %v791_v1 = vperm.slane %v2352_v31, %v1904_v43 }
 0x150   :  { %292 = vadd.xlane.f32.xlu2 %v291_v49  ;;  %1243 = vadd.xlane.f32.xlu0 %v1242_v4  ;;  %v1369_v47 = vmul.f32 %v1367_v37, %v1367_v37  ;;  %vm1366_vm3 = vmand %vm2445_vm4, %vm1364_vm12  ;;  %v1387_v4 = vsel %vm106_vm0, %v1367_v37, 0.0  ;;  %v711_v37 = vsel %vm122_vm2, %v709_v0, 0.0 }
 0x151   :  { %1288 = vadd.xlane.f32.xlu1 %v1287_v38  ;;  %v2460_v62 = vsel %vm1366_vm3, %v1360_v51, 0.0 }
 0x152   :  { %v1371_v58 = vsel %vm106_vm0, %v1369_v47, 0.0  ;;  %v1390_v30 = vsel %vm106_vm0, %v2460_v62, 0.0 }
 0x153   :  { %v413_v20 = vpop.xlane.xlu2 %412  ;;  %v2418_v21 = vpop.xlane.xlu0 %820 }
 0x154   :  { %v414_v22 = vadd.f32 %v413_v20, %v2322_v11  ;;  %v2423_v23 = vpop.xlane.xlu1 %823  ;;  %v375_v11 = vsel %vm122_vm2, %v2079_v12, 0.0  ;;  %v643_v20 = vsel %vm122_vm2, %v2416_v19, 0.0  ;;  %v807_v19 = vperm.slane %v2378_v61, %v1904_v43 }
 0x155   :  { %v828_v41 = vperm.slane %v2423_v23, %v1904_v43  ;;  %v827_v34 = vperm.slane %v2418_v21, %v1904_v43 }
 0x157   :  { %v829_v15 = vsel %vm119_vm15, %v828_v41, %v827_v34 }
 0x158   :  { %376 = vadd.xlane.f32.xlu2 %v375_v11  ;;  %1304 = vadd.xlane.f32.xlu0 %v1303_v39  ;;  %v809_v11 = vsel %vm119_vm15, %v808_v36, %v807_v19 }
 0x159   :  { %1307 = vadd.xlane.f32.xlu1 %v1306_v63 }
 0x15b   :  { %v2440_v50 = vpop.xlane.xlu0 %868 }
 0x15c   :  { %v2442_v12 = vpop.xlane.xlu1 %871  ;;  %v875_v51 = vperm.slane %v2440_v50, %v1904_v43 }
 0x15d   :  { %v876_v47 = vperm.slane %v2442_v12, %v1904_v43 }
 0x160   :  { %460 = vadd.xlane.f32.xlu2 %v459_v59  ;;  %1327 = vadd.xlane.f32.xlu0 %v1326_v52  ;;  %v747_v59 = vsel %vm122_vm2, %v745_v25, 0.0 }
 0x161   :  { %1372 = vadd.xlane.f32.xlu1 %v1371_v58  ;;  %v877_v58 = vsel %vm119_vm15, %v876_v47, %v875_v51 }
 0x163   :  { %v2458_v33 = vpop.xlane.xlu0 %884 }
 0x164   :  { %v2462_v3 = vpop.xlane.xlu1 %887  ;;  %v891_v12 = vperm.slane %v2458_v33, %v1904_v43 }
 0x165   :  { %v892_v60 = vperm.slane %v2462_v3, %v1904_v43 }
 0x168   :  { %544 = vadd.xlane.f32.xlu2 %v543_v6  ;;  %1388 = vadd.xlane.f32.xlu0 %v1387_v4 }
 0x169   :  { %1391 = vadd.xlane.f32.xlu1 %v1390_v30  ;;  %v893_v30 = vsel %vm119_vm15, %v892_v60, %v891_v12 }
 0x16a   :  { %v895_v47 = vsel %vm122_vm2, %v893_v30, 0.0 }
 0x16b   :  { %v497_v9 = vpop.xlane.xlu2 %496  ;;  %v2474_v38 = vpop.xlane.xlu0 %904 }
 0x16c   :  { %v498_v57 = vadd.f32 %v497_v9, %v414_v22  ;;  %v908_v49 = vpop.xlane.xlu1 %907  ;;  %v792_v22 = vperm.slane %v2356_v35, %v1904_v43  ;;  %v911_v6 = vperm.slane %v2474_v38, %v1904_v43 }
 0x16d   :  { %v912_v16 = vperm.slane %v908_v49, %v1904_v43 }
 0x16e   :  { %v793_v24 = vsel %vm119_vm15, %v792_v22, %v791_v1  ;;  %v831_v1 = vsel %vm122_vm2, %v829_v15, 0.0 }
 0x16f   :  { %v795_v28 = vsel %vm122_vm2, %v793_v24, 0.0 }
 0x170   :  { %628 = vadd.xlane.f32.xlu2 %v627_v17  ;;  %v811_v17 = vsel %vm122_vm2, %v809_v11, 0.0  ;;  %v879_v11 = vsel %vm122_vm2, %v877_v58, 0.0 }
 0x173   :  { %v2483_v53 = vpop.xlane.xlu0 %952 }
 0x174   :  { %v2485_v10 = vpop.xlane.xlu1 %955  ;;  %v959_v49 = vperm.slane %v2483_v53, %v1904_v43 }
 0x175   :  { %v960_v46 = vperm.slane %v2485_v10, %v1904_v43 }
 0x177   :  { %v961_v22 = vsel %vm119_vm15, %v960_v46, %v959_v49 }
 0x178   :  { %644 = vadd.xlane.f32.xlu2 %v643_v20  ;;  %v963_v49 = vsel %vm122_vm2, %v961_v22, 0.0 }
 0x17b   :  { %v2494_v7 = vpop.xlane.xlu0 %968 }
 0x17c   :  { %v2496_v55 = vpop.xlane.xlu1 %971 }
 0x17d   :  { %v976_v24 = vperm.slane %v2496_v55, %v1904_v43 }
 0x180   :  { %664 = vadd.xlane.f32.xlu2 %v663_v29  ;;  %v975_v29 = vperm.slane %v2494_v7, %v1904_v43 }
 0x183   :  { %v581_v35 = vpop.xlane.xlu2 %580  ;;  %v2504_v39 = vpop.xlane.xlu0 %988 }
 0x184   :  { %v2506_v31 = vadd.f32 %v581_v35, %v498_v57  ;;  %v2508_v63 = vpop.xlane.xlu1 %991  ;;  %v913_v57 = vsel %vm119_vm15, %v912_v16, %v911_v6  ;;  %v977_v35 = vsel %vm119_vm15, %v976_v24, %v975_v29  ;;  %v995_v55 = vperm.slane %v2504_v39, %v1904_v43 }
 0x188   :  { %712 = vadd.xlane.f32.xlu2 %v711_v37  ;;  %v996_v37 = vperm.slane %v2508_v63, %v1904_v43 }
 0x18b   :  { %v141_v61 = vpop.xlane.xlu2 %140  ;;  %v2516_v42 = vpop.xlane.xlu0 %1036 }
 0x18c   :  { %v2518_v27 = vpop.xlane.xlu1 %1039  ;;  %v1043_v39 = vperm.slane %v2516_v42, %v1904_v43 }
 0x18d   :  { %v1044_v63 = vperm.slane %v2518_v27, %v1904_v43  ;;  %v915_v27 = vsel %vm122_vm2, %v913_v57, 0.0 }
 0x18f   :  { %v1045_v30 = vsel %vm119_vm15, %v1044_v63, %v1043_v39 }
 0x190   :  { %728 = vadd.xlane.f32.xlu2 %v727_v8  ;;  %v997_v8 = vsel %vm119_vm15, %v996_v37, %v995_v55 }
 0x193   :  { %v225_v23 = vpop.xlane.xlu2 %224  ;;  %v2526_v52 = vpop.xlane.xlu0 %1052 }
 0x194   :  { %v226_v21 = vadd.f32 %v225_v23, %v141_v61  ;;  %v2528_v56 = vpop.xlane.xlu1 %1055  ;;  %v1059_v16 = vperm.slane %v2526_v52, %v1904_v43 }
 0x198   :  { %748 = vadd.xlane.f32.xlu2 %v747_v59 }
 0x19b   :  { %v309_v40 = vpop.xlane.xlu2 %308  ;;  %v2536_v50 = vpop.xlane.xlu0 %1072 }
 0x19c   :  { %v310_v0 = vadd.f32 %v309_v40, %v226_v21  ;;  %v2538_v4 = vpop.xlane.xlu1 %1075  ;;  %v1079_v52 = vperm.slane %v2536_v50, %v1904_v43 }
 0x1a0   :  { %796 = vadd.xlane.f32.xlu2 %v795_v28 }
 0x1a3   :  { %v393_v3 = vpop.xlane.xlu2 %392  ;;  %v2545_v9 = vpop.xlane.xlu0 %1120 }
 0x1a4   :  { %v394_v33 = vadd.f32 %v393_v3, %v310_v0  ;;  %v2547_v48 = vpop.xlane.xlu1 %1123  ;;  %v1127_v50 = vperm.slane %v2545_v9, %v1904_v43 }
 0x1a8   :  { %812 = vadd.xlane.f32.xlu2 %v811_v17 }
 0x1ab   :  { %v477_v45 = vpop.xlane.xlu2 %476  ;;  %v1137_v38 = vpop.xlane.xlu0 %1136 }
 0x1ac   :  { %v478_v25 = vadd.f32 %v477_v45, %v394_v33  ;;  %v1140_v20 = vpop.xlane.xlu1 %1139  ;;  %v1143_v41 = vperm.slane %v1137_v38, %v1904_v43 }
 0x1ad   :  { %v1144_v7 = vperm.slane %v1140_v20, %v1904_v43 }
 0x1af   :  { %v1145_v51 = vsel %vm119_vm15, %v1144_v7, %v1143_v41 }
 0x1b0   :  { %832 = vadd.xlane.f32.xlu2 %v831_v1  ;;  %v1147_v23 = vsel %vm122_vm2, %v1145_v51, 0.0  ;;  %v1047_v51 = vsel %vm122_vm2, %v1045_v30, 0.0  ;;  %v1529_v30 = vsel %vm2244_vm1, 1.0, %v1678_v5  ;;  %vm72_vm1 = vcmask 1024  }
 0x1b1   :  { %1148 = vadd.xlane.f32.xlu1 %v1147_v23  ;;  %74 = vst.msk [vmem:[%s2734_s3] sm:$0x3] %vm72_vm1, %v1678_v5 }
 0x1b2   :  { %73 = vst.msk [vmem:[%s2735_s2] sm:$0x3] %vm72_vm1, %v1678_v5 }
 0x1b3   :  { %v561_v10 = vpop.xlane.xlu2 %560  ;;  %v2561_v36 = vpop.xlane.xlu0 %1159  ;;  %75 = vst.msk [vmem:[%s2736_s4] sm:$0x3] %vm72_vm1, %v1678_v5 }
 0x1b4   :  { %v2563_v53 = vadd.f32 %v561_v10, %v478_v25  ;;  %v2565_v19 = vpop.xlane.xlu1 %1204  ;;  %v979_v10 = vsel %vm122_vm2, %v977_v35, 0.0 }
 0x1b8   :  { %880 = vadd.xlane.f32.xlu2 %v879_v11 }
 0x1bb   :  { %v209_v34 = vpop.xlane.xlu2 %208  ;;  %v1221_v61 = vpop.xlane.xlu0 %1220 }
 0x1bc   :  { %v1224_v15 = vpop.xlane.xlu1 %1223  ;;  %v210_v21 = vadd.f32 %v209_v34, %v2195_v13  ;;  %v1227_v59 = vperm.slane %v1221_v61, %v1904_v43  ;;  %v1060_v13 = vperm.slane %v2528_v56, %v1904_v43  ;;  %v1080_v56 = vperm.slane %v2538_v4, %v1904_v43 }
 0x1bd   :  { %v1228_v58 = vperm.slane %v1224_v15, %v1904_v43  ;;  %v1128_v4 = vperm.slane %v2547_v48, %v1904_v43  ;;  %v999_v61 = vsel %vm122_vm2, %v997_v8, 0.0 }
 0x1be   :  { %v1061_v57 = vsel %vm119_vm15, %v1060_v13, %v1059_v16  ;;  %v1081_v22 = vsel %vm119_vm15, %v1080_v56, %v1079_v52  ;;  %v1370_v52 = vmul.f32 %v2460_v62, %v2460_v62 }
 0x1bf   :  { %v1229_v42 = vsel %vm119_vm15, %v1228_v58, %v1227_v59  ;;  %v1129_v34 = vsel %vm119_vm15, %v1128_v4, %v1127_v50  ;;  %v1063_v39 = vsel %vm122_vm2, %v1061_v57, 0.0  ;;  %v1083_v58 = vsel %vm122_vm2, %v1081_v22, 0.0 }
 0x1c0   :  { %896 = vadd.xlane.f32.xlu2 %v895_v47  ;;  %v1231_v28 = vsel %vm122_vm2, %v1229_v42, 0.0  ;;  %v1155_v42 = vsel %vm106_vm0, %v1529_v30, 0.0  ;;  %v1164_v30 = vperm.slane %v2561_v36, %v1904_v43 }
 0x1c1   :  { %1232 = vadd.xlane.f32.xlu1 %v1231_v28 }
 0x1c3   :  { %v293_v60 = vpop.xlane.xlu2 %292  ;;  %v2586_v12 = vpop.xlane.xlu0 %1243 }
 0x1c4   :  { %v294_v40 = vadd.f32 %v293_v60, %v210_v21  ;;  %v2588_v0 = vpop.xlane.xlu1 %1288  ;;  %v1248_v36 = vperm.slane %v2586_v12, %v1904_v43 }
 0x1c8   :  { %916 = vadd.xlane.f32.xlu2 %v915_v27 }
 0x1cb   :  { %v377_v6 = vpop.xlane.xlu2 %376  ;;  %v1305_v3 = vpop.xlane.xlu0 %1304 }
 0x1cc   :  { %v378_v33 = vadd.f32 %v377_v6, %v294_v40  ;;  %v1308_v17 = vpop.xlane.xlu1 %1307  ;;  %v1311_v46 = vperm.slane %v1305_v3, %v1904_v43  ;;  %v1131_v40 = vsel %vm122_vm2, %v1129_v34, 0.0  ;;  %v1535_v6 = vsel %vm2292_vm11, 1.0, %v1678_v5 }
 0x1cd   :  { %v1312_v45 = vperm.slane %v1308_v17, %v1904_v43  ;;  %v1239_v17 = vsel %vm106_vm0, %v1535_v6, 0.0 }
 0x1cf   :  { %v1313_v38 = vsel %vm119_vm15, %v1312_v45, %v1311_v46  ;;  %v1541_v45 = vsel %vm2348_vm9, 1.0, %v1678_v5 }
 0x1d0   :  { %964 = vadd.xlane.f32.xlu2 %v963_v49  ;;  %v1315_v25 = vsel %vm122_vm2, %v1313_v38, 0.0  ;;  %v1323_v56 = vsel %vm106_vm0, %v1541_v45, 0.0 }
 0x1d1   :  { %1316 = vadd.xlane.f32.xlu1 %v1315_v25 }
 0x1d3   :  { %v461_v20 = vpop.xlane.xlu2 %460  ;;  %v2608_v1 = vpop.xlane.xlu0 %1327 }
 0x1d4   :  { %v462_v24 = vadd.f32 %v461_v20, %v378_v33  ;;  %v2610_v29 = vpop.xlane.xlu1 %1372  ;;  %v1548_v33 = vsel %vm2445_vm4, 1.0, %v1678_v5 }
 0x1d5   :  { %v1410_v46 = vsel %vm106_vm0, %v1548_v33, 0.0 }
 0x1d6   :  { %1411 = vadd.xlane.f32.xlu0 %v1410_v46 }
 0x1d8   :  { %980 = vadd.xlane.f32.xlu2 %v979_v10 }
 0x1db   :  { %v545_v11 = vpop.xlane.xlu2 %544  ;;  %v1389_v37 = vpop.xlane.xlu0 %1388 }
 0x1dc   :  { %v546_v55 = vadd.f32 %v545_v11, %v462_v24  ;;  %v1392_v7 = vpop.xlane.xlu1 %1391  ;;  %v1395_v41 = vperm.slane %v1389_v37, %v1904_v43  ;;  %v1547_v24 = vsel %vm2411_vm6, 1.0, %v1678_v5 }
 0x1dd   :  { %v1396_v15 = vperm.slane %v1392_v7, %v1904_v43  ;;  %v1407_v26 = vsel %vm106_vm0, %v1547_v24, 0.0 }
 0x1df   :  { %v1397_v35 = vsel %vm119_vm15, %v1396_v15, %v1395_v41 }
 0x1e0   :  { %1000 = vadd.xlane.f32.xlu2 %v999_v61  ;;  %v1399_v48 = vsel %vm122_vm2, %v1397_v35, 0.0 }
 0x1e1   :  { %1400 = vadd.xlane.f32.xlu1 %v1399_v48 }
 0x1e3   :  { %v629_v9 = vpop.xlane.xlu2 %628 }
 0x1e4   :  { %v630_v47 = vadd.f32 %v629_v9, %v546_v55 }
 0x1e8   :  { %1048 = vadd.xlane.f32.xlu2 %v1047_v51 }
 0x1eb   :  { %v645_v23 = vpop.xlane.xlu2 %644 }
 0x1ec   :  { %v646_v63 = vadd.f32 %v645_v23, %v2563_v53 }
 0x1f0   :  { %1064 = vadd.xlane.f32.xlu2 %v1063_v39 }
 0x1f3   :  { %v665_v8 = vpop.xlane.xlu2 %664 }
 0x1f4   :  { %v666_v21 = vadd.f32 %v665_v8, %v2506_v31  ;;  %v1202_v31 = vmul.f32 %v2354_v32, %v2354_v32  ;;  %v1286_v32 = vmul.f32 %v2420_v14, %v2420_v14  ;;  %v1374_v14 = vsel %vm106_vm0, %v1370_v52, 0.0  ;;  %v1427_v8 = vld [vmem:[%s2734_s3] sm:$0x3] }
 0x1f6   :  { %v1206_v16 = vsel %vm106_vm0, %v1202_v31, 0.0  ;;  %v1290_v44 = vsel %vm106_vm0, %v1286_v32, 0.0 }
 0x1f8   :  { %1084 = vadd.xlane.f32.xlu2 %v1083_v58 }
 0x1fb   :  { %v713_v59 = vpop.xlane.xlu2 %712 }
 0x1fc   :  { %v714_v60 = vadd.f32 %v713_v59, %v630_v47 }
 0x200   :  { %1132 = vadd.xlane.f32.xlu2 %v1131_v40 }
 0x203   :  { %v729_v27 = vpop.xlane.xlu2 %728 }
 0x204   :  { %v730_v53 = vadd.f32 %v729_v27, %v646_v63 }
 0x208   :  { %1156 = vadd.xlane.f32.xlu2 %v1155_v42 }
 0x20b   :  { %v749_v28 = vpop.xlane.xlu2 %748 }
 0x20c   :  { %v750_v13 = vadd.f32 %v749_v28, %v666_v21  ;;  %v1211_v28 = vperm.slane %v2565_v19, %v1904_v43  ;;  %v1295_v19 = vperm.slane %v2588_v0, %v1904_v43 }
 0x210   :  { %1207 = vadd.xlane.f32.xlu2 %v1206_v16 }
 0x213   :  { %v797_v3 = vpop.xlane.xlu2 %796 }
 0x214   :  { %v798_v2 = vadd.f32 %v797_v3, %v714_v60 }
 0x218   :  { %1240 = vadd.xlane.f32.xlu2 %v1239_v17 }
 0x21b   :  { %v813_v57 = vpop.xlane.xlu2 %812 }
 0x21c   :  { %v814_v49 = vadd.f32 %v813_v57, %v730_v53 }
 0x220   :  { %1291 = vadd.xlane.f32.xlu2 %v1290_v44  ;;  %v1332_v44 = vperm.slane %v2608_v1, %v1904_v43 }
 0x223   :  { %v833_v54 = vpop.xlane.xlu2 %832 }
 0x224   :  { %v834_v38 = vadd.f32 %v833_v54, %v750_v13  ;;  %v1149_v37 = vpop.xlane.xlu1 %1148 }
 0x228   :  { %1324 = vadd.xlane.f32.xlu2 %v1323_v56  ;;  %v1379_v56 = vperm.slane %v2610_v29, %v1904_v43 }
 0x22b   :  { %v881_v25 = vpop.xlane.xlu2 %880 }
 0x22c   :  { %v882_v20 = vadd.f32 %v881_v25, %v798_v2 }
 0x230   :  { %1375 = vadd.xlane.f32.xlu2 %v1374_v14 }
 0x233   :  { %v897_v22 = vpop.xlane.xlu2 %896 }
 0x234   :  { %v1233_v7 = vpop.xlane.xlu1 %1232  ;;  %v898_v15 = vadd.f32 %v897_v22, %v814_v49 }
 0x238   :  { %1408 = vadd.xlane.f32.xlu2 %v1407_v26 }
 0x23b   :  { %v917_v10 = vpop.xlane.xlu2 %916 }
 0x23c   :  { %v918_v4 = vadd.f32 %v917_v10, %v834_v38 }
 0x243   :  { %v965_v50 = vpop.xlane.xlu2 %964 }
 0x244   :  { %v966_v11 = vadd.f32 %v965_v50, %v882_v20  ;;  %v1317_v61 = vpop.xlane.xlu1 %1316 }
 0x249   :  { %v1412_v14 = vpop.xlane.xlu0 %1411 }
 0x24a   :  { %v1416_v24 = vperm.slane %v1412_v14, %v1904_v43 }
 0x24b   :  { %v981_v62 = vpop.xlane.xlu2 %980 }
 0x24c   :  { %v982_v35 = vadd.f32 %v981_v62, %v898_v15 }
 0x253   :  { %v1001_v55 = vpop.xlane.xlu2 %1000 }
 0x254   :  { %v1002_v18 = vadd.f32 %v1001_v55, %v918_v4  ;;  %v1401_v23 = vpop.xlane.xlu1 %1400 }
 0x25b   :  { %v1049_v41 = vpop.xlane.xlu2 %1048 }
 0x25c   :  { %v1050_v34 = vadd.f32 %v1049_v41, %v966_v11 }
 0x263   :  { %v1065_v48 = vpop.xlane.xlu2 %1064 }
 0x264   :  { %v1066_v9 = vadd.f32 %v1065_v48, %v982_v35  ;;  %v1430_v35 = vld [vmem:[%s2736_s4] sm:$0x3] }
 0x266   :  { %v1150_v47 = vadd.f32 %v1149_v37, %v1066_v9 }
 0x268   :  { %v1234_v51 = vadd.f32 %v1233_v7, %v1150_v47 }
 0x26a   :  { %v1318_v63 = vadd.f32 %v1317_v61, %v1234_v51 }
 0x26b   :  { %v1085_v39 = vpop.xlane.xlu2 %1084 }
 0x26c   :  { %v2667_v21 = vadd.f32 %v1085_v39, %v1002_v18  ;;  %v1402_v58 = vadd.f32 %v1401_v23, %v1318_v63  ;;  %v1423_v18 = vld [vmem:[%s2735_s2] sm:$0x3] }
 0x26e   :  { %v1428_v59 = vadd.f32 %v1427_v8, %v1402_v58 }
 0x270   :  { %1429 = vst.msk [vmem:[%s2734_s3] sm:$0x3] %vm72_vm1, %v1428_v59 }
 0x273   :  { %v1133_v60 = vpop.xlane.xlu2 %1132 }
 0x274   :  { %v1134_v40 = vadd.f32 %v1133_v60, %v1050_v34 }
 0x27b   :  { %v1157_v27 = vpop.xlane.xlu2 %1156 }
 0x27c   :  { %v1163_v53 = vperm.slane %v1157_v27, %v1904_v43 }
 0x27e   :  { %v1165_v42 = vsel %vm119_vm15, %v1164_v30, %v1163_v53 }
 0x27f   :  { %v1167_v31 = vsel %vm122_vm2, %v1165_v42, 0.0 }
 0x280   :  { %1168 = vadd.xlane.f32.xlu2 %v1167_v31 }
 0x283   :  { %v1208_v13 = vpop.xlane.xlu2 %1207 }
 0x284   :  { %v1212_v16 = vperm.slane %v1208_v13, %v1904_v43 }
 0x286   :  { %v1213_v6 = vsel %vm119_vm15, %v1212_v16, %v1211_v28 }
 0x287   :  { %v1215_v3 = vsel %vm122_vm2, %v1213_v6, 0.0 }
 0x288   :  { %1216 = vadd.xlane.f32.xlu0 %v1215_v3 }
 0x28b   :  { %v1241_v2 = vpop.xlane.xlu2 %1240 }
 0x28c   :  { %v1247_v33 = vperm.slane %v1241_v2, %v1904_v43 }
 0x28e   :  { %v1249_v17 = vsel %vm119_vm15, %v1248_v36, %v1247_v33 }
 0x28f   :  { %v1251_v46 = vsel %vm122_vm2, %v1249_v17, 0.0 }
 0x290   :  { %1252 = vadd.xlane.f32.xlu2 %v1251_v46 }
 0x293   :  { %v1292_v32 = vpop.xlane.xlu2 %1291 }
 0x294   :  { %v1296_v57 = vperm.slane %v1292_v32, %v1904_v43 }
 0x296   :  { %v1297_v12 = vsel %vm119_vm15, %v1296_v57, %v1295_v19 }
 0x297   :  { %v1299_v49 = vsel %vm122_vm2, %v1297_v12, 0.0 }
 0x298   :  { %1300 = vadd.xlane.f32.xlu0 %v1299_v49 }
 0x29b   :  { %v1325_v45 = vpop.xlane.xlu2 %1324 }
 0x29c   :  { %v1331_v0 = vperm.slane %v1325_v45, %v1904_v43 }
 0x29e   :  { %v1333_v54 = vsel %vm119_vm15, %v1332_v44, %v1331_v0 }
 0x29f   :  { %v1335_v38 = vsel %vm122_vm2, %v1333_v54, 0.0 }
 0x2a0   :  { %1336 = vadd.xlane.f32.xlu2 %v1335_v38 }
 0x2a3   :  { %v1376_v52 = vpop.xlane.xlu2 %1375 }
 0x2a4   :  { %v1380_v1 = vperm.slane %v1376_v52, %v1904_v43 }
 0x2a6   :  { %v1381_v25 = vsel %vm119_vm15, %v1380_v1, %v1379_v56 }
 0x2a7   :  { %v1383_v20 = vsel %vm122_vm2, %v1381_v25, 0.0 }
 0x2a8   :  { %1384 = vadd.xlane.f32.xlu0 %v1383_v20 }
 0x2ab   :  { %v1409_v22 = vpop.xlane.xlu2 %1408 }
 0x2ac   :  { %v1415_v5 = vperm.slane %v1409_v22, %v1904_v43 }
 0x2ae   :  { %v1417_v26 = vsel %vm119_vm15, %v1416_v24, %v1415_v5 }
 0x2af   :  { %v1419_v10 = vsel %vm122_vm2, %v1417_v26, 0.0 }
 0x2b0   :  { %1420 = vadd.xlane.f32.xlu2 %v1419_v10 }
 0x2f3   :  { %v1169_v29 = vpop.xlane.xlu2 %1168 }
 0x2f4   :  { %v1170_v43 = vadd.f32 %v1169_v29, %v2667_v21 }
 0x2fb   :  { %v1217_v4 = vpop.xlane.xlu0 %1216 }
 0x2fc   :  { %v1218_v62 = vadd.f32 %v1217_v4, %v1134_v40 }
 0x303   :  { %v1253_v50 = vpop.xlane.xlu2 %1252 }
 0x304   :  { %v1254_v61 = vadd.f32 %v1253_v50, %v1170_v43 }
 0x30b   :  { %v1301_v11 = vpop.xlane.xlu0 %1300 }
 0x30c   :  { %v1302_v37 = vadd.f32 %v1301_v11, %v1218_v62 }
 0x313   :  { %v1337_v55 = vpop.xlane.xlu2 %1336 }
 0x314   :  { %v1338_v15 = vadd.f32 %v1337_v55, %v1254_v61 }
 0x31b   :  { %v1385_v7 = vpop.xlane.xlu0 %1384 }
 0x31c   :  { %v1386_v41 = vadd.f32 %v1385_v7, %v1302_v37 }
 0x31e   :  { %v1424_v34 = vadd.f32 %v1423_v18, %v1386_v41 }
 0x320   :  { %1426 = vst.msk [vmem:[%s2735_s2] sm:$0x3] %vm72_vm1, %v1424_v34 }
 0x323   :  { %v1421_v48 = vpop.xlane.xlu2 %1420 }
 0x324   :  { %v1422_v9 = vadd.f32 %v1421_v48, %v1338_v15 }
 0x326   :  { %v1431_v47 = vadd.f32 %v1430_v35, %v1422_v9 }
 0x328   :  { %1432 = vst.msk [vmem:[%s2736_s4] sm:$0x3] %vm72_vm1, %v1431_v47 }

</bundles_post_ra>
